<compile_context>
chip_gen: v7x
topology: tpu7x:2x2x1
jax: 0.10.0
libtpu: 0.0.40
codegen_flags: <defaults>
</compile_context>

<pallas_src>
import functools

import jax
import jax.numpy as jnp
from jax.experimental import pallas as pl
from jax.experimental.pallas import tpu as pltpu

NUM_GROUPS = 32
GN_EPS = 1e-5  # nn.GroupNorm default eps


def _has_bf16_eup():
    """bf16 exp only on chips with a bf16 EUP (v6e / v7x); f32 elsewhere."""
    try:
        kind = jax.devices()[0].device_kind.lower()
    except Exception:
        return False
    return ("v6" in kind) or ("v7" in kind)


def _linear_transformer_kernel(x_ref, gmask_ref, gamma_ref, beta_ref,
                               wq_ref, bq_ref, wkv_ref, bkv_ref,
                               wp_ref, bp_ref, o_ref,
                               *, num_heads, ch_per_head, c_out, tq, n_tiles,
                               add_residual, bf16_exp):
    x = x_ref[0]                                   # (N, Cin) f32, one batch elem
    hid = num_heads * ch_per_head
    d = ch_per_head

    # ---- GroupNorm(32, affine), folded to h = x * a + b_aff -----------------
    s = jnp.sum(x, axis=0, keepdims=True)          # (1, C) per-channel sum
    ss = jnp.sum(x * x, axis=0, keepdims=True)     # (1, C) per-channel sum-sq
    # one (2,C)x(C,C) matmul; gmask pre-scaled by 1/(N*cg) -> E[x], E[x^2]
    stats = jnp.dot(jnp.concatenate([s, ss], axis=0), gmask_ref[...],
                    preferred_element_type=jnp.float32)        # (2, C)
    mean = stats[0:1, :]
    var = jnp.maximum(stats[1:2, :] - mean * mean, 0.0)        # clamp: no NaN
    a = jax.lax.rsqrt(var + GN_EPS) * gamma_ref[...]           # (1, C)
    b_aff = beta_ref[...] - mean * a                           # (1, C)

    # ---- K / V over the full sequence, computed once -------------------------
    hb = (x * a + b_aff).astype(jnp.bfloat16)                  # (N, C) bf16
    kv = jnp.dot(hb, wkv_ref[...],
                 preferred_element_type=jnp.float32) + bkv_ref[...]   # (N, 2*hid)
    # per-head slices + bf16 casts hoisted OUT of the q-tile loop
    k_h = [kv[:, hd * d:(hd + 1) * d].astype(jnp.bfloat16) for hd in range(num_heads)]
    v_h = [kv[:, hid + hd * d: hid + (hd + 1) * d].astype(jnp.bfloat16)
           for hd in range(num_heads)]
    wp_h = [wp_ref[pl.ds(hd * d, d), :] for hd in range(num_heads)]  # (d, Cout) bf16

    wq = wq_ref[...]                               # (C, hid) bf16, scale folded
    bq = bq_ref[...]                               # (1, hid)  f32 (scale folded)
    bp = bp_ref[...]                               # (1, Cout) f32
    dn = (((1,), (1,)), ((), ()))                  # contract last dims (q . k^T)

    def tile_body(t, carry):
        r0 = pl.multiple_of(t * tq, tq)
        x_t = x_ref[0, pl.ds(r0, tq), :]           # (tq, C) f32 (ref slice)
        h_t = (x_t * a + b_aff).astype(jnp.bfloat16)
        q_t = (jnp.dot(h_t, wq, preferred_element_type=jnp.float32)
               + bq).astype(jnp.bfloat16)          # (tq, hid) bf16

        # lane-dense f32 accumulator; bias (+ residual) folded into the init
        if add_residual:
            acc = x_t + bp
        else:
            acc = jnp.broadcast_to(bp, (tq, c_out)).astype(jnp.float32)

        for hd in range(num_heads):                # static unroll: heads small
            qh = q_t[:, hd * d:(hd + 1) * d]       # (tq, d) bf16
            logits = jax.lax.dot_general(qh, k_h[hd], dn,
                                         preferred_element_type=jnp.float32)
            m = jnp.max(logits, axis=-1, keepdims=True)
            z = logits - m
            if bf16_exp:                           # v6e/v7x: bf16 EUP (~2x exp)
                p = jnp.exp(z.astype(jnp.bfloat16))
                l = jnp.sum(p.astype(jnp.float32), axis=-1, keepdims=True)
            else:                                  # v5e & older: f32-only EUP
                pf = jnp.exp(z)
                l = jnp.sum(pf, axis=-1, keepdims=True)
                p = pf.astype(jnp.bfloat16)
            oh = jnp.dot(p, v_h[hd], preferred_element_type=jnp.float32)  # (tq, d)
            # deferred softmax normalization; reciprocal rides the EUP slot
            ohn = (oh * pl.reciprocal(l, approx=True)).astype(jnp.bfloat16)
            acc = acc + jnp.dot(ohn, wp_h[hd],
                                preferred_element_type=jnp.float32)       # (tq, Cout)

        o_ref[0, pl.ds(r0, tq), :] = acc           # lane-dense f32 store
        return carry

    jax.lax.fori_loop(0, n_tiles, tile_body, 0)


def linear_transformer_attention(x_nchw, params, *, num_heads, ch_per_head):
    """x_nchw: (B, C, H, W) float32.  params: dict from init_params."""
    b, c_in, hgt, wid = x_nchw.shape
    n = hgt * wid
    hid = num_heads * ch_per_head
    c_out = params["wp"].shape[1]
    assert c_in % NUM_GROUPS == 0

    # channels-last, spatially-flattened layout for the kernel.
    # TODO(synk): keep activations channels-last across the network to avoid
    # these two HBM round-trip transposes.
    x = jnp.transpose(x_nchw.reshape(b, c_in, n), (0, 2, 1))   # (B, N, Cin)

    # Fold the softmax scale into the q projection: the module multiplies BOTH
    # q and k by d**-0.25, i.e. a combined d**-0.5 on the logits.
    scale2 = float(ch_per_head) ** -0.5
    wq = (params["wq"] * scale2).astype(jnp.bfloat16)          # (Cin, hid)
    bq = params["bq"] * scale2                                 # (1, hid) f32
    wkv = jnp.concatenate([params["wk"], params["wv"]],
                          axis=1).astype(jnp.bfloat16)         # (Cin, 2*hid)
    bkv = jnp.concatenate([params["bk"], params["bv"]], axis=1)  # (1, 2*hid) f32
    wp = params["wp"].astype(jnp.bfloat16)                     # (hid, Cout)
    bp = params["bp"]                                          # (1, Cout) f32

    # GroupNorm same-group indicator, pre-scaled by 1/(N * ch_per_group) so the
    # kernel's single stats matmul yields E[x] / E[x^2] directly.
    cg = c_in // NUM_GROUPS
    ch_idx = jnp.arange(c_in)
    gmask = (ch_idx[:, None] // cg == ch_idx[None, :] // cg).astype(jnp.float32)
    gmask = gmask / float(n * cg)

    # q-row tile: bounds the logits buffer to (tq, N) instead of (N, N).
    tq = 128 if (n > 128 and n % 128 == 0) else n
    assert n % tq == 0
    n_tiles = n // tq

    kernel = functools.partial(
        _linear_transformer_kernel,
        num_heads=num_heads, ch_per_head=ch_per_head, c_out=c_out,
        tq=tq, n_tiles=n_tiles, add_residual=(c_out == c_in),
        bf16_exp=_has_bf16_eup())

    const2d = lambda shape: pl.BlockSpec(shape, lambda i: (0, 0))

    out = pl.pallas_call(
        kernel,
        out_shape=jax.ShapeDtypeStruct((b, n, c_out), jnp.float32),
        grid=(b,),
        in_specs=[
            pl.BlockSpec((1, n, c_in), lambda i: (i, 0, 0)),   # x
            const2d((c_in, c_in)),                             # gmask (pre-scaled)
            const2d((1, c_in)),                                # gamma
            const2d((1, c_in)),                                # beta
            const2d((c_in, hid)),                              # Wq  (bf16, scaled)
            const2d((1, hid)),                                 # bq  (scaled)
            const2d((c_in, 2 * hid)),                          # Wkv (bf16)
            const2d((1, 2 * hid)),                             # bkv
            const2d((hid, c_out)),                             # Wproj (bf16)
            const2d((1, c_out)),                               # bproj
        ],
        out_specs=pl.BlockSpec((1, n, c_out), lambda i: (i, 0, 0)),
        compiler_params=pltpu.CompilerParams(
            dimension_semantics=("parallel",),
            vmem_limit_bytes=32 * 1024 * 1024),
    )(x, gmask, params["gamma"], params["beta"], wq, bq, wkv, bkv, wp, bp)

    return jnp.transpose(out, (0, 2, 1)).reshape(b, c_out, hgt, wid)


def init_params(key, c_in, hid, c_out):
    """Deterministic synthetic parameters.  1x1 conv weights stored pre-transposed
    as (C_in, C_out) so the kernel computes h @ W^T directly.  NOTE: the PyTorch
    module zero-inits `to_out`; random weights are used here so the validation is
    non-trivial (init value is not part of forward semantics)."""
    ks = jax.random.split(key, 10)
    s = 0.05
    return {
        "gamma": 1.0 + s * jax.random.normal(ks[0], (1, c_in), jnp.float32),
        "beta":  s * jax.random.normal(ks[1], (1, c_in), jnp.float32),
        "wq": s * jax.random.normal(ks[2], (c_in, hid), jnp.float32),
        "bq": s * jax.random.normal(ks[3], (1, hid), jnp.float32),
        "wk": s * jax.random.normal(ks[4], (c_in, hid), jnp.float32),
        "bk": s * jax.random.normal(ks[5], (1, hid), jnp.float32),
        "wv": s * jax.random.normal(ks[6], (c_in, hid), jnp.float32),
        "bv": s * jax.random.normal(ks[7], (1, hid), jnp.float32),
        "wp": s * jax.random.normal(ks[8], (hid, c_out), jnp.float32),
        "bp": s * jax.random.normal(ks[9], (1, c_out), jnp.float32),
    }


def _reference(x_nchw, params, num_heads, ch_per_head):
    """Pure-JAX f32 reference mirroring the PyTorch LinearTransformer forward."""
    b, c, hgt, wid = x_nchw.shape
    n = hgt * wid
    cg = c // NUM_GROUPS
    xg = x_nchw.reshape(b, NUM_GROUPS, cg, hgt, wid)
    mean = jnp.mean(xg, axis=(2, 3, 4), keepdims=True)
    var = jnp.mean((xg - mean) ** 2, axis=(2, 3, 4), keepdims=True)
    xn = ((xg - mean) / jnp.sqrt(var + GN_EPS)).reshape(b, c, hgt, wid)
    hh = xn * params["gamma"].reshape(1, c, 1, 1) + params["beta"].reshape(1, c, 1, 1)
    hf = jnp.transpose(hh.reshape(b, c, n), (0, 2, 1))          # (B, N, C)
    q = hf @ params["wq"] + params["bq"]
    k = hf @ params["wk"] + params["bk"]
    v = hf @ params["wv"] + params["bv"]
    hid = num_heads * ch_per_head
    scale = float(ch_per_head) ** -0.25
    qh = q.reshape(b, n, num_heads, ch_per_head)
    kh = k.reshape(b, n, num_heads, ch_per_head)
    vh = v.reshape(b, n, num_heads, ch_per_head)
    logits = jnp.einsum("bihd,bjhd->bhij", qh * scale, kh * scale)
    attn = jax.nn.softmax(logits, axis=-1)
    o = jnp.einsum("bhij,bjhd->bihd", attn, vh).reshape(b, n, hid)
    proj = o @ params["wp"] + params["bp"]                       # (B, N, Cout)
    out = jnp.transpose(proj, (0, 2, 1)).reshape(b, -1, hgt, wid)
    return x_nchw + out                                          # c_out == c_in here


if __name__ == "__main__":
    key = jax.random.PRNGKey(0)
    # GroupNorm(32) needs C % 32 == 0; C = hid = 128 keeps every store lane-dense.
    B, C, H, W = 2, 128, 16, 16
    NUM_HEADS, CH_PER_HEAD = 4, 32          # hid_channels = 128
    kx, kp = jax.random.split(key)
    x = jax.random.normal(kx, (B, C, H, W), jnp.float32)
    params = init_params(kp, C, NUM_HEADS * CH_PER_HEAD, C)

    out = linear_transformer_attention(x, params,
                                       num_heads=NUM_HEADS, ch_per_head=CH_PER_HEAD)
    out = jax.block_until_ready(out)

    ref = _reference(x, params, NUM_HEADS, CH_PER_HEAD)
    assert out.shape == (B, C, H, W)
    # bf16 matmuls (f32 accumulation) + bf16 exp on v6e/v7x + approx reciprocal
    # vs. a pure-f32 reference.
    err = float(jnp.max(jnp.abs(out - ref)))
    assert err < 2e-2, err

    print("KERNEL_OK")
</pallas_src>

<mosaic_0001>
module attributes {stable_mosaic.version = 11 : i64} {
  func.func @_linear_transformer_kernel(%arg0: i32, %arg1: memref<1x256x128xf32, #tpu.memory_space<vmem>>, %arg2: memref<128x128xf32, #tpu.memory_space<vmem>>, %arg3: memref<1x128xf32, #tpu.memory_space<vmem>>, %arg4: memref<1x128xf32, #tpu.memory_space<vmem>>, %arg5: memref<128x128xbf16, #tpu.memory_space<vmem>>, %arg6: memref<1x128xf32, #tpu.memory_space<vmem>>, %arg7: memref<128x256xbf16, #tpu.memory_space<vmem>>, %arg8: memref<1x256xf32, #tpu.memory_space<vmem>>, %arg9: memref<128x128xbf16, #tpu.memory_space<vmem>>, %arg10: memref<1x128xf32, #tpu.memory_space<vmem>>, %arg11: memref<1x256x128xf32, #tpu.memory_space<vmem>>) attributes {dimension_semantics = [#tpu.dimension_semantics<parallel>], iteration_bounds = array<i64: 2>, scalar_prefetch = 0 : i64, scratch_operands = 0 : i64, tpu.core_type = #tpu.core_type<tc>, window_params = [{transform_indices = @transform_0, window_bounds = array<i64: 1, 256, 128>}, {pipeline_mode = #tpu.pipeline_mode<synchronous>, transform_indices = @transform_1, window_bounds = array<i64: 128, 128>}, {pipeline_mode = #tpu.pipeline_mode<synchronous>, transform_indices = @transform_2, window_bounds = array<i64: 1, 128>}, {pipeline_mode = #tpu.pipeline_mode<synchronous>, transform_indices = @transform_3, window_bounds = array<i64: 1, 128>}, {pipeline_mode = #tpu.pipeline_mode<synchronous>, transform_indices = @transform_4, window_bounds = array<i64: 128, 128>}, {pipeline_mode = #tpu.pipeline_mode<synchronous>, transform_indices = @transform_5, window_bounds = array<i64: 1, 128>}, {pipeline_mode = #tpu.pipeline_mode<synchronous>, transform_indices = @transform_6, window_bounds = array<i64: 128, 256>}, {pipeline_mode = #tpu.pipeline_mode<synchronous>, transform_indices = @transform_7, window_bounds = array<i64: 1, 256>}, {pipeline_mode = #tpu.pipeline_mode<synchronous>, transform_indices = @transform_8, window_bounds = array<i64: 128, 128>}, {pipeline_mode = #tpu.pipeline_mode<synchronous>, transform_indices = @transform_9, window_bounds = array<i64: 1, 128>}, {transform_indices = @transform_10, window_bounds = array<i64: 1, 256, 128>}]} {
    %c0 = arith.constant 0 : index
    %c0_0 = arith.constant 0 : index
    %c0_1 = arith.constant 0 : index
    %0 = vector.load %arg1[%c0, %c0_0, %c0_1] : memref<1x256x128xf32, #tpu.memory_space<vmem>>, vector<1x256x128xf32>
    %1 = vector.shape_cast %0 : vector<1x256x128xf32> to vector<256x128xf32>
    %cst = arith.constant dense<0.000000e+00> : vector<128xf32>
    %2 = vector.multi_reduction <add>, %1, %cst [0] : vector<256x128xf32> to vector<128xf32>
    %3 = vector.shape_cast %2 : vector<128xf32> to vector<1x128xf32>
    %4 = arith.mulf %1, %1 : vector<256x128xf32>
    %cst_2 = arith.constant dense<0.000000e+00> : vector<128xf32>
    %5 = vector.multi_reduction <add>, %4, %cst_2 [0] : vector<256x128xf32> to vector<128xf32>
    %6 = vector.shape_cast %5 : vector<128xf32> to vector<1x128xf32>
    %7 = tpu.concatenate %3, %6 in 0 : vector<1x128xf32>, vector<1x128xf32> -> vector<2x128xf32>
    %c0_3 = arith.constant 0 : index
    %c0_4 = arith.constant 0 : index
    %8 = vector.load %arg2[%c0_3, %c0_4] : memref<128x128xf32, #tpu.memory_space<vmem>>, vector<128x128xf32>
    %cst_5 = arith.constant dense<0.000000e+00> : vector<2x128xf32>
    %9 = tpu.matmul %7, %8, %cst_5 {dimension_numbers = #tpu.dot_dimension_numbers<[1], [0], [0], [1], [0, 0, 1, 1], [], []>} : vector<2x128xf32>, vector<128x128xf32>, vector<2x128xf32> -> vector<2x128xf32>
    %10 = vector.extract_strided_slice %9 {offsets = [0, 0], sizes = [1, 128], strides = [1, 1]} : vector<2x128xf32> to vector<1x128xf32>
    %11 = vector.extract_strided_slice %9 {offsets = [1, 0], sizes = [1, 128], strides = [1, 1]} : vector<2x128xf32> to vector<1x128xf32>
    %12 = arith.mulf %10, %10 : vector<1x128xf32>
    %13 = arith.subf %11, %12 : vector<1x128xf32>
    %cst_6 = arith.constant 0.000000e+00 : f32
    %14 = vector.broadcast %cst_6 : f32 to vector<1x128xf32>
    %15 = arith.maximumf %13, %14 : vector<1x128xf32>
    %cst_7 = arith.constant 9.99999974E-6 : f32
    %16 = vector.broadcast %cst_7 : f32 to vector<1x128xf32>
    %17 = arith.addf %15, %16 : vector<1x128xf32>
    %18 = math.rsqrt %17 : vector<1x128xf32>
    %c0_8 = arith.constant 0 : index
    %c0_9 = arith.constant 0 : index
    %19 = vector.load %arg3[%c0_8, %c0_9] : memref<1x128xf32, #tpu.memory_space<vmem>>, vector<1x128xf32>
    %20 = arith.mulf %18, %19 : vector<1x128xf32>
    %c0_10 = arith.constant 0 : index
    %c0_11 = arith.constant 0 : index
    %21 = vector.load %arg4[%c0_10, %c0_11] : memref<1x128xf32, #tpu.memory_space<vmem>>, vector<1x128xf32>
    %22 = arith.mulf %10, %20 : vector<1x128xf32>
    %23 = arith.subf %21, %22 : vector<1x128xf32>
    %24 = vector.broadcast %20 : vector<1x128xf32> to vector<256x128xf32>
    %25 = arith.mulf %1, %24 : vector<256x128xf32>
    %26 = vector.broadcast %23 : vector<1x128xf32> to vector<256x128xf32>
    %27 = arith.addf %25, %26 : vector<256x128xf32>
    %28 = arith.truncf %27 : vector<256x128xf32> to vector<256x128xbf16>
    %c0_12 = arith.constant 0 : index
    %c0_13 = arith.constant 0 : index
    %29 = vector.load %arg7[%c0_12, %c0_13] : memref<128x256xbf16, #tpu.memory_space<vmem>>, vector<128x256xbf16>
    %cst_14 = arith.constant dense<0.000000e+00> : vector<256x256xf32>
    %30 = tpu.matmul %28, %29, %cst_14 {dimension_numbers = #tpu.dot_dimension_numbers<[1], [0], [0], [1], [0, 0, 1, 1], [], []>} : vector<256x128xbf16>, vector<128x256xbf16>, vector<256x256xf32> -> vector<256x256xf32>
    %c0_15 = arith.constant 0 : index
    %c0_16 = arith.constant 0 : index
    %31 = vector.load %arg8[%c0_15, %c0_16] : memref<1x256xf32, #tpu.memory_space<vmem>>, vector<1x256xf32>
    %32 = vector.broadcast %31 : vector<1x256xf32> to vector<256x256xf32>
    %33 = arith.addf %30, %32 : vector<256x256xf32>
    %34 = vector.extract_strided_slice %33 {offsets = [0, 0], sizes = [256, 32], strides = [1, 1]} : vector<256x256xf32> to vector<256x32xf32>
    %35 = arith.truncf %34 : vector<256x32xf32> to vector<256x32xbf16>
    %36 = vector.extract_strided_slice %33 {offsets = [0, 32], sizes = [256, 32], strides = [1, 1]} : vector<256x256xf32> to vector<256x32xf32>
    %37 = arith.truncf %36 : vector<256x32xf32> to vector<256x32xbf16>
    %38 = vector.extract_strided_slice %33 {offsets = [0, 64], sizes = [256, 32], strides = [1, 1]} : vector<256x256xf32> to vector<256x32xf32>
    %39 = arith.truncf %38 : vector<256x32xf32> to vector<256x32xbf16>
    %40 = vector.extract_strided_slice %33 {offsets = [0, 96], sizes = [256, 32], strides = [1, 1]} : vector<256x256xf32> to vector<256x32xf32>
    %41 = arith.truncf %40 : vector<256x32xf32> to vector<256x32xbf16>
    %42 = vector.extract_strided_slice %33 {offsets = [0, 128], sizes = [256, 32], strides = [1, 1]} : vector<256x256xf32> to vector<256x32xf32>
    %43 = arith.truncf %42 : vector<256x32xf32> to vector<256x32xbf16>
    %44 = vector.extract_strided_slice %33 {offsets = [0, 160], sizes = [256, 32], strides = [1, 1]} : vector<256x256xf32> to vector<256x32xf32>
    %45 = arith.truncf %44 : vector<256x32xf32> to vector<256x32xbf16>
    %46 = vector.extract_strided_slice %33 {offsets = [0, 192], sizes = [256, 32], strides = [1, 1]} : vector<256x256xf32> to vector<256x32xf32>
    %47 = arith.truncf %46 : vector<256x32xf32> to vector<256x32xbf16>
    %48 = vector.extract_strided_slice %33 {offsets = [0, 224], sizes = [256, 32], strides = [1, 1]} : vector<256x256xf32> to vector<256x32xf32>
    %49 = arith.truncf %48 : vector<256x32xf32> to vector<256x32xbf16>
    %c0_17 = arith.constant 0 : index
    %c0_18 = arith.constant 0 : index
    %50 = vector.load %arg9[%c0_17, %c0_18] : memref<128x128xbf16, #tpu.memory_space<vmem>>, vector<32x128xbf16>
    %c32 = arith.constant 32 : index
    %c0_19 = arith.constant 0 : index
    %51 = vector.load %arg9[%c32, %c0_19] : memref<128x128xbf16, #tpu.memory_space<vmem>>, vector<32x128xbf16>
    %c64 = arith.constant 64 : index
    %c0_20 = arith.constant 0 : index
    %52 = vector.load %arg9[%c64, %c0_20] : memref<128x128xbf16, #tpu.memory_space<vmem>>, vector<32x128xbf16>
    %c96 = arith.constant 96 : index
    %c0_21 = arith.constant 0 : index
    %53 = vector.load %arg9[%c96, %c0_21] : memref<128x128xbf16, #tpu.memory_space<vmem>>, vector<32x128xbf16>
    %c0_22 = arith.constant 0 : index
    %c0_23 = arith.constant 0 : index
    %54 = vector.load %arg5[%c0_22, %c0_23] : memref<128x128xbf16, #tpu.memory_space<vmem>>, vector<128x128xbf16>
    %c0_24 = arith.constant 0 : index
    %c0_25 = arith.constant 0 : index
    %55 = vector.load %arg6[%c0_24, %c0_25] : memref<1x128xf32, #tpu.memory_space<vmem>>, vector<1x128xf32>
    %c0_26 = arith.constant 0 : index
    %c0_27 = arith.constant 0 : index
    %56 = vector.load %arg10[%c0_26, %c0_27] : memref<1x128xf32, #tpu.memory_space<vmem>>, vector<1x128xf32>
    %c0_i32 = arith.constant 0 : i32
    %c2_i32 = arith.constant 2 : i32
    %57 = arith.addi %c0_i32, %c2_i32 : i32
    %c1_i32 = arith.constant 1 : i32
    scf.for %arg12 = %c0_i32 to %57 step %c1_i32  : i32 {
      %c128_i32 = arith.constant 128 : i32
      %58 = arith.muli %arg12, %c128_i32 : i32
      %59 = tpu.assume_multiple %58, 128 : i32
      %c0_29 = arith.constant 0 : index
      %60 = arith.index_cast %59 : i32 to index
      %c0_30 = arith.constant 0 : index
      %61 = vector.load %arg1[%c0_29, %60, %c0_30] : memref<1x256x128xf32, #tpu.memory_space<vmem>>, vector<1x128x128xf32>
      %62 = vector.shape_cast %61 : vector<1x128x128xf32> to vector<128x128xf32>
      %63 = vector.broadcast %20 : vector<1x128xf32> to vector<128x128xf32>
      %64 = arith.mulf %62, %63 : vector<128x128xf32>
      %65 = vector.broadcast %23 : vector<1x128xf32> to vector<128x128xf32>
      %66 = arith.addf %64, %65 : vector<128x128xf32>
      %67 = arith.truncf %66 : vector<128x128xf32> to vector<128x128xbf16>
      %cst_31 = arith.constant dense<0.000000e+00> : vector<128x128xf32>
      %68 = tpu.matmul %67, %54, %cst_31 {dimension_numbers = #tpu.dot_dimension_numbers<[1], [0], [0], [1], [0, 0, 1, 1], [], []>} : vector<128x128xbf16>, vector<128x128xbf16>, vector<128x128xf32> -> vector<128x128xf32>
      %69 = vector.broadcast %55 : vector<1x128xf32> to vector<128x128xf32>
      %70 = arith.addf %68, %69 : vector<128x128xf32>
      %71 = arith.truncf %70 : vector<128x128xf32> to vector<128x128xbf16>
      %72 = vector.broadcast %56 : vector<1x128xf32> to vector<128x128xf32>
      %73 = arith.addf %62, %72 : vector<128x128xf32>
      %74 = vector.extract_strided_slice %71 {offsets = [0, 0], sizes = [128, 32], strides = [1, 1]} : vector<128x128xbf16> to vector<128x32xbf16>
      %cst_32 = arith.constant dense<0.000000e+00> : vector<128x256xf32>
      %75 = tpu.matmul %74, %35, %cst_32 {dimension_numbers = #tpu.dot_dimension_numbers<[1], [1], [0], [0], [0, 0, 1, 0], [], []>} : vector<128x32xbf16>, vector<256x32xbf16>, vector<128x256xf32> -> vector<128x256xf32>
      %cst_33 = arith.constant dense<0xFF800000> : vector<128xf32>
      %76 = vector.multi_reduction <maximumf>, %75, %cst_33 [1] : vector<128x256xf32> to vector<128xf32>
      %77 = vector.shape_cast %76 : vector<128xf32> to vector<128x1xf32>
      %78 = vector.broadcast %77 : vector<128x1xf32> to vector<128x256xf32>
      %79 = arith.subf %75, %78 : vector<128x256xf32>
      %80 = math.exp %79 : vector<128x256xf32>
      %cst_34 = arith.constant dense<0.000000e+00> : vector<128xf32>
      %81 = vector.multi_reduction <add>, %80, %cst_34 [1] : vector<128x256xf32> to vector<128xf32>
      %82 = vector.shape_cast %81 : vector<128xf32> to vector<128x1xf32>
      %83 = arith.truncf %80 : vector<128x256xf32> to vector<128x256xbf16>
      %cst_35 = arith.constant dense<0.000000e+00> : vector<128x32xf32>
      %84 = tpu.matmul %83, %43, %cst_35 {dimension_numbers = #tpu.dot_dimension_numbers<[1], [0], [0], [1], [0, 0, 1, 1], [], []>} : vector<128x256xbf16>, vector<256x32xbf16>, vector<128x32xf32> -> vector<128x32xf32>
      %85 = tpu.reciprocal %82 {approx = true} : vector<128x1xf32> -> vector<128x1xf32>
      %86 = vector.broadcast %85 : vector<128x1xf32> to vector<128x32xf32>
      %87 = arith.mulf %84, %86 : vector<128x32xf32>
      %88 = arith.truncf %87 : vector<128x32xf32> to vector<128x32xbf16>
      %cst_36 = arith.constant dense<0.000000e+00> : vector<128x128xf32>
      %89 = tpu.matmul %88, %50, %cst_36 {dimension_numbers = #tpu.dot_dimension_numbers<[1], [0], [0], [1], [0, 0, 1, 1], [], []>} : vector<128x32xbf16>, vector<32x128xbf16>, vector<128x128xf32> -> vector<128x128xf32>
      %90 = arith.addf %73, %89 : vector<128x128xf32>
      %91 = vector.extract_strided_slice %71 {offsets = [0, 32], sizes = [128, 32], strides = [1, 1]} : vector<128x128xbf16> to vector<128x32xbf16>
      %cst_37 = arith.constant dense<0.000000e+00> : vector<128x256xf32>
      %92 = tpu.matmul %91, %37, %cst_37 {dimension_numbers = #tpu.dot_dimension_numbers<[1], [1], [0], [0], [0, 0, 1, 0], [], []>} : vector<128x32xbf16>, vector<256x32xbf16>, vector<128x256xf32> -> vector<128x256xf32>
      %cst_38 = arith.constant dense<0xFF800000> : vector<128xf32>
      %93 = vector.multi_reduction <maximumf>, %92, %cst_38 [1] : vector<128x256xf32> to vector<128xf32>
      %94 = vector.shape_cast %93 : vector<128xf32> to vector<128x1xf32>
      %95 = vector.broadcast %94 : vector<128x1xf32> to vector<128x256xf32>
      %96 = arith.subf %92, %95 : vector<128x256xf32>
      %97 = math.exp %96 : vector<128x256xf32>
      %cst_39 = arith.constant dense<0.000000e+00> : vector<128xf32>
      %98 = vector.multi_reduction <add>, %97, %cst_39 [1] : vector<128x256xf32> to vector<128xf32>
      %99 = vector.shape_cast %98 : vector<128xf32> to vector<128x1xf32>
      %100 = arith.truncf %97 : vector<128x256xf32> to vector<128x256xbf16>
      %cst_40 = arith.constant dense<0.000000e+00> : vector<128x32xf32>
      %101 = tpu.matmul %100, %45, %cst_40 {dimension_numbers = #tpu.dot_dimension_numbers<[1], [0], [0], [1], [0, 0, 1, 1], [], []>} : vector<128x256xbf16>, vector<256x32xbf16>, vector<128x32xf32> -> vector<128x32xf32>
      %102 = tpu.reciprocal %99 {approx = true} : vector<128x1xf32> -> vector<128x1xf32>
      %103 = vector.broadcast %102 : vector<128x1xf32> to vector<128x32xf32>
      %104 = arith.mulf %101, %103 : vector<128x32xf32>
      %105 = arith.truncf %104 : vector<128x32xf32> to vector<128x32xbf16>
      %cst_41 = arith.constant dense<0.000000e+00> : vector<128x128xf32>
      %106 = tpu.matmul %105, %51, %cst_41 {dimension_numbers = #tpu.dot_dimension_numbers<[1], [0], [0], [1], [0, 0, 1, 1], [], []>} : vector<128x32xbf16>, vector<32x128xbf16>, vector<128x128xf32> -> vector<128x128xf32>
      %107 = arith.addf %90, %106 : vector<128x128xf32>
      %108 = vector.extract_strided_slice %71 {offsets = [0, 64], sizes = [128, 32], strides = [1, 1]} : vector<128x128xbf16> to vector<128x32xbf16>
      %cst_42 = arith.constant dense<0.000000e+00> : vector<128x256xf32>
      %109 = tpu.matmul %108, %39, %cst_42 {dimension_numbers = #tpu.dot_dimension_numbers<[1], [1], [0], [0], [0, 0, 1, 0], [], []>} : vector<128x32xbf16>, vector<256x32xbf16>, vector<128x256xf32> -> vector<128x256xf32>
      %cst_43 = arith.constant dense<0xFF800000> : vector<128xf32>
      %110 = vector.multi_reduction <maximumf>, %109, %cst_43 [1] : vector<128x256xf32> to vector<128xf32>
      %111 = vector.shape_cast %110 : vector<128xf32> to vector<128x1xf32>
      %112 = vector.broadcast %111 : vector<128x1xf32> to vector<128x256xf32>
      %113 = arith.subf %109, %112 : vector<128x256xf32>
      %114 = math.exp %113 : vector<128x256xf32>
      %cst_44 = arith.constant dense<0.000000e+00> : vector<128xf32>
      %115 = vector.multi_reduction <add>, %114, %cst_44 [1] : vector<128x256xf32> to vector<128xf32>
      %116 = vector.shape_cast %115 : vector<128xf32> to vector<128x1xf32>
      %117 = arith.truncf %114 : vector<128x256xf32> to vector<128x256xbf16>
      %cst_45 = arith.constant dense<0.000000e+00> : vector<128x32xf32>
      %118 = tpu.matmul %117, %47, %cst_45 {dimension_numbers = #tpu.dot_dimension_numbers<[1], [0], [0], [1], [0, 0, 1, 1], [], []>} : vector<128x256xbf16>, vector<256x32xbf16>, vector<128x32xf32> -> vector<128x32xf32>
      %119 = tpu.reciprocal %116 {approx = true} : vector<128x1xf32> -> vector<128x1xf32>
      %120 = vector.broadcast %119 : vector<128x1xf32> to vector<128x32xf32>
      %121 = arith.mulf %118, %120 : vector<128x32xf32>
      %122 = arith.truncf %121 : vector<128x32xf32> to vector<128x32xbf16>
      %cst_46 = arith.constant dense<0.000000e+00> : vector<128x128xf32>
      %123 = tpu.matmul %122, %52, %cst_46 {dimension_numbers = #tpu.dot_dimension_numbers<[1], [0], [0], [1], [0, 0, 1, 1], [], []>} : vector<128x32xbf16>, vector<32x128xbf16>, vector<128x128xf32> -> vector<128x128xf32>
      %124 = arith.addf %107, %123 : vector<128x128xf32>
      %125 = vector.extract_strided_slice %71 {offsets = [0, 96], sizes = [128, 32], strides = [1, 1]} : vector<128x128xbf16> to vector<128x32xbf16>
      %cst_47 = arith.constant dense<0.000000e+00> : vector<128x256xf32>
      %126 = tpu.matmul %125, %41, %cst_47 {dimension_numbers = #tpu.dot_dimension_numbers<[1], [1], [0], [0], [0, 0, 1, 0], [], []>} : vector<128x32xbf16>, vector<256x32xbf16>, vector<128x256xf32> -> vector<128x256xf32>
      %cst_48 = arith.constant dense<0xFF800000> : vector<128xf32>
      %127 = vector.multi_reduction <maximumf>, %126, %cst_48 [1] : vector<128x256xf32> to vector<128xf32>
      %128 = vector.shape_cast %127 : vector<128xf32> to vector<128x1xf32>
      %129 = vector.broadcast %128 : vector<128x1xf32> to vector<128x256xf32>
      %130 = arith.subf %126, %129 : vector<128x256xf32>
      %131 = math.exp %130 : vector<128x256xf32>
      %cst_49 = arith.constant dense<0.000000e+00> : vector<128xf32>
      %132 = vector.multi_reduction <add>, %131, %cst_49 [1] : vector<128x256xf32> to vector<128xf32>
      %133 = vector.shape_cast %132 : vector<128xf32> to vector<128x1xf32>
      %134 = arith.truncf %131 : vector<128x256xf32> to vector<128x256xbf16>
      %cst_50 = arith.constant dense<0.000000e+00> : vector<128x32xf32>
      %135 = tpu.matmul %134, %49, %cst_50 {dimension_numbers = #tpu.dot_dimension_numbers<[1], [0], [0], [1], [0, 0, 1, 1], [], []>} : vector<128x256xbf16>, vector<256x32xbf16>, vector<128x32xf32> -> vector<128x32xf32>
      %136 = tpu.reciprocal %133 {approx = true} : vector<128x1xf32> -> vector<128x1xf32>
      %137 = vector.broadcast %136 : vector<128x1xf32> to vector<128x32xf32>
      %138 = arith.mulf %135, %137 : vector<128x32xf32>
      %139 = arith.truncf %138 : vector<128x32xf32> to vector<128x32xbf16>
      %cst_51 = arith.constant dense<0.000000e+00> : vector<128x128xf32>
      %140 = tpu.matmul %139, %53, %cst_51 {dimension_numbers = #tpu.dot_dimension_numbers<[1], [0], [0], [1], [0, 0, 1, 1], [], []>} : vector<128x32xbf16>, vector<32x128xbf16>, vector<128x128xf32> -> vector<128x128xf32>
      %141 = arith.addf %124, %140 : vector<128x128xf32>
      %c0_52 = arith.constant 0 : index
      %142 = arith.index_cast %59 : i32 to index
      %c0_53 = arith.constant 0 : index
      %143 = vector.load %arg11[%c0_52, %142, %c0_53] : memref<1x256x128xf32, #tpu.memory_space<vmem>>, vector<1x128x128xf32>
      %144 = vector.shape_cast %143 : vector<1x128x128xf32> to vector<128x128xf32>
      %145 = vector.shape_cast %141 : vector<128x128xf32> to vector<1x128x128xf32>
      tpu.vector_store %arg11[%c0_52, %142, %c0_53], %145 {strides = array<i32>} : memref<1x256x128xf32, #tpu.memory_space<vmem>>, vector<1x128x128xf32>,
    }
    %c2_i32_28 = arith.constant 2 : i32
    return
  }
  func.func @transform_0(%arg0: i32) -> (i32, i32, i32) {
    %c0_i32 = arith.constant 0 : i32
    %c0_i32_0 = arith.constant 0 : i32
    %c0_i32_1 = arith.constant 0 : i32
    return %arg0, %c0_i32, %c0_i32_0 : i32, i32, i32
  }
  func.func @transform_1(%arg0: i32) -> (i32, i32) {
    %c0_i32 = arith.constant 0 : i32
    %c0_i32_0 = arith.constant 0 : i32
    %c0_i32_1 = arith.constant 0 : i32
    return %c0_i32, %c0_i32_0 : i32, i32
  }
  func.func @transform_2(%arg0: i32) -> (i32, i32) {
    %c0_i32 = arith.constant 0 : i32
    %c0_i32_0 = arith.constant 0 : i32
    %c0_i32_1 = arith.constant 0 : i32
    return %c0_i32, %c0_i32_0 : i32, i32
  }
  func.func @transform_3(%arg0: i32) -> (i32, i32) {
    %c0_i32 = arith.constant 0 : i32
    %c0_i32_0 = arith.constant 0 : i32
    %c0_i32_1 = arith.constant 0 : i32
    return %c0_i32, %c0_i32_0 : i32, i32
  }
  func.func @transform_4(%arg0: i32) -> (i32, i32) {
    %c0_i32 = arith.constant 0 : i32
    %c0_i32_0 = arith.constant 0 : i32
    %c0_i32_1 = arith.constant 0 : i32
    return %c0_i32, %c0_i32_0 : i32, i32
  }
  func.func @transform_5(%arg0: i32) -> (i32, i32) {
    %c0_i32 = arith.constant 0 : i32
    %c0_i32_0 = arith.constant 0 : i32
    %c0_i32_1 = arith.constant 0 : i32
    return %c0_i32, %c0_i32_0 : i32, i32
  }
  func.func @transform_6(%arg0: i32) -> (i32, i32) {
    %c0_i32 = arith.constant 0 : i32
    %c0_i32_0 = arith.constant 0 : i32
    %c0_i32_1 = arith.constant 0 : i32
    return %c0_i32, %c0_i32_0 : i32, i32
  }
  func.func @transform_7(%arg0: i32) -> (i32, i32) {
    %c0_i32 = arith.constant 0 : i32
    %c0_i32_0 = arith.constant 0 : i32
    %c0_i32_1 = arith.constant 0 : i32
    return %c0_i32, %c0_i32_0 : i32, i32
  }
  func.func @transform_8(%arg0: i32) -> (i32, i32) {
    %c0_i32 = arith.constant 0 : i32
    %c0_i32_0 = arith.constant 0 : i32
    %c0_i32_1 = arith.constant 0 : i32
    return %c0_i32, %c0_i32_0 : i32, i32
  }
  func.func @transform_9(%arg0: i32) -> (i32, i32) {
    %c0_i32 = arith.constant 0 : i32
    %c0_i32_0 = arith.constant 0 : i32
    %c0_i32_1 = arith.constant 0 : i32
    return %c0_i32, %c0_i32_0 : i32, i32
  }
  func.func @transform_10(%arg0: i32) -> (i32, i32, i32) {
    %c0_i32 = arith.constant 0 : i32
    %c0_i32_0 = arith.constant 0 : i32
    %c0_i32_1 = arith.constant 0 : i32
    return %arg0, %c0_i32, %c0_i32_0 : i32, i32, i32
  }
}

</mosaic_0001>

<bundles_post_ra>
// kernel: tpu_custom_call.1
= control target key start
LH: loop header
LB: loop body
LE: loop exit
PB: predicated region body
PF: predicated region fallthrough
CT: control target
= control target key end

     0   :  { %s8735_s0 = inlined_call_operand.hbm [shape: f32[2,256,128], index: 0, kind: input, shape index: {}]   ;;  %s8736_s1 = inlined_call_operand.hbm [shape: f32[128,128], index: 1, kind: input, shape index: {}]   ;;  %s8737_s2 = inlined_call_operand.vmem [shape: f32[1,128], index: 2, kind: input, shape index: {}]   ;;  %s8738_s3 = inlined_call_operand.vmem [shape: f32[1,128], index: 3, kind: input, shape index: {}]   ;;  %s8739_s4 = inlined_call_operand.hbm [shape: bf16[128,128], index: 4, kind: input, shape index: {}]   ;;  %s8740_s5 = inlined_call_operand.vmem [shape: f32[1,128], index: 5, kind: input, shape index: {}]   ;;  %s8741_s6 = inlined_call_operand.hbm [shape: bf16[128,256], index: 6, kind: input, shape index: {}]   ;;  %s8742_s7 = inlined_call_operand.vmem [shape: f32[1,256], index: 7, kind: input, shape index: {}]   ;;  %s8743_s8 = inlined_call_operand.hbm [shape: bf16[128,128], index: 8, kind: input, shape index: {}]   ;;  %s8744_s9 = inlined_call_operand.vmem [shape: f32[1,128], index: 9, kind: input, shape index: {}]   ;;  %s8745_s10 = inlined_call_operand.hbm [shape: f32[2,256,128], index: 10, kind: output, shape index: {}]  }
   0x1   :  { %8898 = sst [smem:[#allocation124_spill]] %s8742_s7 }
   0x2   :  { %8899 = sst [smem:[#allocation125_spill]] %s8745_s10 }
   0x3   :  { %15 = vsyncpa [#allocation3], 0 }
   0x4   :  { %17 = vsyncpa [#allocation3 + $0x1], 0 }
   0x5   :  { %18 = vsyncpa [#allocation6], 0 }
   0x6   :  { %19 = vsyncpa [#allocation9], 0 }
   0x7   :  { %20 = vsyncpa [#allocation4], 0 }
   0x8   :  { %22 = vsyncpa [#allocation4 + $0x1], 0  ;;  %s6281_s13 = smov 0   ;;  %s6283_s14 = smov 0  }
   0x9   :  { %s6285_s15 = smov 0   ;;  %s6287_s16 = smov 0  }
   0xa LB: > { %8900 = sst [smem:[#allocation16_spill]] %s6189_s13  ;;  %s6302_s17 = sadd.s32 4294967295, %s6201_s16   ;;  %s6201_s16 = sphi %s6287_s16, %s9274_s16   ;;  %s6197_s15 = sphi %s6285_s15, %s9273_s15   ;;  %s6193_s14 = sphi %s6283_s14, %s9272_s14   ;;  %s6189_s13 = sphi %s6281_s13, %s9271_s13  }
   0xb   : > { %s4583_s18 = sadd.s32 4294967294, %s6201_s16   ;;  %p48_p0 = scmp.ne.s32.totalorder %s6193_s14, %s6189_s13 }
   0xc   : > { %p8746_p1 = scmp.eq.s32.totalorder %s6302_s17, 0  ;;  %p267_p3 = scmp.eq.s32.totalorder %s4583_s18, 1 }
   0xd   : > { %p4584_p5 = scmp.ge.s32.totalorder %s6201_s16, 1  ;;  %p274_p7 = scmp.lt.s32.totalorder %s6201_s16, 3 }
   0xe   : > { %p6311_p4 = por %p8746_p1, %p48_p0  ;;  %p6316_p6 = por %p267_p3, %p48_p0 }
   0xf   : > { %p6321_p8 = pnand %p4584_p5, %p274_p7  ;;  %s6207_s22 = smov [#allocation5]  }
  0x10   : > { %s8901_s19 = scalar_select %p6311_p4, 1, 0 }
  0x11   : > { %s8902_s20 = scalar_select %p6316_p6, 1, 0 }
  0x12   : > { %s8904_s21 = scalar_select %p6321_p8, 1, 0 }
  0x13   : > { %8903 = sst [smem:[#allocation17_spill]] %s8902_s20  ;;  %s286_s23 = sshll.u32 %s6207_s22, 4  ;;  %s6325_s23 = int_to_ptr.vmem [resolvable:$true] %s286_s23 }
  0x14   : > { %p5467_p9 = pneg %p6321_p8  ;;  %s6208_s25 = smov [#allocation8]  }
  0x15   : > { %s321_s26 = sshll.u32 %s6208_s25, 4  ;;  %s6209_s27 = smov [#allocation7]   ;;  %s6336_s26 = int_to_ptr.vmem [resolvable:$true] %s321_s26 }
  0x16   : > { %p6332_p11 = pnand %p5467_p9, %p8746_p1  ;;  %s6338_s28 = sshll.u32 %s6209_s27, 4  ;;  %s306_s28 = int_to_ptr.vmem [resolvable:$true] %s6338_s28 }
  0x17   : > { %s5981_s11 = scalar_lea.hbm %s8736_s1, 2048 }
  0x18   : > { %p5982_p12 = scmp.ne.s32.totalorder %s8736_s1, %s5981_s11  ;;  %p6348_p13 = pneg %p6332_p11 }
  0x19   : > { %p5988_p5 = scmp.lt.u32.totalorder %s5981_s11, %s8736_s1 }
  0x1a   : > { %p5984_p0 = pnand %p6348_p13, %p5982_p12 }
  0x1c   : > { %p5985_p3 = pneg %p5984_p0 }
  0x1e   : > { %p5990_p7 = pnand %p5988_p5, %p5985_p3 }
  0x20   : > { %5993 = shalt.err (!%p5990_p7)
}
  0x21   : > { %s5994_s29 = scalar_lea.vmem %s6325_s23, 2048  ;;  %p6002_p2 = scmp.lt.s32.totalorder %s6325_s23, %s6325_s23 }
  0x22   : > { %p5995_p9 = scmp.ne.s32.totalorder %s6325_s23, %s5994_s29  ;;  %p6003_p6 = scmp.lt.s32.totalorder %s5994_s29, %s5994_s29 }
  0x24   : > { %p5997_p10 = pnand %p5995_p9, %p6348_p13  ;;  %p6004_p12 = por %p6003_p6, %p6002_p2 }
  0x26   : > { %p5998_p1 = pneg %p5997_p10 }
  0x28   : > { %p6005_p0 = pnand %p6004_p12, %p5998_p1 }
  0x2a   : > { %6008 = shalt.err (!%p6005_p0)
}
  0x2b   : > { %s8752_s30 = smov 128   ;;  %s8753_s11 = smov 8  }
  0x2c   : > { %5470 = dma.hbm_to_vmem [thread:$0]  (!%p6332_p11), %s8736_s1, 2048, %s6325_s23, [#allocation6], %s8752_s30, %s8752_s30, %s8753_s11  }
  0x2d   : > { %s6009_s29 = scalar_lea.hbm %s8741_s6, 2048 }
  0x2e   : > { %p6010_p1 = scmp.ne.s32.totalorder %s8741_s6, %s6009_s29  ;;  %p6016_p10 = scmp.lt.u32.totalorder %s6009_s29, %s8741_s6 }
  0x30   : > { %p6012_p2 = pnand %p6010_p1, %p6348_p13 }
  0x32   : > { %p6013_p6 = pneg %p6012_p2 }
  0x34   : > { %p6018_p3 = pnand %p6016_p10, %p6013_p6 }
  0x36   : > { %6021 = shalt.err (!%p6018_p3)
}
  0x37   : > { %s6022_s23 = scalar_lea.vmem %s6336_s26, 2048  ;;  %p6030_p12 = scmp.lt.s32.totalorder %s6336_s26, %s6336_s26 }
  0x38   : > { %p6023_p5 = scmp.ne.s32.totalorder %s6336_s26, %s6022_s23  ;;  %p6031_p0 = scmp.lt.s32.totalorder %s6022_s23, %s6022_s23 }
  0x3a   : > { %p6025_p7 = pnand %p6023_p5, %p6348_p13  ;;  %p6032_p1 = por %p6031_p0, %p6030_p12 }
  0x3c   : > { %p6026_p9 = pneg %p6025_p7 }
  0x3e   : > { %p6033_p2 = pnand %p6032_p1, %p6026_p9 }
  0x40   : > { %6036 = shalt.err (!%p6033_p2)
}
  0x41   : > { %5476 = dma.hbm_to_vmem [thread:$0]  (!%p6332_p11), %s8741_s6, 2048, %s6336_s26, [#allocation9], %s8752_s30, %s8752_s30, %s8753_s11  }
  0x42   : > { %s6037_s12 = scalar_lea.hbm %s8739_s4, 1024 }
  0x43   : > { %p6038_p6 = scmp.ne.s32.totalorder %s8739_s4, %s6037_s12  ;;  %p6044_p5 = scmp.lt.u32.totalorder %s6037_s12, %s8739_s4 }
  0x45   : > { %p6040_p10 = pnand %p6038_p6, %p6348_p13 }
  0x47   : > { %p6041_p3 = pneg %p6040_p10 }
  0x49   : > { %p6046_p7 = pnand %p6044_p5, %p6041_p3 }
  0x4b   : > { %6049 = shalt.err (!%p6046_p7)
}
  0x4c   : > { %s6050_s23 = scalar_lea.vmem %s306_s28, 1024  ;;  %p6058_p1 = scmp.lt.s32.totalorder %s306_s28, %s306_s28 }
  0x4d   : > { %p6051_p9 = scmp.ne.s32.totalorder %s306_s28, %s6050_s23  ;;  %p6059_p2 = scmp.lt.s32.totalorder %s6050_s23, %s6050_s23 }
  0x4f   : > { %p6053_p12 = pnand %p6051_p9, %p6348_p13  ;;  %p6060_p4 = por %p6059_p2, %p6058_p1 }
  0x51   : > { %p6054_p0 = pneg %p6053_p12 }
  0x53   : > { %p6061_p8 = pnand %p6060_p4, %p6054_p0 }
  0x55   : > { %6064 = shalt.err (!%p6061_p8)
}
  0x56   : > { %s6212_s26 = smov 64   ;;  %s6213_s7 = smov 4  }
  0x57   : > { %5473 = dma.hbm_to_vmem [thread:$0]  (!%p6332_p11), %s8739_s4, 1024, %s306_s28, [#allocation6], %s6212_s26, %s6212_s26, %s6213_s7  }
  0x58   : > { %s6214_s20 = smov [#allocation10]   ;;  %s6065_s27 = scalar_lea.hbm %s8743_s8, 1024 }
  0x59   : > { %s337_s12 = sshll.u32 %s6214_s20, 4  ;;  %p6066_p4 = scmp.ne.s32.totalorder %s8743_s8, %s6065_s27  ;;  %s338_s12 = int_to_ptr.vmem [resolvable:$true] %s337_s12 }
  0x5a   : > { %p6072_p10 = scmp.lt.u32.totalorder %s6065_s27, %s8743_s8 }
  0x5b   : > { %p6068_p8 = pnand %p6066_p4, %p6348_p13 }
  0x5d   : > { %p6069_p6 = pneg %p6068_p8 }
  0x5f   : > { %p6074_p3 = pnand %p6072_p10, %p6069_p6 }
  0x61   : > { %6077 = shalt.err (!%p6074_p3)
}
  0x62   : > { %s6078_s28 = scalar_lea.vmem %s338_s12, 1024  ;;  %p6086_p12 = scmp.lt.s32.totalorder %s338_s12, %s338_s12 }
  0x63   : > { %p6079_p5 = scmp.ne.s32.totalorder %s338_s12, %s6078_s28  ;;  %p6087_p0 = scmp.lt.s32.totalorder %s6078_s28, %s6078_s28 }
  0x65   : > { %p6081_p7 = pnand %p6079_p5, %p6348_p13  ;;  %p6088_p1 = por %p6087_p0, %p6086_p12 }
  0x67   : > { %p6082_p9 = pneg %p6081_p7 }
  0x69   : > { %p6089_p2 = pnand %p6088_p1, %p6082_p9 }
  0x6b   : > { %6092 = shalt.err (!%p6089_p2)
}
  0x6c   : > { %5479 = dma.hbm_to_vmem [thread:$0]  (!%p6332_p11), %s8743_s8, 1024, %s338_s12, [#allocation9], %s6212_s26, %s6212_s26, %s6213_s7  }
  0x6d   : > { %s6436_s22 = sadd.s32 1, %s6201_s16   ;;  %s35_s30 = sadd.s32 1, %s6197_s15 }
  0x6e   : > { %s32_s24 = ssub.s32 %s6201_s16, %s6436_s22  ;;  %p42_p13 = scmp.ne.s32.totalorder %s6197_s15, %s6193_s14 }
  0x6f   : > { %p33_p4 = scmp.eq.s32.totalorder %s32_s24, 0  ;;  %p43_p8 = scmp.eq.s32.totalorder %s6201_s16, 0 }
  0x70   : > { %p8907_p6 = scmp.eq.s32.totalorder %s6302_s17, 1  ;;  %p5492_p3 = scmp.lt.s32.totalorder %s6201_s16, 2 }
  0x71   : > { %s6452_s20 = scalar_select %p33_p4, %s6197_s15, %s35_s30  }
  0x72   : > { %p6446_p10 = por %p8907_p6, %p42_p13  ;;  %p44_p5 = por %p43_p8, %p42_p13 }
  0x73   : > { %s354_s18 = sand.u32 1, %s6197_s15   ;;  %s4705_s26 = sshll.u32 %s6201_s16, 12 }
  0x74   : > { %s4590_s25 = sshll.u32 %s354_s18, 8  ;;  %s6459_s27 = scalar_lea.hbm %s8735_s0, %s4705_s26 }
  0x75   : > { %s358_s29 = scalar_lea.vmem [#allocation2], %s4590_s25  ;;  %p6463_p11 = pnand %p5492_p3, %p44_p5 }
  0x76   : > { %s365_s23 = sshll.u32 %s358_s29, 4  ;;  %s6467_s10 = scalar_lea.sflag [#allocation3], %s354_s18  ;;  %s6461_s23 = int_to_ptr.vmem [resolvable:$true] %s365_s23 }
  0x77   : > { %s6093_s13 = scalar_lea.hbm %s6459_s27, 4096  ;;  %p6095_p9 = pneg %p6463_p11 }
  0x78   : > { %p6094_p7 = scmp.ne.s32.totalorder %s6459_s27, %s6093_s13  ;;  %s6098_s25 = scalar_lea.hbm %s8735_s0, 8192 }
  0x79   : > { %p6099_p1 = scmp.lt.u32.totalorder %s6459_s27, %s8735_s0  ;;  %p6100_p2 = scmp.lt.u32.totalorder %s6098_s25, %s6093_s13 }
  0x7a   : > { %p6096_p12 = pnand %p6095_p9, %p6094_p7  ;;  %p6102_p4 = scmp.lt.u32.totalorder %s6093_s13, %s6459_s27 }
  0x7b   : > { %p6101_p13 = por %p6100_p2, %p6099_p1 }
  0x7c   : > { %p6097_p0 = pneg %p6096_p12 }
  0x7d   : > { %p6103_p8 = por %p6102_p4, %p6101_p13 }
  0x7f   : > { %p6104_p6 = pnand %p6103_p8, %p6097_p0 }
  0x81   : > { %6107 = shalt.err (!%p6104_p6)
}
  0x82   : > { %s6108_s18 = scalar_lea.vmem %s6461_s23, 4096  ;;  %s6215_s12 = smov [#allocation2]  }
  0x83   : > { %p6109_p3 = scmp.ne.s32.totalorder %s6461_s23, %s6108_s18  ;;  %s6113_s29 = sshll.u32 %s6215_s12, 4  ;;  %s6114_s29 = int_to_ptr.vmem [resolvable:$false] %s6113_s29 }
  0x84   : > { %s6115_s30 = scalar_lea.vmem %s6114_s29, 8192  ;;  %p6116_p12 = scmp.lt.s32.totalorder %s6461_s23, %s6114_s29 }
  0x85   : > { %p6111_p5 = pnand %p6109_p3, %p6095_p9  ;;  %p6117_p1 = scmp.lt.s32.totalorder %s6115_s30, %s6108_s18 }
  0x87   : > { %p6112_p7 = pneg %p6111_p5  ;;  %p6118_p2 = por %p6117_p1, %p6116_p12 }
  0x89   : > { %p6119_p13 = pnand %p6118_p2, %p6112_p7 }
  0x8b   : > { %6122 = shalt.err (!%p6119_p13)
}
  0x8c   : > { %s8910_s13 = smov 8   ;;  %s8911_s24 = smov 128  }
  0x8d   : > { %5483 = dma.hbm_to_vmem [thread:$0]  (!%p6463_p11), %s6459_s27, 4096, %s6461_s23, %s6467_s10, %s8911_s24, %s8911_s24, %s8910_s13  }
  0x8e   : > { %p8912_p9 = scmp.ne.s32.totalorder %s8904_s21, 0 }
  0x90   : > { %377 = sbr.rel (%p8912_p9) target bundleno = 3064 (0xbf8), region = 60 }
  0x97   : > { %s6501_s25 = sand.u32 1, %s6193_s14   ;;  %p8913_p0 = scmp.ne.s32.totalorder %s8901_s19, 0 }
  0x98   : > { %s4594_s26 = sshll.u32 %s6501_s25, 8  ;;  %s380_s7 = scalar_lea.sflag [#allocation3], %s6501_s25 }
  0x99   : > { %s6507_s28 = scalar_lea.vmem [#allocation2], %s4594_s26 }
  0x9a   : > { %6172 = dma.done.wait (%p8913_p0), %s380_s7, 4096  }
  0x9b   : > { %6174 = vsyncadd (%p8913_p0), %s380_s7, 4294963200  ;;  %p8914_p11 = scmp.eq.s32.totalorder %s6302_s17, 0 }
  0x9d   : > { %6176 = dma.done.wait (%p8914_p11), [#allocation6], 3072   ;;  %p8915_p4 = pmov %p8914_p11 }
  0x9f   : > { %6178 = vsyncadd (%p8915_p4), [#allocation6], 4294964224  ;;  %p8916_p8 = pmov %p8915_p4 }
  0xa0   : > { %p8917_p6 = pmov %p8915_p4 }
  0xa1   : > { %6180 = dma.done.wait (%p8916_p8), [#allocation9], 3072  }
  0xa2   : > { %6182 = vsyncadd (%p8917_p6), [#allocation9], 4294964224  ;;  %v6216_v0 = vmov 0.0|0.0   ;;  %vm6217_vm0 = vmmov 0   ;;  %v6218_v1 = vmov 0.0   ;;  %v577_v36 = vld [vmem:[#allocation5] sm:$0xff] }
  0xa3   : > { %5311 = vmatprep.subr.bf16.mxu0 %v6216_v0  ;;  %5196 = vmatprep.mubr.msk.f32.mxu0 %vm6217_vm0, %v6218_v1  ;;  %v6522_v2 = vld [vmem:[#allocation10] sm:$0xf]  ;;  %v6524_v3 = vld [vmem:[#allocation10 + $0x4] sm:$0xf]  ;;  %v6526_v4 = vld [vmem:[#allocation10 + $0x8] sm:$0xf] }
  0xa4   : > { %8918 = vst [vmem:[#allocation18_spill] sm:$0xff] %v6522_v2  ;;  %8919 = vst [vmem:[#allocation19_spill] sm:$0xff] %v6524_v3  ;;  %v6528_v5 = vld [vmem:[#allocation10 + $0xc] sm:$0xf]  ;;  %v6530_v6 = vld [vmem:[#allocation10 + $0x10] sm:$0xf] }
  0xa5   : > { %8920 = vst [vmem:[#allocation20_spill] sm:$0xff] %v6526_v4  ;;  %8921 = vst [vmem:[#allocation21_spill] sm:$0xff] %v6528_v5  ;;  %v6532_v7 = vld [vmem:[#allocation10 + $0x14] sm:$0xf]  ;;  %v6534_v8 = vld [vmem:[#allocation10 + $0x18] sm:$0xf] }
  0xa6   : > { %8922 = vst [vmem:[#allocation22_spill] sm:$0xff] %v6530_v6  ;;  %8923 = vst [vmem:[#allocation23_spill] sm:$0xff] %v6532_v7  ;;  %v6536_v9 = vld [vmem:[#allocation10 + $0x1c] sm:$0xf]  ;;  %v6538_v10 = vld [vmem:[#allocation10 + $0x20] sm:$0xf] }
  0xa7   : > { %8924 = vst [vmem:[#allocation24_spill] sm:$0xff] %v6534_v8  ;;  %8925 = vst [vmem:[#allocation25_spill] sm:$0xff] %v6536_v9  ;;  %v6540_v11 = vld [vmem:[#allocation10 + $0x24] sm:$0xf]  ;;  %v6542_v12 = vld [vmem:[#allocation10 + $0x28] sm:$0xf] }
  0xa8   : > { %8926 = vst [vmem:[#allocation26_spill] sm:$0xff] %v6538_v10  ;;  %8927 = vst [vmem:[#allocation27_spill] sm:$0xff] %v6540_v11  ;;  %v6544_v13 = vld [vmem:[#allocation10 + $0x2c] sm:$0xf]  ;;  %v6546_v14 = vld [vmem:[#allocation10 + $0x30] sm:$0xf] }
  0xa9   : > { %8928 = vst [vmem:[#allocation28_spill] sm:$0xff] %v6542_v12  ;;  %8929 = vst [vmem:[#allocation29_spill] sm:$0xff] %v6544_v13  ;;  %v6548_v15 = vld [vmem:[#allocation10 + $0x34] sm:$0xf]  ;;  %v6550_v16 = vld [vmem:[#allocation10 + $0x38] sm:$0xf] }
  0xaa   : > { %8930 = vst [vmem:[#allocation30_spill] sm:$0xff] %v6546_v14  ;;  %8931 = vst [vmem:[#allocation31_spill] sm:$0xff] %v6548_v15  ;;  %v6552_v17 = vld [vmem:[#allocation10 + $0x3c] sm:$0xf]  ;;  %v6554_v18 = vld [vmem:[#allocation7] sm:$0xf] }
  0xab   : > { %8932 = vst [vmem:[#allocation32_spill] sm:$0xff] %v6550_v16  ;;  %8933 = vst [vmem:[#allocation33_spill] sm:$0xff] %v6552_v17  ;;  %v6556_v19 = vld [vmem:[#allocation7 + $0x4] sm:$0xf]  ;;  %v6558_v20 = vld [vmem:[#allocation7 + $0x8] sm:$0xf] }
  0xac   : > { %8934 = vst [vmem:[#allocation34_spill] sm:$0xff] %v6554_v18  ;;  %8935 = vst [vmem:[#allocation35_spill] sm:$0xff] %v6556_v19  ;;  %v6560_v21 = vld [vmem:[#allocation7 + $0xc] sm:$0xf]  ;;  %v6562_v22 = vld [vmem:[#allocation7 + $0x10] sm:$0xf] }
  0xad   : > { %8936 = vst [vmem:[#allocation36_spill] sm:$0xff] %v6558_v20  ;;  %8937 = vst [vmem:[#allocation37_spill] sm:$0xff] %v6560_v21  ;;  %v6564_v23 = vld [vmem:[#allocation7 + $0x14] sm:$0xf]  ;;  %v6566_v24 = vld [vmem:[#allocation7 + $0x18] sm:$0xf] }
  0xae   : > { %8938 = vst [vmem:[#allocation38_spill] sm:$0xff] %v6562_v22  ;;  %8939 = vst [vmem:[#allocation39_spill] sm:$0xff] %v6564_v23  ;;  %v6568_v25 = vld [vmem:[#allocation7 + $0x1c] sm:$0xf]  ;;  %v6570_v26 = vld [vmem:[#allocation7 + $0x20] sm:$0xf] }
  0xaf   : > { %8940 = vst [vmem:[#allocation40_spill] sm:$0xff] %v6566_v24  ;;  %8941 = vst [vmem:[#allocation41_spill] sm:$0xff] %v6568_v25  ;;  %v6572_v27 = vld [vmem:[#allocation7 + $0x24] sm:$0xf]  ;;  %v6574_v28 = vld [vmem:[#allocation7 + $0x28] sm:$0xf] }
  0xb0   : > { %8942 = vst [vmem:[#allocation42_spill] sm:$0xff] %v6570_v26  ;;  %8943 = vst [vmem:[#allocation43_spill] sm:$0xff] %v6572_v27  ;;  %v6576_v29 = vld [vmem:[#allocation7 + $0x2c] sm:$0xf]  ;;  %v6578_v30 = vld [vmem:[#allocation7 + $0x30] sm:$0xf] }
  0xb1   : > { %8944 = vst [vmem:[#allocation44_spill] sm:$0xff] %v6574_v28  ;;  %8945 = vst [vmem:[#allocation45_spill] sm:$0xff] %v6576_v29  ;;  %v6580_v31 = vld [vmem:[#allocation7 + $0x34] sm:$0xf]  ;;  %v6582_v32 = vld [vmem:[#allocation7 + $0x38] sm:$0xf] }
  0xb2   : > { %8946 = vst [vmem:[#allocation46_spill] sm:$0xff] %v6578_v30  ;;  %8947 = vst [vmem:[#allocation47_spill] sm:$0xff] %v6580_v31  ;;  %v6584_v33 = vld [vmem:[#allocation7 + $0x3c] sm:$0xf]  ;;  %v6589_v34 = vld [vmem:[%s8740_s5] ss:$0 sm:$0xff] }
  0xb3   : > { %8948 = vst [vmem:[#allocation48_spill] sm:$0xff] %v6582_v32  ;;  %8949 = vst [vmem:[#allocation49_spill] sm:$0xff] %v6584_v33  ;;  %v6594_v35 = vld [vmem:[%s8744_s9] ss:$0 sm:$0xff]  ;;  %v578_v37 = vld [vmem:[#allocation5 + $0x8] sm:$0xff]  ;;  %vm575_vm1 = vcmask 1040384  }
  0xb4   : > { %8950 = vst [vmem:[#allocation50_spill] sm:$0xff] %v6589_v34  ;;  %8951 = vst [vmem:[#allocation51_spill] sm:$0xff] %v6594_v35  ;;  %v5312_v38 = vpack.c.bf16 %v578_v37, %v577_v36  ;;  %v579_v39 = vld [vmem:[#allocation5 + $0x10] sm:$0xff]  ;;  %v580_v40 = vld [vmem:[#allocation5 + $0x18] sm:$0xff]  ;;  %s8954_s24 = sld [smem:[#allocation124_spill]]  ;;  %s7081_s7 = scalar_lea.vmem [#allocation11], %s4594_s26 }
  0xb5   : > { %v5315_v41 = vpack.c.bf16 %v580_v40, %v579_v39  ;;  %v581_v42 = vld [vmem:[#allocation5 + $0x20] sm:$0xff]  ;;  %v582_v43 = vld [vmem:[#allocation5 + $0x28] sm:$0xff]  ;;  %v6604_v46 = vld [vmem:[%s6507_s28 + $0x10] sm:$0xff]  ;;  %s7083_s19 = smov 0  }
  0xb6   : > { %5313 = vmatpush3.bf16.msra.mxu0 %v5312_v38  ;;  %v6598_v44 = vld [vmem:[%s6507_s28] sm:$0xff]  ;;  %v6601_v45 = vld [vmem:[%s6507_s28 + $0x8] sm:$0xff]  ;;  %v5318_v48 = vpack.c.bf16 %v582_v43, %v581_v42  ;;  %v6609_v49 = vld [vmem:[%s6507_s28 + $0x18] sm:$0xff]  ;;  %v508_v54 = vmul.f32 %v6604_v46, %v6604_v46 }
  0xb7   : > { %5314 = vmatprep.subr.bf16.mxu0 %v6216_v0  ;;  %v506_v47 = vmul.f32 %v6598_v44, %v6598_v44  ;;  %v469_v50 = vadd.f32 %v6601_v45, %v6598_v44  ;;  %v507_v51 = vmul.f32 %v6601_v45, %v6601_v45  ;;  %v583_v52 = vld [vmem:[#allocation5 + $0x30] sm:$0xff]  ;;  %v584_v53 = vld [vmem:[#allocation5 + $0x38] sm:$0xff]  ;;  %v6619_v55 = vld [vmem:[%s6507_s28 + $0x20] sm:$0xff]  ;;  %v509_v57 = vmul.f32 %v6609_v49, %v6609_v49 }
  0xb8   : > { %v5321_v59 = vpack.c.bf16 %v584_v53, %v583_v52  ;;  %v6625_v60 = vld [vmem:[%s6507_s28 + $0x28] sm:$0xff]  ;;  %v585_v62 = vld [vmem:[#allocation5 + $0x40] sm:$0xff]  ;;  %v510_v1 = vmul.f32 %v6619_v55, %v6619_v55  ;;  %v6632_v37 = vld [vmem:[%s6507_s28 + $0x30] sm:$0xff] }
  0xb9   : > { %v470_v56 = vadd.f32 %v469_v50, %v6604_v46  ;;  %v538_v58 = vadd.f32 %v507_v51, %v506_v47  ;;  %v586_v63 = vld [vmem:[#allocation5 + $0x48] sm:$0xff]  ;;  %v511_v39 = vmul.f32 %v6625_v60, %v6625_v60  ;;  %v587_v42 = vld [vmem:[#allocation5 + $0x50] sm:$0xff]  ;;  %v588_v43 = vld [vmem:[#allocation5 + $0x58] sm:$0xff]  ;;  %v512_v51 = vmul.f32 %v6632_v37, %v6632_v37 }
  0xba   : > { %5316 = vmatpush3.bf16.msra.mxu0 %v5315_v41  ;;  %v5324_v41 = vpack.c.bf16 %v586_v63, %v585_v62  ;;  %v6638_v47 = vld [vmem:[%s6507_s28 + $0x38] sm:$0xff]  ;;  %v6643_v50 = vld [vmem:[%s6507_s28 + $0x40] sm:$0xff]  ;;  %v6648_v53 = vld [vmem:[%s6507_s28 + $0x48] sm:$0xff] }
  0xbb   : > { %5317 = vmatprep.subr.bf16.mxu0 %v6216_v0  ;;  %v471_v61 = vadd.f32 %v470_v56, %v6609_v49  ;;  %v539_v36 = vadd.f32 %v538_v58, %v508_v54  ;;  %v589_v56 = vld [vmem:[#allocation5 + $0x60] sm:$0xff]  ;;  %v513_v58 = vmul.f32 %v6638_v47, %v6638_v47  ;;  %v514_v63 = vmul.f32 %v6643_v50, %v6643_v50  ;;  %v6708_v35 = vld [vmem:[%s6507_s28 + $0x90] sm:$0xff]  ;;  %v6714_v16 = vld [vmem:[%s6507_s28 + $0x98] sm:$0xff] }
  0xbc   : > { %v6720_v17 = vld [vmem:[%s6507_s28 + $0xa0] sm:$0xff]  ;;  %v6726_v14 = vld [vmem:[%s6507_s28 + $0xa8] sm:$0xff]  ;;  %v6732_v15 = vld [vmem:[%s6507_s28 + $0xb0] sm:$0xff] }
  0xbd   : > { %v472_v38 = vadd.f32 %v471_v61, %v6619_v55  ;;  %v540_v40 = vadd.f32 %v539_v36, %v509_v57  ;;  %v590_v57 = vld [vmem:[#allocation5 + $0x68] sm:$0xff]  ;;  %v5327_v61 = vpack.c.bf16 %v588_v43, %v587_v42  ;;  %v6658_v36 = vld [vmem:[%s6507_s28 + $0x50] sm:$0xff]  ;;  %v6738_v12 = vld [vmem:[%s6507_s28 + $0xb8] sm:$0xff] }
  0xbe   : > { %5319 = vmatpush3.bf16.msra.mxu0 %v5318_v48  ;;  %v591_v43 = vld [vmem:[#allocation5 + $0x70] sm:$0xff]  ;;  %v6744_v13 = vld [vmem:[%s6507_s28 + $0xc0] sm:$0xff]  ;;  %v6750_v10 = vld [vmem:[%s6507_s28 + $0xc8] sm:$0xff] }
  0xbf   : > { %5320 = vmatprep.subr.bf16.mxu0 %v6216_v0  ;;  %v473_v48 = vadd.f32 %v472_v38, %v6625_v60  ;;  %v541_v52 = vadd.f32 %v540_v40, %v510_v1  ;;  %v515_v40 = vmul.f32 %v6648_v53, %v6648_v53  ;;  %v6756_v11 = vld [vmem:[%s6507_s28 + $0xd0] sm:$0xff]  ;;  %v6762_v8 = vld [vmem:[%s6507_s28 + $0xd8] sm:$0xff]  ;;  %v6768_v9 = vld [vmem:[%s6507_s28 + $0xe0] sm:$0xff] }
  0xc0   : > { %v6774_v6 = vld [vmem:[%s6507_s28 + $0xe8] sm:$0xff]  ;;  %v6780_v7 = vld [vmem:[%s6507_s28 + $0xf0] sm:$0xff]  ;;  %v6786_v4 = vld [vmem:[%s6507_s28 + $0xf8] sm:$0xff] }
  0xc1   : > { %v474_v54 = vadd.f32 %v473_v48, %v6632_v37 }
  0xc2   : > { %5322 = vmatpush3.bf16.msra.mxu0 %v5321_v59  ;;  %v542_v59 = vadd.f32 %v541_v52, %v511_v39  ;;  %v5330_v39 = vpack.c.bf16 %v590_v57, %v589_v56  ;;  %v516_v52 = vmul.f32 %v6658_v36, %v6658_v36 }
  0xc3   : > { %5323 = vmatprep.subr.bf16.mxu0 %v6216_v0  ;;  %v475_v62 = vadd.f32 %v474_v54, %v6638_v47 }
  0xc4   : > { %v543_v1 = vadd.f32 %v542_v59, %v512_v51  ;;  %v592_v51 = vld [vmem:[#allocation5 + $0x78] sm:$0xff]  ;;  %v6671_v59 = vld [vmem:[%s6507_s28 + $0x60] sm:$0xff] }
  0xc5   : > { %v476_v38 = vadd.f32 %v475_v62, %v6643_v50  ;;  %v6677_v62 = vld [vmem:[%s6507_s28 + $0x68] sm:$0xff] }
  0xc6   : > { %5325 = vmatpush3.bf16.msra.mxu0 %v5324_v41  ;;  %v544_v48 = vadd.f32 %v543_v1, %v513_v58  ;;  %v6664_v41 = vld [vmem:[%s6507_s28 + $0x58] sm:$0xff] }
  0xc7   : > { %5326 = vmatprep.subr.bf16.mxu0 %v6216_v0  ;;  %v477_v42 = vadd.f32 %v476_v38, %v6648_v53  ;;  %v517_v56 = vmul.f32 %v6664_v41, %v6664_v41 }
  0xc8   : > { %v545_v54 = vadd.f32 %v544_v48, %v514_v63  ;;  %v518_v63 = vmul.f32 %v6671_v59, %v6671_v59  ;;  %v6684_v48 = vld [vmem:[%s6507_s28 + $0x70] sm:$0xff] }
  0xc9   : > { %v478_v58 = vadd.f32 %v477_v42, %v6658_v36 }
  0xca   : > { %5328 = vmatpush3.bf16.msra.mxu0 %v5327_v61  ;;  %v546_v57 = vadd.f32 %v545_v54, %v515_v40  ;;  %v5333_v61 = vpack.c.bf16 %v592_v51, %v591_v43  ;;  %v519_v40 = vmul.f32 %v6677_v62, %v6677_v62  ;;  %v6690_v43 = vld [vmem:[%s6507_s28 + $0x78] sm:$0xff]  ;;  %v520_v51 = vmul.f32 %v6684_v48, %v6684_v48 }
  0xcb   : > { %5329 = vmatprep.subr.bf16.mxu0 %v6216_v0  ;;  %v479_v1 = vadd.f32 %v478_v58, %v6664_v41 }
  0xcc   : > { %v547_v38 = vadd.f32 %v546_v57, %v516_v52  ;;  %v6696_v52 = vld [vmem:[%s6507_s28 + $0x80] sm:$0xff]  ;;  %v521_v57 = vmul.f32 %v6690_v43, %v6690_v43 }
  0xcd   : > { %v480_v42 = vadd.f32 %v479_v1, %v6671_v59 }
  0xce   : > { %5331 = vmatpush3.bf16.msra.mxu0 %v5330_v39  ;;  %v548_v39 = vadd.f32 %v547_v38, %v517_v56  ;;  %v6702_v56 = vld [vmem:[%s6507_s28 + $0x88] sm:$0xff]  ;;  %v522_v38 = vmul.f32 %v6696_v52, %v6696_v52 }
  0xcf   : > { %5332 = vmatprep.subr.bf16.mxu0 %v6216_v0  ;;  %v481_v0 = vadd.f32 %v480_v42, %v6677_v62 }
  0xd0   : > { %v549_v54 = vadd.f32 %v548_v39, %v518_v63  ;;  %v523_v39 = vmul.f32 %v6702_v56, %v6702_v56 }
  0xd1   : > { %v482_v58 = vadd.f32 %v481_v0, %v6684_v48 }
  0xd2   : > { %5334 = vmatpush3.bf16.msra.mxu0 %v5333_v61  ;;  %v550_v1 = vadd.f32 %v549_v54, %v519_v40  ;;  %v524_v54 = vmul.f32 %v6708_v35, %v6708_v35 }
  0xd3   : > { %v483_v61 = vadd.f32 %v482_v58, %v6690_v43 }
  0xd4   : > { %v551_v42 = vadd.f32 %v550_v1, %v520_v51  ;;  %v525_v1 = vmul.f32 %v6714_v16, %v6714_v16 }
  0xd5   : > { %v484_v63 = vadd.f32 %v483_v61, %v6696_v52 }
  0xd6   : > { %v552_v0 = vadd.f32 %v551_v42, %v521_v57  ;;  %v526_v42 = vmul.f32 %v6720_v17, %v6720_v17 }
  0xd7   : > { %v485_v40 = vadd.f32 %v484_v63, %v6702_v56 }
  0xd8   : > { %v553_v58 = vadd.f32 %v552_v0, %v522_v38  ;;  %v527_v0 = vmul.f32 %v6726_v14, %v6726_v14 }
  0xd9   : > { %v486_v51 = vadd.f32 %v485_v40, %v6708_v35 }
  0xda   : > { %v554_v61 = vadd.f32 %v553_v58, %v523_v39  ;;  %v528_v58 = vmul.f32 %v6732_v15, %v6732_v15 }
  0xdb   : > { %v487_v57 = vadd.f32 %v486_v51, %v6714_v16 }
  0xdc   : > { %v555_v63 = vadd.f32 %v554_v61, %v524_v54  ;;  %v529_v61 = vmul.f32 %v6738_v12, %v6738_v12 }
  0xdd   : > { %v488_v38 = vadd.f32 %v487_v57, %v6720_v17 }
  0xde   : > { %v556_v40 = vadd.f32 %v555_v63, %v525_v1  ;;  %v530_v63 = vmul.f32 %v6744_v13, %v6744_v13 }
  0xdf   : > { %v489_v39 = vadd.f32 %v488_v38, %v6726_v14 }
  0xe0   : > { %v557_v51 = vadd.f32 %v556_v40, %v526_v42  ;;  %v531_v40 = vmul.f32 %v6750_v10, %v6750_v10 }
  0xe1   : > { %v490_v54 = vadd.f32 %v489_v39, %v6732_v15 }
  0xe2   : > { %v558_v57 = vadd.f32 %v557_v51, %v527_v0  ;;  %v532_v51 = vmul.f32 %v6756_v11, %v6756_v11 }
  0xe3   : > { %v491_v1 = vadd.f32 %v490_v54, %v6738_v12 }
  0xe4   : > { %v559_v38 = vadd.f32 %v558_v57, %v528_v58  ;;  %v533_v57 = vmul.f32 %v6762_v8, %v6762_v8 }
  0xe5   : > { %v492_v42 = vadd.f32 %v491_v1, %v6744_v13 }
  0xe6   : > { %v560_v39 = vadd.f32 %v559_v38, %v529_v61  ;;  %v534_v38 = vmul.f32 %v6768_v9, %v6768_v9 }
  0xe7   : > { %v493_v0 = vadd.f32 %v492_v42, %v6750_v10 }
  0xe8   : > { %v561_v54 = vadd.f32 %v560_v39, %v530_v63  ;;  %v535_v39 = vmul.f32 %v6774_v6, %v6774_v6 }
  0xe9   : > { %v494_v58 = vadd.f32 %v493_v0, %v6756_v11 }
  0xea   : > { %v562_v1 = vadd.f32 %v561_v54, %v531_v40  ;;  %v536_v54 = vmul.f32 %v6780_v7, %v6780_v7 }
  0xeb   : > { %v495_v61 = vadd.f32 %v494_v58, %v6762_v8 }
  0xec   : > { %v563_v42 = vadd.f32 %v562_v1, %v532_v51  ;;  %v537_v51 = vmul.f32 %v6786_v4, %v6786_v4 }
  0xed   : > { %v496_v63 = vadd.f32 %v495_v61, %v6768_v9 }
  0xee   : > { %v564_v0 = vadd.f32 %v563_v42, %v533_v57 }
  0xef   : > { %v497_v40 = vadd.f32 %v496_v63, %v6774_v6 }
  0xf0   : > { %v565_v58 = vadd.f32 %v564_v0, %v534_v38 }
  0xf1   : > { %v498_v5 = vadd.f32 %v497_v40, %v6780_v7 }
  0xf2   : > { %v566_v1 = vadd.f32 %v565_v58, %v535_v39  ;;  %v5557_v39 = vld [vmem:[#allocation8 + $0x4] ss:$8 sps:$4 sm:$0xff]   ;;  %v5555_v58 = vld [vmem:[#allocation8] ss:$8 sps:$4 sm:$0xff]  }
  0xf3   : > { %v499_v61 = vadd.f32 %v498_v5, %v6786_v4  ;;  %883 = vmatprep.subr.bf16.mxu0 %v5557_v39  ;;  %5335 = vmatprep.subr.bf16.mxu1 %v5557_v39  ;;  %v5563_v5 = vld [vmem:[#allocation8 + $0x24] ss:$8 sps:$4 sm:$0xff]  }
  0xf4   : > { %v567_v2 = vadd.f32 %v566_v1, %v536_v54  ;;  %5343 = vmatpush1.bf16.msra.mxu1 %v5555_v58  ;;  %v5575_v54 = vld [vmem:[#allocation8 + $0x64] ss:$8 sps:$4 sm:$0xff]   ;;  %v5576_v1 = vld [vmem:[#allocation8 + $0x70] ss:$8 sps:$4 sm:$0xff]  }
  0xf5   : > { %v500_v3 = vrot.slane %v499_v61, 4 }
  0xf6   : > { %v568_v34 = vadd.f32 %v567_v2, %v537_v51  ;;  %v5560_v2 = vld [vmem:[#allocation8 + $0x14] ss:$8 sps:$4 sm:$0xff]   ;;  %v5573_v51 = vld [vmem:[#allocation8 + $0x60] ss:$8 sps:$4 sm:$0xff]  }
  0xf7   : > { %v501_v57 = vadd.f32 %v500_v3, %v499_v61  ;;  %v5558_v3 = vld [vmem:[#allocation8 + $0x10] ss:$8 sps:$4 sm:$0xff]   ;;  %5336 = vmatprep.subr.bf16.mxu1 %v5560_v2  ;;  %v5578_v61 = vld [vmem:[#allocation8 + $0x74] ss:$8 sps:$4 sm:$0xff]  }
  0xf8   : > { %v569_v42 = vrot.slane %v568_v34, 4  ;;  %5344 = vmatpush1.bf16.msra.mxu1 %v5558_v3 }
  0xf9   : > { %v502_v32 = vrot.slane %v501_v57, 2  ;;  %5337 = vmatprep.subr.bf16.mxu1 %v5563_v5 }
  0xfa   : > { %v570_v33 = vadd.f32 %v569_v42, %v568_v34  ;;  %v5570_v34 = vld [vmem:[#allocation8 + $0x50] ss:$8 sps:$4 sm:$0xff]  }
  0xfb   : > { %v503_v63 = vadd.f32 %v502_v32, %v501_v57  ;;  %v5567_v32 = vld [vmem:[#allocation8 + $0x40] ss:$8 sps:$4 sm:$0xff]   ;;  %v6219_v57 = vmov 0  }
  0xfc   : > { %v571_v30 = vrot.slane %v570_v33, 2  ;;  %975 = vmatprep.mubr.bf16.mxu1 %v6219_v57 }
  0xfd   : > { %v504_v31 = vrot.slane %v503_v63, 1 }
  0xfe   : > { %v572_v28 = vadd.f32 %v571_v30, %v570_v33  ;;  %v5561_v30 = vld [vmem:[#allocation8 + $0x20] ss:$8 sps:$4 sm:$0xff]   ;;  %v5572_v33 = vld [vmem:[#allocation8 + $0x54] ss:$8 sps:$4 sm:$0xff]  }
  0xff   : > { %v505_v38 = vadd.f32 %v504_v31, %v503_v63  ;;  %5345 = vmatpush1.bf16.msra.mxu1 %v5561_v30  ;;  %v5569_v31 = vld [vmem:[#allocation8 + $0x44] ss:$8 sps:$4 sm:$0xff]  }
 0x100   : > { %v573_v0 = vrot.slane %v572_v28, 1 }
 0x102   : > { %v574_v40 = vadd.f32 %v573_v0, %v572_v28  ;;  %v5566_v28 = vld [vmem:[#allocation8 + $0x34] ss:$8 sps:$4 sm:$0xff]  }
 0x103   : > { %5338 = vmatprep.subr.bf16.mxu1 %v5566_v28 }
 0x104   : > { %v576_v29 = vsel %vm575_vm1, %v505_v38, %v574_v40 }
 0x105   : > { %5197 = vmatmul.mubr.f32.vlgmr.msra.gmra.mrb[0].mxu0 %v576_v29  ;;  %v5564_v29 = vld [vmem:[#allocation8 + $0x30] ss:$8 sps:$4 sm:$0xff]  }
 0x106   : > { %884 = vmatpush1.bf16.msra.mxu0 %v5555_v58  ;;  %5346 = vmatpush1.bf16.msra.mxu1 %v5564_v29 }
 0x107   : > { %885 = vmatprep.subr.bf16.mxu0 %v5560_v2  ;;  %5339 = vmatprep.subr.bf16.mxu1 %v5569_v31  ;;  %v685_v2 = vlaneseq }
 0x108   : > { %915 = vmatprep.mubr.bf16.mxu0 %v6219_v57 }
 0x10a   : > { %886 = vmatpush1.bf16.msra.mxu0 %v5558_v3  ;;  %5347 = vmatpush1.bf16.msra.mxu1 %v5567_v32  ;;  %v6797_v3 = vshrl.u32 %v685_v2, 7 }
 0x10b   : > { %887 = vmatprep.subr.bf16.mxu0 %v5563_v5  ;;  %5340 = vmatprep.subr.bf16.mxu1 %v5572_v33  ;;  %v4600_v5 = vld [vmem:[%s8737_s2] ss:$0 sm:$0xff] }
 0x10e   : > { %888 = vmatpush1.bf16.msra.mxu0 %v5561_v30  ;;  %5348 = vmatpush1.bf16.msra.mxu1 %v5570_v34 }
 0x10f   : > { %889 = vmatprep.subr.bf16.mxu0 %v5566_v28  ;;  %5341 = vmatprep.subr.bf16.mxu1 %v5575_v54  ;;  %v687_v28 = vsub.s32 1, %v6797_v3 }
 0x112   : > { %890 = vmatpush1.bf16.msra.mxu0 %v5564_v29  ;;  %5349 = vmatpush1.bf16.msra.mxu1 %v5573_v51 }
 0x113   : > { %891 = vmatprep.subr.bf16.mxu0 %v5569_v31  ;;  %5342 = vmatprep.subr.bf16.mxu1 %v5578_v61 }
 0x116   : > { %892 = vmatpush1.bf16.msra.mxu0 %v5567_v32  ;;  %5350 = vmatpush1.bf16.msra.mxu1 %v5576_v1  ;;  %v679_v32 = vld [vmem:[%s8738_s3] sm:$0x1] }
 0x117   : > { %893 = vmatprep.subr.bf16.mxu0 %v5572_v33 }
 0x11a   : > { %894 = vmatpush1.bf16.msra.mxu0 %v5570_v34 }
 0x11b   : > { %895 = vmatprep.subr.bf16.mxu0 %v5575_v54  ;;  %v724_v54 = vsub.s32 0, %v6797_v3 }
 0x11e   : > { %896 = vmatpush1.bf16.msra.mxu0 %v5573_v51 }
 0x11f   : > { %897 = vmatprep.subr.bf16.mxu0 %v5578_v61 }
 0x122   : > { %898 = vmatpush1.bf16.msra.mxu0 %v5576_v1 }
 0x1d8   : > { %v659_v42 = vpop.f32.mrb[0].mxu0 }
 0x1d9   : > { %v663_v63 = vmul.f32 %v659_v42, %v659_v42  ;;  %v5198_v38 = vpop.f32.mrb[1].mxu0 }
 0x1db   : > { %v665_v0 = vrot.slane %v663_v63, 7 }
 0x1dd   : > { %v667_v40 = vsub.f32 %v659_v42, %v665_v0 }
 0x1df   : > { %v668_v39 = vmax.f32 %v667_v40, 0.0 }
 0x1e1   : > { %v669_v58 = vadd.f32 1e-05, %v668_v39 }
 0x1e3   : > { %5579 = vrsqrt.f32 %v669_v58 }
 0x1ed   : > { %v5580_v30 = vpop.eup %5579 }
 0x1ee   : > { %v678_v29 = vmul.f32 %v5580_v30, %v4600_v5 }
 0x1f0   : > { %v681_v31 = vrot.slane %v678_v29, 1  ;;  %v6808_v33 = vrot.slane %v678_v29, %v687_v28 }
 0x1f2   : > { %8952 = vst [vmem:[#allocation52_spill] sm:$0xff] %v6808_v33  ;;  %v683_v34 = vmul.f32 %v681_v31, %v659_v42  ;;  %v689_v1 = vmul.f32 %v6808_v33, %v6598_v44  ;;  %v690_v63 = vmul.f32 %v6808_v33, %v6601_v45  ;;  %v701_v38 = vmul.f32 %v6808_v33, %v6671_v59 }
 0x1f3   : > { %v702_v0 = vmul.f32 %v6808_v33, %v6677_v62  ;;  %v691_v5 = vmul.f32 %v6808_v33, %v6604_v46  ;;  %v692_v45 = vmul.f32 %v6808_v33, %v6609_v49  ;;  %v703_v59 = vmul.f32 %v6808_v33, %v6684_v48 }
 0x1f4   : > { %v684_v51 = vsub.f32 %v679_v32, %v683_v34  ;;  %v704_v62 = vmul.f32 %v6808_v33, %v6690_v43  ;;  %v693_v48 = vmul.f32 %v6808_v33, %v6619_v55  ;;  %v694_v43 = vmul.f32 %v6808_v33, %v6625_v60 }
 0x1f5   : > { %v705_v34 = vmul.f32 %v6808_v33, %v6696_v52 }
 0x1f6   : > { %v6815_v61 = vrot.slane %v684_v51, %v724_v54  ;;  %v717_v51 = vmul.f32 %v6808_v33, %v6768_v9  ;;  %v719_v9 = vmul.f32 %v6808_v33, %v6780_v7 }
 0x1f8   : > { %8953 = vst [vmem:[#allocation53_spill] sm:$0xff] %v6815_v61  ;;  %v727_v42 = vadd.f32 %v6815_v61, %v689_v1  ;;  %v728_v40 = vadd.f32 %v6815_v61, %v690_v63  ;;  %v739_v39 = vadd.f32 %v6815_v61, %v701_v38  ;;  %v740_v44 = vadd.f32 %v6815_v61, %v702_v0 }
 0x1f9   : > { %v729_v30 = vadd.f32 %v6815_v61, %v691_v5  ;;  %v730_v29 = vadd.f32 %v6815_v61, %v692_v45  ;;  %v741_v46 = vadd.f32 %v6815_v61, %v703_v59  ;;  %v742_v31 = vadd.f32 %v6815_v61, %v704_v62 }
 0x1fa   : > { %v759_v58 = vpack.c.bf16 %v728_v40, %v727_v42  ;;  %v765_v2 = vpack.c.bf16 %v740_v44, %v739_v39  ;;  %v731_v1 = vadd.f32 %v6815_v61, %v693_v48  ;;  %v706_v63 = vmul.f32 %v6808_v33, %v6702_v56 }
 0x1fb   : > { %v760_v32 = vpack.c.bf16 %v730_v29, %v729_v30  ;;  %v766_v49 = vpack.c.bf16 %v742_v31, %v741_v46  ;;  %v718_v38 = vmul.f32 %v6808_v33, %v6774_v6  ;;  %v732_v55 = vadd.f32 %v6815_v61, %v694_v43 }
 0x1fc   : > { %916 = vmatmul.mubr.bf16.vlgmr.msra.gmra.mrb[4].mxu0 %v759_v58  ;;  %976 = vmatmul.mubr.bf16.vlgmr.msra.gmra.mrb[0].mxu1 %v765_v2  ;;  %v6858_v60 = vadd.f32 %v6815_v61, %v717_v51  ;;  %v743_v52 = vadd.f32 %v6815_v61, %v705_v34  ;;  %v744_v0 = vadd.f32 %v6815_v61, %v706_v63 }
 0x1fd   : > { %925 = vmatprep.mubr.bf16.mxu0 %v6219_v57  ;;  %985 = vmatprep.mubr.bf16.mxu1 %v6219_v57  ;;  %v6865_v56 = vadd.f32 %v6815_v61, %v718_v38  ;;  %v720_v6 = vmul.f32 %v6808_v33, %v6786_v4  ;;  %v6870_v42 = vadd.f32 %v6815_v61, %v719_v9 }
 0x1fe   : > { %v761_v7 = vpack.c.bf16 %v732_v55, %v731_v1  ;;  %v767_v44 = vpack.c.bf16 %v744_v0, %v743_v52  ;;  %v695_v2 = vmul.f32 %v6808_v33, %v6632_v37  ;;  %v696_v4 = vmul.f32 %v6808_v33, %v6638_v47 }
 0x1ff   : > { %v773_v40 = vpack.c.bf16 %v6865_v56, %v6858_v60  ;;  %v6875_v39 = vadd.f32 %v6815_v61, %v720_v6  ;;  %v707_v5 = vmul.f32 %v6808_v33, %v6708_v35  ;;  %v708_v45 = vmul.f32 %v6808_v33, %v6714_v16 }
 0x200   : > { %v733_v59 = vadd.f32 %v6815_v61, %v695_v2  ;;  %v734_v62 = vadd.f32 %v6815_v61, %v696_v4  ;;  %v697_v35 = vmul.f32 %v6808_v33, %v6643_v50  ;;  %v698_v16 = vmul.f32 %v6808_v33, %v6648_v53 }
 0x201   : > { %v774_v58 = vpack.c.bf16 %v6875_v39, %v6870_v42  ;;  %v745_v37 = vadd.f32 %v6815_v61, %v707_v5  ;;  %v746_v30 = vadd.f32 %v6815_v61, %v708_v45  ;;  %v709_v46 = vmul.f32 %v6808_v33, %v6720_v17 }
 0x202   : > { %v762_v29 = vpack.c.bf16 %v734_v62, %v733_v59  ;;  %v710_v31 = vmul.f32 %v6808_v33, %v6726_v14  ;;  %v699_v17 = vmul.f32 %v6808_v33, %v6658_v36  ;;  %v700_v14 = vmul.f32 %v6808_v33, %v6664_v41 }
 0x203   : > { %v768_v47 = vpack.c.bf16 %v746_v30, %v745_v37  ;;  %v747_v50 = vadd.f32 %v6815_v61, %v709_v46  ;;  %v711_v34 = vmul.f32 %v6808_v33, %v6732_v15  ;;  %v712_v51 = vmul.f32 %v6808_v33, %v6738_v12 }
 0x204   : > { %926 = vmatmul.mubr.bf16.gmra.mrb[8].mxu0 %v760_v32  ;;  %986 = vmatmul.mubr.bf16.gmra.mrb[4].mxu1 %v766_v49  ;;  %v735_v32 = vadd.f32 %v6815_v61, %v697_v35  ;;  %v736_v49 = vadd.f32 %v6815_v61, %v698_v16  ;;  %v748_v48 = vadd.f32 %v6815_v61, %v710_v31 }
 0x205   : > { %935 = vmatprep.mubr.bf16.mxu0 %v6219_v57  ;;  %995 = vmatprep.mubr.bf16.mxu1 %v6219_v57  ;;  %v737_v1 = vadd.f32 %v6815_v61, %v699_v17  ;;  %v738_v63 = vadd.f32 %v6815_v61, %v700_v14  ;;  %v749_v36 = vadd.f32 %v6815_v61, %v711_v34 }
 0x206   : > { %v763_v43 = vpack.c.bf16 %v736_v49, %v735_v32  ;;  %v769_v53 = vpack.c.bf16 %v748_v48, %v747_v50  ;;  %v750_v38 = vadd.f32 %v6815_v61, %v712_v51  ;;  %v713_v15 = vmul.f32 %v6808_v33, %v6744_v13 }
 0x207   : > { %v764_v55 = vpack.c.bf16 %v738_v63, %v737_v1  ;;  %v714_v12 = vmul.f32 %v6808_v33, %v6750_v10  ;;  %v715_v6 = vmul.f32 %v6808_v33, %v6756_v11  ;;  %v716_v42 = vmul.f32 %v6808_v33, %v6762_v8  ;;  %v791_v8 = vld [vmem:[%s8954_s24] sm:$0x3] }
 0x208   : > { %v770_v41 = vpack.c.bf16 %v750_v38, %v749_v36  ;;  %v751_v9 = vadd.f32 %v6815_v61, %v713_v15  ;;  %v6945_v11 = vrot.slane %v791_v8, %v724_v54  ;;  %v6949_v2 = vrot.slane %v791_v8, %v687_v28 }
 0x209   : > { %v752_v52 = vadd.f32 %v6815_v61, %v714_v12  ;;  %v753_v13 = vadd.f32 %v6815_v61, %v715_v6  ;;  %v754_v10 = vadd.f32 %v6815_v61, %v716_v42 }
 0x20b   : > { %v771_v0 = vpack.c.bf16 %v752_v52, %v751_v9  ;;  %v772_v39 = vpack.c.bf16 %v754_v10, %v753_v13 }
 0x20c   : > { %936 = vmatmul.mubr.bf16.gmra.mrb[12].mxu0 %v761_v7  ;;  %996 = vmatmul.mubr.bf16.gmra.mrb[8].mxu1 %v767_v44 }
 0x20d   : > { %945 = vmatprep.mubr.bf16.mxu0 %v6219_v57  ;;  %1005 = vmatprep.mubr.bf16.mxu1 %v6219_v57 }
 0x214   : > { %946 = vmatmul.mubr.bf16.gmra.mrb[16].mxu0 %v762_v29  ;;  %1006 = vmatmul.mubr.bf16.gmra.mrb[12].mxu1 %v768_v47 }
 0x215   : > { %955 = vmatprep.mubr.bf16.mxu0 %v6219_v57  ;;  %1015 = vmatprep.mubr.bf16.mxu1 %v6219_v57 }
 0x21c   : > { %956 = vmatmul.mubr.bf16.gmra.mrb[20].mxu0 %v763_v43  ;;  %1016 = vmatmul.mubr.bf16.gmra.mrb[16].mxu1 %v769_v53 }
 0x21d   : > { %965 = vmatprep.mubr.bf16.mxu0 %v6219_v57  ;;  %1025 = vmatprep.mubr.bf16.mxu1 %v6219_v57 }
 0x224   : > { %966 = vmatmul.mubr.bf16.gmra.mrb[24].mxu0 %v764_v55  ;;  %1026 = vmatmul.mubr.bf16.gmra.mrb[20].mxu1 %v770_v41 }
 0x225   : > { %1035 = vmatprep.mubr.bf16.mxu1 %v6219_v57 }
 0x22c   : > { %1036 = vmatmul.mubr.bf16.gmra.mrb[24].mxu1 %v771_v0 }
 0x22d   : > { %1045 = vmatprep.mubr.bf16.mxu1 %v6219_v57 }
 0x234   : > { %1046 = vmatmul.mubr.bf16.gmra.mrb[28].mxu1 %v772_v39 }
 0x235   : > { %1055 = vmatprep.mubr.bf16.mxu1 %v6219_v57 }
 0x23c   : > { %1056 = vmatmul.mubr.bf16.gmra.mrb[32].mxu1 %v773_v40 }
 0x23d   : > { %1065 = vmatprep.mubr.bf16.mxu1 %v6219_v57 }
 0x244   : > { %1066 = vmatmul.mubr.bf16.gmra.mrb[36].mxu1 %v774_v58 }
 0x2cf   : > { %v917_v7 = vpop.f32.mrb[4].mxu0  ;;  %v977_v44 = vpop.f32.mrb[0].mxu1 }
 0x2d0   : > { %v918_v60 = vadd.f32 %v917_v7, %v6945_v11  ;;  %v978_v56 = vadd.f32 %v977_v44, %v6945_v11  ;;  %v919_v57 = vpop.f32.mrb[5].mxu0  ;;  %v979_v40 = vpop.f32.mrb[1].mxu1 }
 0x2d1   : > { %v921_v58 = vpop.f32.mrb[6].mxu0  ;;  %v981_v4 = vpop.f32.mrb[2].mxu1  ;;  %v920_v62 = vadd.f32 %v919_v57, %v6949_v2  ;;  %v980_v3 = vadd.f32 %v979_v40, %v6949_v2 }
 0x2d2   : > { %v922_v5 = vadd.f32 %v921_v58, %v6945_v11  ;;  %v982_v45 = vadd.f32 %v981_v4, %v6945_v11  ;;  %v923_v54 = vpop.f32.mrb[7].mxu0  ;;  %v983_v59 = vpop.f32.mrb[3].mxu1 }
 0x2d3   : > { %v924_v28 = vadd.f32 %v923_v54, %v6949_v2  ;;  %v984_v37 = vadd.f32 %v983_v59, %v6949_v2 }
 0x2d4   : > { %v6959_v30 = vpack.c.bf16 %v922_v5, %v918_v60  ;;  %v6961_v29 = vpack.c.bf16 %v982_v45, %v978_v56 }
 0x2d5   : > { %v6963_v47 = vpack.c.bf16 %v924_v28, %v920_v62  ;;  %v6965_v35 = vpack.c.bf16 %v984_v37, %v980_v3 }
 0x2d6   : > { %8955 = vst [vmem:[#allocation54_spill] sm:$0xff] %v6959_v30  ;;  %8956 = vst [vmem:[#allocation55_spill] sm:$0xff] %v6961_v29 }
 0x2d7   : > { %8957 = vst [vmem:[#allocation56_spill] sm:$0xff] %v6963_v47  ;;  %8958 = vst [vmem:[#allocation57_spill] sm:$0xff] %v6965_v35  ;;  %v927_v16 = vpop.f32.mrb[8].mxu0  ;;  %v987_v46 = vpop.f32.mrb[4].mxu1 }
 0x2d8   : > { %v928_v31 = vadd.f32 %v927_v16, %v6945_v11  ;;  %v988_v32 = vadd.f32 %v987_v46, %v6945_v11  ;;  %v929_v49 = vpop.f32.mrb[9].mxu0  ;;  %v989_v50 = vpop.f32.mrb[5].mxu1 }
 0x2d9   : > { %v931_v48 = vpop.f32.mrb[10].mxu0  ;;  %v991_v43 = vpop.f32.mrb[6].mxu1  ;;  %v930_v51 = vadd.f32 %v929_v49, %v6949_v2  ;;  %v990_v1 = vadd.f32 %v989_v50, %v6949_v2 }
 0x2da   : > { %v932_v53 = vadd.f32 %v931_v48, %v6945_v11  ;;  %v992_v17 = vadd.f32 %v991_v43, %v6945_v11  ;;  %v933_v14 = vpop.f32.mrb[11].mxu0  ;;  %v993_v34 = vpop.f32.mrb[7].mxu1 }
 0x2db   : > { %v934_v63 = vadd.f32 %v933_v14, %v6949_v2  ;;  %v994_v36 = vadd.f32 %v993_v34, %v6949_v2 }
 0x2dc   : > { %v6975_v38 = vpack.c.bf16 %v932_v53, %v928_v31  ;;  %v6977_v55 = vpack.c.bf16 %v992_v17, %v988_v32 }
 0x2dd   : > { %v6979_v41 = vpack.c.bf16 %v934_v63, %v930_v51  ;;  %v6981_v15 = vpack.c.bf16 %v994_v36, %v990_v1 }
 0x2de   : > { %8959 = vst [vmem:[#allocation58_spill] sm:$0xff] %v6975_v38  ;;  %8960 = vst [vmem:[#allocation59_spill] sm:$0xff] %v6977_v55 }
 0x2df   : > { %8961 = vst [vmem:[#allocation60_spill] sm:$0xff] %v6979_v41  ;;  %8962 = vst [vmem:[#allocation61_spill] sm:$0xff] %v6981_v15  ;;  %v937_v12 = vpop.f32.mrb[12].mxu0  ;;  %v997_v9 = vpop.f32.mrb[8].mxu1 }
 0x2e0   : > { %v938_v52 = vadd.f32 %v937_v12, %v6945_v11  ;;  %v998_v0 = vadd.f32 %v997_v9, %v6945_v11  ;;  %v939_v6 = vpop.f32.mrb[13].mxu0  ;;  %v999_v42 = vpop.f32.mrb[9].mxu1 }
 0x2e1   : > { %v941_v13 = vpop.f32.mrb[14].mxu0  ;;  %v1001_v10 = vpop.f32.mrb[10].mxu1  ;;  %v940_v60 = vadd.f32 %v939_v6, %v6949_v2  ;;  %v1000_v56 = vadd.f32 %v999_v42, %v6949_v2 }
 0x2e2   : > { %v942_v39 = vadd.f32 %v941_v13, %v6945_v11  ;;  %v1002_v8 = vadd.f32 %v1001_v10, %v6945_v11  ;;  %v943_v7 = vpop.f32.mrb[15].mxu0  ;;  %v1003_v44 = vpop.f32.mrb[11].mxu1 }
 0x2e3   : > { %v944_v57 = vadd.f32 %v943_v7, %v6949_v2  ;;  %v1004_v40 = vadd.f32 %v1003_v44, %v6949_v2 }
 0x2e4   : > { %v6991_v58 = vpack.c.bf16 %v942_v39, %v938_v52  ;;  %v6993_v4 = vpack.c.bf16 %v1002_v8, %v998_v0 }
 0x2e5   : > { %v6995_v5 = vpack.c.bf16 %v944_v57, %v940_v60  ;;  %v6997_v45 = vpack.c.bf16 %v1004_v40, %v1000_v56 }
 0x2e6   : > { %8963 = vst [vmem:[#allocation62_spill] sm:$0xff] %v6991_v58  ;;  %8964 = vst [vmem:[#allocation63_spill] sm:$0xff] %v6993_v4 }
 0x2e7   : > { %8965 = vst [vmem:[#allocation64_spill] sm:$0xff] %v6995_v5  ;;  %8966 = vst [vmem:[#allocation65_spill] sm:$0xff] %v6997_v45  ;;  %v947_v54 = vpop.f32.mrb[16].mxu0  ;;  %v1007_v59 = vpop.f32.mrb[12].mxu1 }
 0x2e8   : > { %v948_v62 = vadd.f32 %v947_v54, %v6945_v11  ;;  %v1008_v3 = vadd.f32 %v1007_v59, %v6945_v11  ;;  %v949_v28 = vpop.f32.mrb[17].mxu0  ;;  %v1009_v37 = vpop.f32.mrb[13].mxu1 }
 0x2e9   : > { %v951_v16 = vpop.f32.mrb[18].mxu0  ;;  %v1011_v46 = vpop.f32.mrb[14].mxu1  ;;  %v950_v48 = vadd.f32 %v949_v28, %v6949_v2  ;;  %v1010_v43 = vadd.f32 %v1009_v37, %v6949_v2 }
 0x2ea   : > { %v952_v31 = vadd.f32 %v951_v16, %v6945_v11  ;;  %v1012_v32 = vadd.f32 %v1011_v46, %v6945_v11  ;;  %v953_v49 = vpop.f32.mrb[19].mxu0  ;;  %v1013_v50 = vpop.f32.mrb[15].mxu1 }
 0x2eb   : > { %v954_v53 = vadd.f32 %v953_v49, %v6949_v2  ;;  %v1014_v17 = vadd.f32 %v1013_v50, %v6949_v2 }
 0x2ec   : > { %v7007_v14 = vpack.c.bf16 %v952_v31, %v948_v62  ;;  %v7009_v34 = vpack.c.bf16 %v1012_v32, %v1008_v3 }
 0x2ed   : > { %v7011_v51 = vpack.c.bf16 %v954_v53, %v950_v48  ;;  %v7013_v1 = vpack.c.bf16 %v1014_v17, %v1010_v43 }
 0x2ee   : > { %8967 = vst [vmem:[#allocation66_spill] sm:$0xff] %v7007_v14  ;;  %8968 = vst [vmem:[#allocation67_spill] sm:$0xff] %v7009_v34 }
 0x2ef   : > { %8969 = vst [vmem:[#allocation68_spill] sm:$0xff] %v7011_v51  ;;  %8970 = vst [vmem:[#allocation69_spill] sm:$0xff] %v7013_v1  ;;  %v957_v63 = vpop.f32.mrb[20].mxu0  ;;  %v1017_v36 = vpop.f32.mrb[16].mxu1 }
 0x2f0   : > { %v958_v12 = vadd.f32 %v957_v63, %v6945_v11  ;;  %v1018_v9 = vadd.f32 %v1017_v36, %v6945_v11  ;;  %v959_v52 = vpop.f32.mrb[21].mxu0  ;;  %v1019_v0 = vpop.f32.mrb[17].mxu1 }
 0x2f1   : > { %v961_v6 = vpop.f32.mrb[22].mxu0  ;;  %v1021_v42 = vpop.f32.mrb[18].mxu1  ;;  %v960_v7 = vadd.f32 %v959_v52, %v6949_v2  ;;  %v1020_v44 = vadd.f32 %v1019_v0, %v6949_v2 }
 0x2f2   : > { %v962_v13 = vadd.f32 %v961_v6, %v6945_v11  ;;  %v1022_v10 = vadd.f32 %v1021_v42, %v6945_v11  ;;  %v963_v39 = vpop.f32.mrb[23].mxu0  ;;  %v1023_v8 = vpop.f32.mrb[19].mxu1 }
 0x2f3   : > { %v964_v60 = vadd.f32 %v963_v39, %v6949_v2  ;;  %v1024_v56 = vadd.f32 %v1023_v8, %v6949_v2 }
 0x2f4   : > { %v7023_v57 = vpack.c.bf16 %v962_v13, %v958_v12  ;;  %v7025_v40 = vpack.c.bf16 %v1022_v10, %v1018_v9 }
 0x2f5   : > { %v7027_v54 = vpack.c.bf16 %v964_v60, %v960_v7  ;;  %v7029_v59 = vpack.c.bf16 %v1024_v56, %v1020_v44 }
 0x2f6   : > { %8971 = vst [vmem:[#allocation70_spill] sm:$0xff] %v7023_v57  ;;  %8972 = vst [vmem:[#allocation71_spill] sm:$0xff] %v7025_v40 }
 0x2f7   : > { %8973 = vst [vmem:[#allocation72_spill] sm:$0xff] %v7027_v54  ;;  %8974 = vst [vmem:[#allocation73_spill] sm:$0xff] %v7029_v59  ;;  %v967_v62 = vpop.f32.mrb[24].mxu0  ;;  %v1027_v3 = vpop.f32.mrb[20].mxu1 }
 0x2f8   : > { %v968_v28 = vadd.f32 %v967_v62, %v6945_v11  ;;  %v1028_v37 = vadd.f32 %v1027_v3, %v6945_v11  ;;  %v969_v16 = vpop.f32.mrb[25].mxu0  ;;  %v1029_v46 = vpop.f32.mrb[21].mxu1 }
 0x2f9   : > { %v971_v31 = vpop.f32.mrb[26].mxu0  ;;  %v1031_v32 = vpop.f32.mrb[22].mxu1  ;;  %v970_v53 = vadd.f32 %v969_v16, %v6949_v2  ;;  %v1030_v17 = vadd.f32 %v1029_v46, %v6949_v2 }
 0x2fa   : > { %v972_v49 = vadd.f32 %v971_v31, %v6945_v11  ;;  %v1032_v50 = vadd.f32 %v1031_v32, %v6945_v11  ;;  %v973_v48 = vpop.f32.mrb[27].mxu0  ;;  %v1033_v43 = vpop.f32.mrb[23].mxu1 }
 0x2fb   : > { %v974_v63 = vadd.f32 %v973_v48, %v6949_v2  ;;  %v1034_v36 = vadd.f32 %v1033_v43, %v6949_v2 }
 0x2fc   : > { %v7039_v12 = vpack.c.bf16 %v972_v49, %v968_v28  ;;  %v7041_v9 = vpack.c.bf16 %v1032_v50, %v1028_v37 }
 0x2fd   : > { %v7043_v52 = vpack.c.bf16 %v974_v63, %v970_v53  ;;  %v7045_v0 = vpack.c.bf16 %v1034_v36, %v1030_v17 }
 0x2fe   : > { %8975 = vst [vmem:[#allocation74_spill] sm:$0xff] %v7039_v12  ;;  %8976 = vst [vmem:[#allocation75_spill] sm:$0xff] %v7041_v9 }
 0x2ff   : > { %8977 = vst [vmem:[#allocation76_spill] sm:$0xff] %v7043_v52  ;;  %8978 = vst [vmem:[#allocation77_spill] sm:$0xff] %v7045_v0  ;;  %v1037_v6 = vpop.f32.mrb[24].mxu1 }
 0x300   : > { %v1038_v42 = vadd.f32 %v1037_v6, %v6945_v11  ;;  %v1039_v13 = vpop.f32.mrb[25].mxu1 }
 0x301   : > { %v1041_v10 = vpop.f32.mrb[26].mxu1  ;;  %v1040_v7 = vadd.f32 %v1039_v13, %v6949_v2 }
 0x302   : > { %v1042_v39 = vadd.f32 %v1041_v10, %v6945_v11  ;;  %v1043_v8 = vpop.f32.mrb[27].mxu1 }
 0x303   : > { %v1044_v44 = vadd.f32 %v1043_v8, %v6949_v2 }
 0x304   : > { %v7051_v60 = vpack.c.bf16 %v1042_v39, %v1038_v42 }
 0x305   : > { %v7053_v56 = vpack.c.bf16 %v1044_v44, %v1040_v7 }
 0x306   : > { %8979 = vst [vmem:[#allocation78_spill] sm:$0xff] %v7051_v60 }
 0x307   : > { %8980 = vst [vmem:[#allocation79_spill] sm:$0xff] %v7053_v56  ;;  %v1047_v62 = vpop.f32.mrb[28].mxu1 }
 0x308   : > { %v1048_v3 = vadd.f32 %v1047_v62, %v6945_v11  ;;  %v1049_v28 = vpop.f32.mrb[29].mxu1 }
 0x309   : > { %v1051_v37 = vpop.f32.mrb[30].mxu1  ;;  %v1050_v31 = vadd.f32 %v1049_v28, %v6949_v2 }
 0x30a   : > { %v1052_v16 = vadd.f32 %v1051_v37, %v6945_v11  ;;  %v1053_v46 = vpop.f32.mrb[31].mxu1 }
 0x30b   : > { %v1054_v32 = vadd.f32 %v1053_v46, %v6949_v2 }
 0x30c   : > { %v7059_v49 = vpack.c.bf16 %v1052_v16, %v1048_v3 }
 0x30d   : > { %v7061_v50 = vpack.c.bf16 %v1054_v32, %v1050_v31 }
 0x30e   : > { %8981 = vst [vmem:[#allocation80_spill] sm:$0xff] %v7059_v49 }
 0x30f   : > { %8982 = vst [vmem:[#allocation81_spill] sm:$0xff] %v7061_v50  ;;  %v1057_v48 = vpop.f32.mrb[32].mxu1 }
 0x310   : > { %v1058_v43 = vadd.f32 %v1057_v48, %v6945_v11  ;;  %v1059_v53 = vpop.f32.mrb[33].mxu1 }
 0x311   : > { %v1061_v17 = vpop.f32.mrb[34].mxu1  ;;  %v1060_v6 = vadd.f32 %v1059_v53, %v6949_v2 }
 0x312   : > { %v1062_v63 = vadd.f32 %v1061_v17, %v6945_v11  ;;  %v1063_v36 = vpop.f32.mrb[35].mxu1 }
 0x313   : > { %v1064_v42 = vadd.f32 %v1063_v36, %v6949_v2 }
 0x314   : > { %v7067_v13 = vpack.c.bf16 %v1062_v63, %v1058_v43 }
 0x315   : > { %v7069_v10 = vpack.c.bf16 %v1064_v42, %v1060_v6 }
 0x316   : > { %8983 = vst [vmem:[#allocation82_spill] sm:$0xff] %v7067_v13 }
 0x317   : > { %8984 = vst [vmem:[#allocation83_spill] sm:$0xff] %v7069_v10  ;;  %v1067_v39 = vpop.f32.mrb[36].mxu1 }
 0x318   : > { %v1068_v8 = vadd.f32 %v1067_v39, %v6945_v11  ;;  %v1069_v7 = vpop.f32.mrb[37].mxu1 }
 0x319   : > { %v1071_v44 = vpop.f32.mrb[38].mxu1  ;;  %v1070_v28 = vadd.f32 %v1069_v7, %v6949_v2 }
 0x31a   : > { %v1072_v62 = vadd.f32 %v1071_v44, %v6945_v11  ;;  %v1073_v3 = vpop.f32.mrb[39].mxu1 }
 0x31b   : > { %v1074_v37 = vadd.f32 %v1073_v3, %v6949_v2 }
 0x31c   : > { %v7075_v16 = vpack.c.bf16 %v1072_v62, %v1068_v8 }
 0x31d   : > { %v7077_v46 = vpack.c.bf16 %v1074_v37, %v1070_v28 }
 0x31e   : > { %8985 = vst [vmem:[#allocation84_spill] sm:$0xff] %v7075_v16 }
 0x31f   : > { %8986 = vst [vmem:[#allocation85_spill] sm:$0xff] %v7077_v46 }
 0x320 LB: >> { %v8987_v51 = vld [vmem:[#allocation68_spill] sm:$0xff]  ;;  %v8988_v0 = vld [vmem:[#allocation77_spill] sm:$0xff]  ;;  %v8989_v60 = vld [vmem:[#allocation78_spill] sm:$0xff]  ;;  %s6220_s21 = smov 96   ;;  %s4617_s26 = sshll.u32 %s6205_s19, 7  ;;  %vm1387_vm2 = vcmask 261120   ;;  %s6205_s19 = sphi %s7083_s19, %s1147_s19  }
 0x321   : >> { %v8990_v49 = vld [vmem:[#allocation80_spill] sm:$0xff]  ;;  %v8991_v12 = vld [vmem:[#allocation74_spill] sm:$0xff]  ;;  %v8992_v29 = vld [vmem:[#allocation55_spill] sm:$0xff]  ;;  %s7100_s27 = scalar_lea.vmem %s6507_s28, %s4617_s26 [#allocation2]  ;;  %s6221_s23 = smov 64  }
 0x322   : >> { %v8993_v13 = vld [vmem:[#allocation82_spill] sm:$0xff]  ;;  %v8994_v55 = vld [vmem:[#allocation59_spill] sm:$0xff]  ;;  %v8996_v45 = vld [vmem:[#allocation65_spill] sm:$0xff]  ;;  %s6222_s10 = smov 32   ;;  %s8637_s18 = scalar_lea.vmem %s7081_s7, %s4617_s26 [#allocation11] }
 0x323   : >> { %v8997_v1 = vld [vmem:[#allocation69_spill] sm:$0xff]  ;;  %v8998_v41 = vld [vmem:[#allocation60_spill] sm:$0xff]  ;;  %v9003_v58 = vld [vmem:[#allocation62_spill] sm:$0xff]  ;;  %s1147_s19 = sadd.s32 1, %s6205_s19  }
 0x324   : >> { %v8999_v47 = vld [vmem:[#allocation56_spill] sm:$0xff]  ;;  %v9001_v59 = vld [vmem:[#allocation73_spill] sm:$0xff]  ;;  %v9004_v57 = vld [vmem:[#allocation70_spill] sm:$0xff]  ;;  %v1419_v37 = vsel %vm1387_vm2, %v9003_v58, 0  ;;  %p1144_p3 = scmp.ge.s32.totalorder %s1147_s19, 2  }
 0x325   : >> { %v8995_v16 = vld [vmem:[#allocation84_spill] sm:$0xff]  ;;  %v9002_v61 = vld [vmem:[#allocation53_spill] sm:$0xff]  ;;  %v9005_v40 = vld [vmem:[#allocation71_spill] sm:$0xff]  ;;  %s4706_s12 = sshll.u32 (%p1144_p3), %s6302_s17, 12  ;;  %s9265_s13 = sld [smem:[#allocation125_spill]] (%p1144_p3) }
 0x326   : >> { %v9000_v5 = vld [vmem:[#allocation64_spill] sm:$0xff]  ;;  %v9006_v38 = vld [vmem:[#allocation58_spill] sm:$0xff]  ;;  %v9007_v34 = vld [vmem:[#allocation67_spill] sm:$0xff]  ;;  %s4463_s26 = sshll.u32 (%p1144_p3), %s7081_s7, 4  ;;  %s6223_s28 = smov (%p1144_p3), [#allocation11]   ;;  %s8691_s26 = int_to_ptr.vmem [resolvable:$true] %s4463_s26 }
 0x327   : >> { %v9008_v33 = vld [vmem:[#allocation52_spill] sm:$0xff]  ;;  %v9009_v30 = vld [vmem:[#allocation54_spill] sm:$0xff]  ;;  %v9011_v9 = vld [vmem:[#allocation75_spill] sm:$0xff]  ;;  %2109 = vrot.lane.b32.xlu1 %v9006_v38, %s6220_s21  ;;  %v1416_v39 = vsel %vm1387_vm2, %v9006_v38, 0  ;;  %s6127_s19 = sshll.u32 (%p1144_p3), %s6223_s28, 4  ;;  %s6128_s19 = int_to_ptr.vmem [resolvable:$false] %s6127_s19 }
 0x328   : >> { %v9010_v14 = vld [vmem:[#allocation66_spill] sm:$0xff]  ;;  %v9012_v4 = vld [vmem:[#allocation63_spill] sm:$0xff]  ;;  %v9015_v21 = vld [vmem:[#allocation37_spill] sm:$0xff]  ;;  %2107 = vrot.lane.b32.xlu0 %v9009_v30, %s6220_s21  ;;  %v1413_v31 = vsel %vm1387_vm2, %v9009_v30, 0  ;;  %s6129_s17 = scalar_lea.vmem (%p1144_p3), %s6128_s19, 8192  ;;  %p6130_p1 = scmp.lt.s32.totalorder (%p1144_p3), %s8691_s26, %s6128_s19 }
 0x329   : >> { %v9013_v19 = vld [vmem:[#allocation35_spill] sm:$0xff]  ;;  %v9014_v18 = vld [vmem:[#allocation34_spill] sm:$0xff]  ;;  %v9016_v20 = vld [vmem:[#allocation36_spill] sm:$0xff]  ;;  %5415 = vmatprep.subr.msk.bf16.mxu1 %vm1387_vm2, %v9012_v4 }
 0x32a   : >> { %v4619_v11 = vcombine.low %v9014_v18, %v9013_v19  ;;  %v4620_v2 = vcombine.low %v9016_v20, %v9015_v21  ;;  %v9017_v23 = vld [vmem:[#allocation39_spill] sm:$0xff]  ;;  %v9018_v22 = vld [vmem:[#allocation38_spill] sm:$0xff]  ;;  %4741 = vmatpush3.bf16.xpose.msra.mxu1 %v1413_v31  ;;  %v9019_v25 = vld [vmem:[#allocation41_spill] sm:$0xff] }
 0x32b   : >> { %v4621_v32 = vcombine.low %v9018_v22, %v9017_v23  ;;  %v1150_v48 = vld [vmem:[%s7100_s27] sm:$0xff]  ;;  %v1151_v43 = vld [vmem:[%s7100_s27 + $0x8] sm:$0xff]  ;;  %5416 = vmatprep.subr.msk.bf16.mxu1 %vm1387_vm2, %v9007_v34  ;;  %2125 = vrot.lane.b32.xlu1 %v9007_v34, %s6220_s21  ;;  %v9020_v24 = vld [vmem:[#allocation40_spill] sm:$0xff]  ;;  %s9266_s24 = smov (%p1144_p3), %s9265_s13 }
 0x32c   : >> { %5199 = vmatprep.subr.bf16.mxu0 %v4619_v11  ;;  %v1166_v53 = vmul.f32 %v1150_v48, %v9008_v33  ;;  %v1167_v17 = vmul.f32 %v1151_v43, %v9008_v33  ;;  %2123 = vrot.lane.b32.xlu0 %v9012_v4, %s6220_s21  ;;  %v4622_v6 = vcombine.low %v9020_v24, %v9019_v25  ;;  %v9021_v27 = vld [vmem:[#allocation43_spill] sm:$0xff]  ;;  %v9022_v26 = vld [vmem:[#allocation42_spill] sm:$0xff]  ;;  %v9023_v7 = vld [vmem:[#allocation45_spill] sm:$0xff] }
 0x32d   : >> { %5200 = vmatpush3.bf16.msra.mxu0 %v4619_v11  ;;  %v4623_v8 = vcombine.low %v9022_v26, %v9021_v27  ;;  %v9024_v44 = vld [vmem:[#allocation44_spill] sm:$0xff]  ;;  %v1153_v28 = vld [vmem:[%s7100_s27 + $0x18] sm:$0xff]  ;;  %v9025_v11 = vld [vmem:[#allocation47_spill] sm:$0xff] }
 0x32e   : >> { %5201 = vmatprep.subr.bf16.mxu0 %v4620_v2  ;;  %v1182_v63 = vadd.f32 %v1166_v53, %v9002_v61  ;;  %v1183_v36 = vadd.f32 %v1167_v17, %v9002_v61  ;;  %v4624_v62 = vcombine.low %v9024_v44, %v9023_v7  ;;  %v1152_v3 = vld [vmem:[%s7100_s27 + $0x10] sm:$0xff]  ;;  %v1155_v48 = vld [vmem:[%s7100_s27 + $0x28] sm:$0xff]  ;;  %v1169_v53 = vmul.f32 %v1153_v28, %v9008_v33  ;;  %v9031_v50 = vld [vmem:[#allocation81_spill] sm:$0xff] }
 0x32f   : >> { %2127 = vrot.lane.b32.xlu1 %v9005_v40, %s6220_s21  ;;  %v1168_v43 = vmul.f32 %v1152_v3, %v9008_v33  ;;  %v1157_v3 = vld [vmem:[%s7100_s27 + $0x38] sm:$0xff]  ;;  %v1422_v28 = vsel %vm1387_vm2, %v9010_v14, 0  ;;  %v9029_v56 = vld [vmem:[#allocation79_spill] sm:$0xff]  ;;  %v9030_v54 = vld [vmem:[#allocation72_spill] sm:$0xff] }
 0x330   : >> { %v1198_v42 = vpack.c.bf16 %v1183_v36, %v1182_v63  ;;  %2111 = vrot.lane.b32.xlu0 %v9003_v58, %s6220_s21  ;;  %v1171_v63 = vmul.f32 %v1155_v48, %v9008_v33  ;;  %v9027_v36 = vld [vmem:[#allocation49_spill] sm:$0xff]  ;;  %v9032_v52 = vld [vmem:[#allocation76_spill] sm:$0xff]  ;;  %v9033_v10 = vld [vmem:[#allocation83_spill] sm:$0xff] }
 0x331   : >> { %5202 = vmatpush3.bf16.msra.mxu0 %v4620_v2  ;;  %v9026_v2 = vld [vmem:[#allocation46_spill] sm:$0xff]  ;;  %v9034_v35 = vld [vmem:[#allocation57_spill] sm:$0xff] }
 0x332   : >> { %5203 = vmatprep.subr.bf16.mxu0 %v4621_v32  ;;  %5215 = vmatprep.mubr.bf16.mxu0 %v1198_v42  ;;  %v4625_v31 = vcombine.low %v9026_v2, %v9025_v11  ;;  %v1187_v44 = vadd.f32 %v1171_v63, %v9002_v61  ;;  %v1159_v11 = vld [vmem:[%s7100_s27 + $0x48] sm:$0xff]  ;;  %v9035_v46 = vld [vmem:[#allocation85_spill] sm:$0xff] }
 0x333   : >> { %2129 = vrot.lane.b32.xlu1 %v9011_v9, %s6220_s21  ;;  %4743 = vmatpush3.bf16.xpose.msra.mxu1 %v1416_v39  ;;  %v1184_v39 = vadd.f32 %v1168_v43, %v9002_v61  ;;  %v9036_v15 = vld [vmem:[#allocation61_spill] sm:$0xff] }
 0x334   : >> { %2113 = vrot.lane.b32.xlu0 %v9010_v14, %s6220_s21  ;;  %5417 = vmatprep.subr.msk.bf16.mxu1 %vm1387_vm2, %v9005_v40 }
 0x335   : >> { %5204 = vmatpush3.bf16.msra.mxu0 %v4621_v32  ;;  %v1154_v32 = vld [vmem:[%s7100_s27 + $0x20] sm:$0xff] }
 0x336   : >> { %5205 = vmatprep.subr.bf16.mxu0 %v4622_v6  ;;  %v1170_v17 = vmul.f32 %v1154_v32, %v9008_v33 }
 0x337   : >> { %2131 = vrot.lane.b32.xlu1 %v8989_v60, %s6220_s21 }
 0x338   : >> { %2115 = vrot.lane.b32.xlu0 %v9004_v57, %s6220_s21  ;;  %v1186_v7 = vadd.f32 %v1170_v17, %v9002_v61 }
 0x339   : >> { %5206 = vmatpush3.bf16.msra.mxu0 %v4622_v6  ;;  %v9028_v6 = vld [vmem:[#allocation48_spill] sm:$0xff] }
 0x33a   : >> { %5207 = vmatprep.subr.bf16.mxu0 %v4623_v8  ;;  %v4626_v42 = vcombine.low %v9028_v6, %v9027_v36  ;;  %v1200_v48 = vpack.c.bf16 %v1187_v44, %v1186_v7  ;;  %v1162_v7 = vld [vmem:[%s7100_s27 + $0x60] sm:$0xff]  ;;  %v1163_v44 = vld [vmem:[%s7100_s27 + $0x68] sm:$0xff] }
 0x33b   : >> { %2133 = vrot.lane.b32.xlu1 %v8990_v49, %s6220_s21  ;;  %4745 = vmatpush3.bf16.xpose.msra.mxu1 %v1419_v37  ;;  %v1158_v37 = vld [vmem:[%s7100_s27 + $0x40] sm:$0xff] }
 0x33c   : >> { %2117 = vrot.lane.b32.xlu0 %v8991_v12, %s6220_s21  ;;  %5418 = vmatprep.subr.msk.bf16.mxu1 %vm1387_vm2, %v9011_v9  ;;  %v1174_v43 = vmul.f32 %v1158_v37, %v9008_v33 }
 0x33d   : >> { %5208 = vmatpush3.bf16.msra.mxu0 %v4623_v8  ;;  %v1185_v8 = vadd.f32 %v1169_v53, %v9002_v61  ;;  %v1175_v53 = vmul.f32 %v1159_v11, %v9008_v33  ;;  %v1178_v11 = vmul.f32 %v1162_v7, %v9008_v33 }
 0x33e   : >> { %5209 = vmatprep.subr.bf16.mxu0 %v4624_v62  ;;  %v1190_v36 = vadd.f32 %v1174_v43, %v9002_v61 }
 0x33f   : >> { %2135 = vrot.lane.b32.xlu1 %v8993_v13, %s6220_s21  ;;  %v1199_v2 = vpack.c.bf16 %v1185_v8, %v1184_v39  ;;  %v1191_v6 = vadd.f32 %v1175_v53, %v9002_v61  ;;  %v1161_v39 = vld [vmem:[%s7100_s27 + $0x58] sm:$0xff]  ;;  %v1425_v8 = vsel %vm1387_vm2, %v9004_v57, 0  ;;  %v1164_v53 = vld [vmem:[%s7100_s27 + $0x70] sm:$0xff] }
 0x340   : >> { %2119 = vrot.lane.b32.xlu0 %v8992_v29, %s6220_s21 }
 0x341   : >> { %5210 = vmatpush3.bf16.msra.mxu0 %v4624_v62  ;;  %v1156_v62 = vld [vmem:[%s7100_s27 + $0x30] sm:$0xff]  ;;  %v1202_v37 = vpack.c.bf16 %v1191_v6, %v1190_v36  ;;  %v1180_v6 = vmul.f32 %v1164_v53, %v9008_v33 }
 0x342   : >> { %5211 = vmatprep.subr.bf16.mxu0 %v4625_v31  ;;  %v1172_v32 = vmul.f32 %v1156_v62, %v9008_v33 }
 0x343   : >> { %2137 = vrot.lane.b32.xlu1 %v8995_v16, %s6220_s21  ;;  %4747 = vmatpush3.bf16.xpose.msra.mxu1 %v1422_v28  ;;  %v1177_v28 = vmul.f32 %v1161_v39, %v9008_v33 }
 0x344   : >> { %2121 = vrot.lane.b32.xlu0 %v8994_v55, %s6220_s21  ;;  %5419 = vmatprep.subr.msk.bf16.mxu1 %vm1387_vm2, %v8989_v60  ;;  %v1188_v17 = vadd.f32 %v1172_v32, %v9002_v61 }
 0x345   : >> { %5212 = vmatpush3.bf16.msra.mxu0 %v4625_v31  ;;  %v1173_v31 = vmul.f32 %v1157_v3, %v9008_v33 }
 0x346   : >> { %5213 = vmatprep.subr.bf16.mxu0 %v4626_v42 }
 0x347   : >> { %v1189_v63 = vadd.f32 %v1173_v31, %v9002_v61  ;;  %2918 = vrot.lane.b32.xlu1 %v9005_v40, %s6221_s23  ;;  %v1193_v31 = vadd.f32 %v1177_v28, %v9002_v61 }
 0x348   : >> { %2898 = vrot.lane.b32.xlu0 %v9009_v30, %s6221_s23 }
 0x349   : >> { %5214 = vmatpush3.bf16.msra.mxu0 %v4626_v42  ;;  %v1160_v42 = vld [vmem:[%s7100_s27 + $0x50] sm:$0xff]  ;;  %v1201_v62 = vpack.c.bf16 %v1189_v63, %v1188_v17  ;;  %v1165_v17 = vld [vmem:[%s7100_s27 + $0x78] sm:$0xff]  ;;  %v1428_v63 = vsel %vm1387_vm2, %v8991_v12, 0 }
 0x34a   : >> { %4772 = vmatprep.subr.bf16.mxu0 %v8996_v45  ;;  %v1176_v3 = vmul.f32 %v1160_v42, %v9008_v33  ;;  %v1181_v42 = vmul.f32 %v1165_v17, %v9008_v33 }
 0x34b   : >> { %2920 = vrot.lane.b32.xlu1 %v9011_v9, %s6221_s23  ;;  %4749 = vmatpush3.bf16.xpose.msra.mxu1 %v1425_v8  ;;  %v1196_v8 = vadd.f32 %v1180_v6, %v9002_v61 }
 0x34c   : >> { %5216 = vmatmul.mubr.bf16.vlgmr.msra.gmra.mrb[0].mxu0 %v1199_v2  ;;  %2914 = vrot.lane.b32.xlu0 %v9012_v4, %s6221_s23  ;;  %v1179_v2 = vmul.f32 %v1163_v44, %v9008_v33  ;;  %v1192_v32 = vadd.f32 %v1176_v3, %v9002_v61  ;;  %v1197_v7 = vadd.f32 %v1181_v42, %v9002_v61  ;;  %v1431_v44 = vsel %vm1387_vm2, %v8992_v29, 0 }
 0x34d   : >> { %5219 = vmatprep.mubr.bf16.mxu0 %v1200_v48  ;;  %4773 = vmatpush3.bf16.msra.mxu0 %v8999_v47  ;;  %v1194_v48 = vadd.f32 %v1178_v11, %v9002_v61  ;;  %v1434_v3 = vsel %vm1387_vm2, %v8994_v55, 0 }
 0x34e   : >> { %4774 = vmatprep.subr.bf16.mxu0 %v8997_v1  ;;  %5420 = vmatprep.subr.msk.bf16.mxu1 %vm1387_vm2, %v8990_v49  ;;  %v1195_v43 = vadd.f32 %v1179_v2, %v9002_v61  ;;  %v1203_v36 = vpack.c.bf16 %v1193_v31, %v1192_v32  ;;  %v9037_v31 = vld [vmem:[#allocation50_spill] sm:$0xff] }
 0x34f   : >> { %2922 = vrot.lane.b32.xlu1 %v8989_v60, %s6221_s23 }
 0x350   : >> { %2900 = vrot.lane.b32.xlu0 %v9006_v38, %s6221_s23  ;;  %v1204_v39 = vpack.c.bf16 %v1195_v43, %v1194_v48 }
 0x351   : >> { %4775 = vmatpush3.bf16.msra.mxu0 %v8998_v41 }
 0x352   : >> { %4776 = vmatprep.subr.bf16.mxu0 %v9001_v59 }
 0x353   : >> { %2924 = vrot.lane.b32.xlu1 %v8990_v49, %s6221_s23  ;;  %4751 = vmatpush3.bf16.xpose.msra.mxu1 %v1428_v63 }
 0x354   : >> { %5220 = vmatmul.mubr.bf16.gmra.mrb[4].mxu0 %v1201_v62  ;;  %2916 = vrot.lane.b32.xlu0 %v9007_v34, %s6221_s23  ;;  %v1205_v62 = vpack.c.bf16 %v1197_v7, %v1196_v8 }
 0x355   : >> { %5223 = vmatprep.mubr.bf16.mxu0 %v1202_v37  ;;  %4777 = vmatpush3.bf16.msra.mxu0 %v9000_v5 }
 0x356   : >> { %4778 = vmatprep.subr.bf16.mxu0 %v8988_v0  ;;  %5421 = vmatprep.subr.msk.bf16.mxu1 %vm1387_vm2, %v8993_v13 }
 0x357   : >> { %2926 = vrot.lane.b32.xlu1 %v8993_v13, %s6221_s23 }
 0x358   : >> { %2902 = vrot.lane.b32.xlu0 %v9003_v58, %s6221_s23 }
 0x359   : >> { %4779 = vmatpush3.bf16.msra.mxu0 %v8987_v51 }
 0x35a   : >> { %4780 = vmatprep.subr.bf16.mxu0 %v9029_v56 }
 0x35b   : >> { %2928 = vrot.lane.b32.xlu1 %v8995_v16, %s6221_s23  ;;  %4753 = vmatpush3.bf16.xpose.msra.mxu1 %v1431_v44 }
 0x35c   : >> { %5224 = vmatmul.mubr.bf16.gmra.mrb[8].mxu0 %v1203_v36  ;;  %2904 = vrot.lane.b32.xlu0 %v9010_v14, %s6221_s23 }
 0x35d   : >> { %5227 = vmatprep.mubr.bf16.mxu0 %v1204_v39  ;;  %4781 = vmatpush3.bf16.msra.mxu0 %v9030_v54 }
 0x35e   : >> { %4782 = vmatprep.subr.bf16.mxu0 %v9031_v50  ;;  %5422 = vmatprep.subr.msk.bf16.mxu1 %vm1387_vm2, %v8995_v16 }
 0x35f   : >> { %3673 = vrot.lane.b32.xlu1 %v9009_v30, %s6222_s10 }
 0x360   : >> { %2906 = vrot.lane.b32.xlu0 %v9004_v57, %s6221_s23 }
 0x361   : >> { %4783 = vmatpush3.bf16.msra.mxu0 %v9032_v52 }
 0x362   : >> { %4784 = vmatprep.subr.bf16.mxu0 %v9033_v10 }
 0x363   : >> { %3675 = vrot.lane.b32.xlu1 %v9006_v38, %s6222_s10  ;;  %4755 = vmatpush3.bf16.xpose.msra.mxu1 %v1434_v3 }
 0x364   : >> { %5228 = vmatmul.mubr.bf16.gmra.mrb[12].mxu0 %v1205_v62  ;;  %2908 = vrot.lane.b32.xlu0 %v8991_v12, %s6221_s23 }
 0x365   : >> { %4785 = vmatpush3.bf16.msra.mxu0 %v9034_v35 }
 0x366   : >> { %4786 = vmatprep.subr.bf16.mxu0 %v9035_v46 }
 0x367   : >> { %3677 = vrot.lane.b32.xlu1 %v9003_v58, %s6222_s10 }
 0x368   : >> { %2910 = vrot.lane.b32.xlu0 %v8992_v29, %s6221_s23 }
 0x369   : >> { %4787 = vmatpush3.bf16.msra.mxu0 %v9036_v15 }
 0x36c   : >> { %2912 = vrot.lane.b32.xlu0 %v8994_v55, %s6221_s23 }
 0x370   : >> { %3689 = vrot.lane.b32.xlu0 %v9012_v4, %s6222_s10 }
 0x374   : >> { %3691 = vrot.lane.b32.xlu0 %v9007_v34, %s6222_s10 }
 0x378   : >> { %3693 = vrot.lane.b32.xlu0 %v9005_v40, %s6222_s10 }
 0x399   : >> { %v2110_v36 = vpop.permute.xlu1 %2109 }
 0x39a   : >> { %v2108_v28 = vpop.permute.xlu0 %2107 }
 0x39b   : >> { %v2164_v39 = vsel %vm1387_vm2, %v2108_v28, 0 }
 0x39e   : >> { %v2124_v37 = vpop.permute.xlu0 %2123 }
 0x39f   : >> { %5423 = vmatprep.subr.msk.bf16.mxu1 %vm1387_vm2, %v2124_v37 }
 0x3a2   : >> { %v2112_v8 = vpop.permute.xlu0 %2111 }
 0x41f   : >> { %v5217_v11 = vpop.f32.mrb[0].mxu0 }
 0x420   : >> { %v1294_v2 = vpop.f32.mrb[1].mxu0  ;;  %v1303_v48 = vadd.f32 %v5217_v11, %v9037_v31  ;;  %v2126_v11 = vpop.permute.xlu1 %2125 }
 0x421   : >> { %v5218_v32 = vpop.f32.mrb[2].mxu0  ;;  %v1295_v17 = vadd.f32 %v9037_v31, %v1294_v2 }
 0x422   : >> { %v1306_v43 = vadd.f32 %v5218_v32, %v9037_v31  ;;  %v1297_v53 = vpop.f32.mrb[3].mxu0 }
 0x423   : >> { %v1298_v63 = vadd.f32 %v9037_v31, %v1297_v53 }
 0x424   : >> { %v7287_v6 = vpack.c.bf16 %v1306_v43, %v1303_v48  ;;  %v2114_v43 = vpop.permute.xlu0 %2113 }
 0x425   : >> { %v7289_v42 = vpack.c.bf16 %v1298_v63, %v1295_v17  ;;  %v2167_v17 = vsel %vm1387_vm2, %v2110_v36, 0 }
 0x426   : >> { %9038 = vst [vmem:[#allocation86_spill] sm:$0xff] %v7287_v6  ;;  %2884 = vrot.lane.b32.xlu0 %v7287_v6, %s6221_s23  ;;  %2077 = vrot.lane.b32.xlu1 %v7287_v6, %s6220_s21 }
 0x427   : >> { %9039 = vst [vmem:[#allocation87_spill] sm:$0xff] %v7289_v42  ;;  %4756 = vmatprep.mubr.msk.bf16.mxu1 %vm1387_vm2, %v7289_v42  ;;  %v5221_v7 = vpop.f32.mrb[4].mxu0 }
 0x428   : >> { %4757 = vmatmul.mubr.msk.bf16.vlgmr.msra.gmra.mrb[0].mxu1 %vm1387_vm2, %v7289_v42  ;;  %v1319_v44 = vadd.f32 %v5221_v7, %v9037_v31  ;;  %v1310_v62 = vpop.f32.mrb[5].mxu0 }
 0x429   : >> { %4758 = vmatprep.mubr.msk.bf16.mxu1 %vm1387_vm2, %v7287_v6  ;;  %v1311_v3 = vadd.f32 %v9037_v31, %v1310_v62  ;;  %v5222_v37 = vpop.f32.mrb[6].mxu0  ;;  %4847 = vmatpush3.bf16.xpose.msra.mxu1 %v2164_v39 }
 0x42a   : >> { %2075 = vrot.lane.b32.xlu0 %v7289_v42, %s6220_s21  ;;  %v1322_v28 = vadd.f32 %v5222_v37, %v9037_v31  ;;  %v1313_v2 = vpop.f32.mrb[7].mxu0  ;;  %5424 = vmatprep.subr.msk.bf16.mxu1 %vm1387_vm2, %v2126_v11  ;;  %v2116_v11 = vpop.permute.xlu0 %2115 }
 0x42b   : >> { %v1314_v32 = vadd.f32 %v9037_v31, %v1313_v2 }
 0x42c   : >> { %v7309_v48 = vpack.c.bf16 %v1322_v28, %v1319_v44 }
 0x42d   : >> { %v7311_v53 = vpack.c.bf16 %v1314_v32, %v1311_v3  ;;  %v2128_v3 = vpop.permute.xlu1 %2127 }
 0x42e   : >> { %9040 = vst [vmem:[#allocation88_spill] sm:$0xff] %v7309_v48  ;;  %2882 = vrot.lane.b32.xlu0 %v7289_v42, %s6221_s23  ;;  %2081 = vrot.lane.b32.xlu1 %v7309_v48, %s6220_s21 }
 0x42f   : >> { %9041 = vst [vmem:[#allocation89_spill] sm:$0xff] %v7311_v53  ;;  %v5225_v63 = vpop.f32.mrb[8].mxu0 }
 0x430   : >> { %4759 = vmatmul.mubr.msk.bf16.gmra.mrb[4].mxu1 %vm1387_vm2, %v7287_v6  ;;  %v1335_v39 = vadd.f32 %v5225_v63, %v9037_v31  ;;  %v1326_v7 = vpop.f32.mrb[9].mxu0 }
 0x431   : >> { %v1327_v44 = vadd.f32 %v9037_v31, %v1326_v7  ;;  %4760 = vmatprep.mubr.msk.bf16.mxu1 %vm1387_vm2, %v7311_v53  ;;  %v5226_v62 = vpop.f32.mrb[10].mxu0  ;;  %4849 = vmatpush3.bf16.xpose.msra.mxu1 %v2167_v17  ;;  %v2170_v17 = vsel %vm1387_vm2, %v2112_v8, 0 }
 0x432   : >> { %2079 = vrot.lane.b32.xlu0 %v7311_v53, %s6220_s21  ;;  %v1338_v36 = vadd.f32 %v5226_v62, %v9037_v31  ;;  %v1329_v37 = vpop.f32.mrb[11].mxu0  ;;  %5425 = vmatprep.subr.msk.bf16.mxu1 %vm1387_vm2, %v2128_v3  ;;  %v2118_v3 = vpop.permute.xlu0 %2117 }
 0x433   : >> { %v1330_v28 = vadd.f32 %v9037_v31, %v1329_v37 }
 0x434   : >> { %v7329_v2 = vpack.c.bf16 %v1338_v36, %v1335_v39  ;;  %v2130_v36 = vpop.permute.xlu1 %2129 }
 0x435   : >> { %v7331_v32 = vpack.c.bf16 %v1330_v28, %v1327_v44 }
 0x436   : >> { %9042 = vst [vmem:[#allocation90_spill] sm:$0xff] %v7329_v2  ;;  %2886 = vrot.lane.b32.xlu0 %v7311_v53, %s6221_s23  ;;  %2085 = vrot.lane.b32.xlu1 %v7329_v2, %s6220_s21 }
 0x437   : >> { %9043 = vst [vmem:[#allocation91_spill] sm:$0xff] %v7331_v32  ;;  %v5229_v63 = vpop.f32.mrb[12].mxu0 }
 0x438   : >> { %v1351_v7 = vadd.f32 %v5229_v63, %v9037_v31  ;;  %v1342_v62 = vpop.f32.mrb[13].mxu0  ;;  %4761 = vmatmul.mubr.msk.bf16.gmra.mrb[8].mxu1 %vm1387_vm2, %v7311_v53 }
 0x439   : >> { %v1343_v39 = vadd.f32 %v9037_v31, %v1342_v62  ;;  %v5230_v44 = vpop.f32.mrb[14].mxu0  ;;  %4762 = vmatprep.mubr.msk.bf16.mxu1 %vm1387_vm2, %v7309_v48  ;;  %4851 = vmatpush3.bf16.xpose.msra.mxu1 %v2170_v17  ;;  %v2173_v62 = vsel %vm1387_vm2, %v2114_v43, 0  ;;  %v2120_v17 = vpop.permute.xlu0 %2119 }
 0x43a   : >> { %v1354_v37 = vadd.f32 %v5230_v44, %v9037_v31  ;;  %v1345_v28 = vpop.f32.mrb[15].mxu0  ;;  %2083 = vrot.lane.b32.xlu0 %v7331_v32, %s6220_s21  ;;  %5426 = vmatprep.subr.msk.bf16.mxu1 %vm1387_vm2, %v2130_v36  ;;  %v2132_v44 = vpop.permute.xlu1 %2131 }
 0x43b   : >> { %v1346_v8 = vadd.f32 %v9037_v31, %v1345_v28 }
 0x43c   : >> { %v7349_v63 = vpack.c.bf16 %v1354_v37, %v1351_v7  ;;  %v2176_v7 = vsel %vm1387_vm2, %v2116_v11, 0  ;;  %v2179_v11 = vsel %vm1387_vm2, %v2118_v3, 0  ;;  %v2182_v3 = vsel %vm1387_vm2, %v2120_v17, 0 }
 0x43d   : >> { %v7351_v4 = vpack.c.bf16 %v1346_v8, %v1343_v39  ;;  %v2122_v43 = vpop.permute.xlu0 %2121 }
 0x43e   : >> { %9044 = vst [vmem:[#allocation92_spill] sm:$0xff] %v7349_v63  ;;  %2089 = vrot.lane.b32.xlu1 %v7349_v63, %s6220_s21  ;;  %v2134_v39 = vpop.permute.xlu1 %2133 }
 0x43f   : >> { %9045 = vst [vmem:[#allocation93_spill] sm:$0xff] %v7351_v4  ;;  %2087 = vrot.lane.b32.xlu0 %v7351_v4, %s6220_s21 }
 0x440   : >> { %4763 = vmatmul.mubr.msk.bf16.gmra.mrb[12].mxu1 %vm1387_vm2, %v7309_v48 }
 0x441   : >> { %4764 = vmatprep.mubr.msk.bf16.mxu1 %vm1387_vm2, %v7331_v32  ;;  %4853 = vmatpush3.bf16.xpose.msra.mxu1 %v2173_v62  ;;  %v2899_v36 = vpop.permute.xlu0 %2898 }
 0x442   : >> { %5427 = vmatprep.subr.msk.bf16.mxu1 %vm1387_vm2, %v2132_v44  ;;  %2548 = vrot.lane.b32.xlu1 %v8999_v47, %s6220_s21  ;;  %v2136_v28 = vpop.permute.xlu1 %2135  ;;  %v2955_v27 = vsel %vm1387_vm2, %v2899_v36, 0 }
 0x443   : >> { %2564 = vrot.lane.b32.xlu0 %v8996_v45, %s6220_s21 }
 0x445   : >> { %v2915_v37 = vpop.permute.xlu0 %2914 }
 0x446   : >> { %3695 = vrot.lane.b32.xlu1 %v9011_v9, %s6222_s10  ;;  %v2138_v62 = vpop.permute.xlu1 %2137 }
 0x447   : >> { %2888 = vrot.lane.b32.xlu0 %v7309_v48, %s6221_s23 }
 0x448   : >> { %4765 = vmatmul.mubr.msk.bf16.gmra.mrb[16].mxu1 %vm1387_vm2, %v7331_v32 }
 0x449   : >> { %4766 = vmatprep.mubr.msk.bf16.mxu1 %vm1387_vm2, %v7329_v2  ;;  %4855 = vmatpush3.bf16.xpose.msra.mxu1 %v2176_v7  ;;  %v2901_v8 = vpop.permute.xlu0 %2900  ;;  %v2185_v7 = vsel %vm1387_vm2, %v2122_v43, 0 }
 0x44a   : >> { %5428 = vmatprep.subr.msk.bf16.mxu1 %vm1387_vm2, %v2134_v39  ;;  %2550 = vrot.lane.b32.xlu1 %v8998_v41, %s6220_s21  ;;  %v2919_v39 = vpop.permute.xlu1 %2918  ;;  %v2958_v33 = vsel %vm1387_vm2, %v2901_v8, 0 }
 0x44b   : >> { %3679 = vrot.lane.b32.xlu0 %v9010_v14, %s6222_s10 }
 0x44d   : >> { %v2917_v44 = vpop.permute.xlu0 %2916 }
 0x44e   : >> { %2552 = vrot.lane.b32.xlu1 %v9000_v5, %s6220_s21 }
 0x44f   : >> { %2566 = vrot.lane.b32.xlu0 %v8997_v1, %s6220_s21 }
 0x450   : >> { %4767 = vmatmul.mubr.msk.bf16.gmra.mrb[20].mxu1 %vm1387_vm2, %v7329_v2 }
 0x451   : >> { %4768 = vmatprep.mubr.msk.bf16.mxu1 %vm1387_vm2, %v7351_v4  ;;  %4857 = vmatpush3.bf16.xpose.msra.mxu1 %v2179_v11  ;;  %v2903_v17 = vpop.permute.xlu0 %2902 }
 0x452   : >> { %5429 = vmatprep.subr.msk.bf16.mxu1 %vm1387_vm2, %v2136_v28  ;;  %3681 = vrot.lane.b32.xlu1 %v9004_v57, %s6222_s10  ;;  %v2921_v28 = vpop.permute.xlu1 %2920  ;;  %v2961_v36 = vsel %vm1387_vm2, %v2903_v17, 0 }
 0x453   : >> { %2568 = vrot.lane.b32.xlu0 %v9001_v59, %s6220_s21 }
 0x455   : >> { %v2905_v11 = vpop.permute.xlu0 %2904 }
 0x456   : >> { %v2923_v14 = vpop.permute.xlu1 %2922 }
 0x457   : >> { %2890 = vrot.lane.b32.xlu0 %v7331_v32, %s6221_s23 }
 0x458   : >> { %4769 = vmatmul.mubr.msk.bf16.gmra.mrb[24].mxu1 %vm1387_vm2, %v7351_v4 }
 0x459   : >> { %4770 = vmatprep.mubr.msk.bf16.mxu1 %vm1387_vm2, %v7349_v63  ;;  %4859 = vmatpush3.bf16.xpose.msra.mxu1 %v2182_v3  ;;  %v2907_v9 = vpop.permute.xlu0 %2906 }
 0x45a   : >> { %5430 = vmatprep.subr.msk.bf16.mxu1 %vm1387_vm2, %v2138_v62  ;;  %v2925_v19 = vpop.permute.xlu1 %2924 }
 0x45d   : >> { %v2909_v18 = vpop.permute.xlu0 %2908 }
 0x45e   : >> { %v2927_v20 = vpop.permute.xlu1 %2926 }
 0x460   : >> { %4771 = vmatmul.mubr.msk.bf16.gmra.mrb[28].mxu1 %vm1387_vm2, %v7349_v63 }
 0x461   : >> { %4861 = vmatpush3.bf16.xpose.msra.mxu1 %v2185_v7  ;;  %v2911_v3 = vpop.permute.xlu0 %2910 }
 0x462   : >> { %5431 = vmatprep.subr.msk.bf16.mxu1 %vm1387_vm2, %v2915_v37  ;;  %v2929_v21 = vpop.permute.xlu1 %2928 }
 0x465   : >> { %v2913_v62 = vpop.permute.xlu0 %2912 }
 0x466   : >> { %v3674_v43 = vpop.permute.xlu1 %3673 }
 0x469   : >> { %v3690_v22 = vpop.permute.xlu0 %3689 }
 0x46a   : >> { %v7407_v24 = vpop.permute.xlu1 %3675 }
 0x46b   : >> { %v3733_v17 = vsel %vm1387_vm2, %v7407_v24, 0 }
 0x46d   : >> { %v3692_v23 = vpop.permute.xlu0 %3691 }
 0x46e   : >> { %v7411_v25 = vpop.permute.xlu1 %3677 }
 0x471   : >> { %v7409_v7 = vpop.permute.xlu0 %3693 }
 0x498   : >> { %v2885_v37 = vpop.permute.xlu0 %2884  ;;  %v2078_v30 = vpop.permute.xlu1 %2077 }
 0x49c   : >> { %v2076_v26 = vpop.permute.xlu0 %2075 }
 0x49d   : >> { %4862 = vmatprep.mubr.msk.bf16.mxu1 %vm1387_vm2, %v2076_v26 }
 0x49e   : >> { %4863 = vmatmul.mubr.msk.bf16.vlgmr.msra.gmra.mrb[32].mxu1 %vm1387_vm2, %v2076_v26 }
 0x49f   : >> { %4953 = vmatpush3.bf16.xpose.msra.mxu1 %v2955_v27  ;;  %4864 = vmatprep.mubr.msk.bf16.mxu1 %vm1387_vm2, %v2078_v30  ;;  %v2964_v27 = vsel %vm1387_vm2, %v2905_v11, 0 }
 0x4a0   : >> { %5432 = vmatprep.subr.msk.bf16.mxu1 %vm1387_vm2, %v2917_v44  ;;  %v2883_v31 = vpop.permute.xlu0 %2882  ;;  %v2082_v38 = vpop.permute.xlu1 %2081 }
 0x4a4   : >> { %v2080_v34 = vpop.permute.xlu0 %2079 }
 0x4a6   : >> { %4865 = vmatmul.mubr.msk.bf16.gmra.mrb[36].mxu1 %vm1387_vm2, %v2078_v30 }
 0x4a7   : >> { %4955 = vmatpush3.bf16.xpose.msra.mxu1 %v2958_v33  ;;  %4866 = vmatprep.mubr.msk.bf16.mxu1 %vm1387_vm2, %v2080_v34  ;;  %v2967_v33 = vsel %vm1387_vm2, %v2907_v9, 0 }
 0x4a8   : >> { %5433 = vmatprep.subr.msk.bf16.mxu1 %vm1387_vm2, %v2919_v39  ;;  %v2887_v26 = vpop.permute.xlu0 %2886  ;;  %v2086_v30 = vpop.permute.xlu1 %2085 }
 0x4ac   : >> { %v2084_v8 = vpop.permute.xlu0 %2083 }
 0x4ae   : >> { %4867 = vmatmul.mubr.msk.bf16.gmra.mrb[40].mxu1 %vm1387_vm2, %v2080_v34  ;;  %v2970_v34 = vsel %vm1387_vm2, %v2909_v18, 0  ;;  %v2976_v18 = vsel %vm1387_vm2, %v2913_v62, 0 }
 0x4af   : >> { %4957 = vmatpush3.bf16.xpose.msra.mxu1 %v2961_v36  ;;  %4868 = vmatprep.mubr.msk.bf16.mxu1 %vm1387_vm2, %v2082_v38 }
 0x4b0   : >> { %5434 = vmatprep.subr.msk.bf16.mxu1 %vm1387_vm2, %v2921_v28 }
 0x4b1   : >> { %v2088_v44 = vpop.permute.xlu0 %2087 }
 0x4b6   : >> { %4869 = vmatmul.mubr.msk.bf16.gmra.mrb[44].mxu1 %vm1387_vm2, %v2082_v38  ;;  %v2973_v38 = vsel %vm1387_vm2, %v2911_v3, 0 }
 0x4b7   : >> { %4959 = vmatpush3.bf16.xpose.msra.mxu1 %v2964_v27  ;;  %4870 = vmatprep.mubr.msk.bf16.mxu1 %vm1387_vm2, %v2084_v8 }
 0x4b8   : >> { %5435 = vmatprep.subr.msk.bf16.mxu1 %vm1387_vm2, %v2923_v14  ;;  %v2090_v14 = vpop.permute.xlu1 %2089 }
 0x4be   : >> { %4871 = vmatmul.mubr.msk.bf16.gmra.mrb[48].mxu1 %vm1387_vm2, %v2084_v8 }
 0x4bf   : >> { %4961 = vmatpush3.bf16.xpose.msra.mxu1 %v2967_v33  ;;  %4872 = vmatprep.mubr.msk.bf16.mxu1 %vm1387_vm2, %v2086_v30 }
 0x4c0   : >> { %5436 = vmatprep.subr.msk.bf16.mxu1 %vm1387_vm2, %v2925_v19  ;;  %v7445_v19 = vpop.permute.xlu0 %2564 }
 0x4c4   : >> { %v2889_v9 = vpop.permute.xlu0 %2888 }
 0x4c6   : >> { %4873 = vmatmul.mubr.msk.bf16.gmra.mrb[52].mxu1 %vm1387_vm2, %v2086_v30 }
 0x4c7   : >> { %4963 = vmatpush3.bf16.xpose.msra.mxu1 %v2970_v34  ;;  %4874 = vmatprep.mubr.msk.bf16.mxu1 %vm1387_vm2, %v2088_v44 }
 0x4c8   : >> { %5437 = vmatprep.subr.msk.bf16.mxu1 %vm1387_vm2, %v2927_v20  ;;  %v3730_v20 = vsel %vm1387_vm2, %v3674_v43, 0 }
 0x4ce   : >> { %4875 = vmatmul.mubr.msk.bf16.gmra.mrb[56].mxu1 %vm1387_vm2, %v2088_v44 }
 0x4cf   : >> { %4965 = vmatpush3.bf16.xpose.msra.mxu1 %v2973_v38  ;;  %4876 = vmatprep.mubr.msk.bf16.mxu1 %vm1387_vm2, %v2090_v14 }
 0x4d0   : >> { %5438 = vmatprep.subr.msk.bf16.mxu1 %vm1387_vm2, %v2929_v21  ;;  %v3680_v21 = vpop.permute.xlu0 %3679 }
 0x4d1   : >> { %v3739_v11 = vsel %vm1387_vm2, %v3680_v21, 0 }
 0x4d6   : >> { %4877 = vmatmul.mubr.msk.bf16.gmra.mrb[60].mxu1 %vm1387_vm2, %v2090_v14 }
 0x4d7   : >> { %4967 = vmatpush3.bf16.xpose.msra.mxu1 %v2976_v18  ;;  %4968 = vmatprep.mubr.msk.bf16.mxu1 %vm1387_vm2, %v2883_v31 }
 0x4d8   : >> { %5439 = vmatprep.subr.msk.bf16.mxu1 %vm1387_vm2, %v3690_v22  ;;  %v7456_v22 = vpop.permute.xlu1 %2548 }
 0x4d9   : >> { %9046 = vst [vmem:[#allocation94_spill] sm:$0xff] %v7456_v22 }
 0x4dc   : >> { %v3696_v39 = vpop.permute.xlu1 %3695 }
 0x4de   : >> { %4969 = vmatmul.mubr.msk.bf16.vlgmr.msra.gmra.mrb[64].mxu1 %vm1387_vm2, %v2883_v31  ;;  %v7460_v31 = vpop.permute.xlu0 %2566 }
 0x4df   : >> { %5059 = vmatpush3.bf16.xpose.msra.mxu1 %v3730_v20  ;;  %4970 = vmatprep.mubr.msk.bf16.mxu1 %vm1387_vm2, %v2885_v37  ;;  %9047 = vst [vmem:[#allocation95_spill] sm:$0xff] %v7460_v31 }
 0x4e0   : >> { %5440 = vmatprep.subr.msk.bf16.mxu1 %vm1387_vm2, %v3692_v23  ;;  %v3736_v23 = vsel %vm1387_vm2, %v7411_v25, 0 }
 0x4e2   : >> { %v7466_v24 = vpop.permute.xlu0 %2568 }
 0x4e3   : >> { %9048 = vst [vmem:[#allocation96_spill] sm:$0xff] %v7466_v24 }
 0x4e6   : >> { %4971 = vmatmul.mubr.msk.bf16.gmra.mrb[68].mxu1 %vm1387_vm2, %v2885_v37  ;;  %v2891_v28 = vpop.permute.xlu0 %2890 }
 0x4e7   : >> { %5061 = vmatpush3.bf16.xpose.msra.mxu1 %v3733_v17  ;;  %4972 = vmatprep.mubr.msk.bf16.mxu1 %vm1387_vm2, %v2887_v26 }
 0x4e8   : >> { %5441 = vmatprep.subr.msk.bf16.mxu1 %vm1387_vm2, %v7409_v7 }
 0x4ee   : >> { %4973 = vmatmul.mubr.msk.bf16.gmra.mrb[72].mxu1 %vm1387_vm2, %v2887_v26 }
 0x4ef   : >> { %5063 = vmatpush3.bf16.xpose.msra.mxu1 %v3736_v23  ;;  %4974 = vmatprep.mubr.msk.bf16.mxu1 %vm1387_vm2, %v2889_v9 }
 0x4f0   : >> { %5442 = vmatprep.subr.msk.bf16.mxu1 %vm1387_vm2, %v3696_v39 }
 0x4f6   : >> { %4975 = vmatmul.mubr.msk.bf16.gmra.mrb[76].mxu1 %vm1387_vm2, %v2889_v9 }
 0x4f7   : >> { %4976 = vmatprep.mubr.msk.bf16.mxu1 %vm1387_vm2, %v2891_v28  ;;  %5065 = vmatpush3.bf16.xpose.msra.mxu1 %v3739_v11 }
 0x4fb   : >> { %v7472_v3 = vpop.f32.mrb[0].mxu1 }
 0x4fc   : >> { %v7474_v25 = vpop.f32.mrb[1].mxu1 }
 0x4fd   : >> { %v7476_v62 = vpop.f32.mrb[2].mxu1  ;;  %v1573_v43 = vmax.f32 %v7472_v3, %v7474_v25 }
 0x4fe   : >> { %v7480_v7 = vpop.f32.mrb[3].mxu1  ;;  %4977 = vmatmul.mubr.msk.bf16.gmra.mrb[80].mxu1 %vm1387_vm2, %v2891_v28 }
 0x4ff   : >> { %1574 = vmax.xlane.f32.xlu0 %v1573_v43  ;;  %v1576_v37 = vmax.f32 %v7476_v62, %v7480_v7 }
 0x501   : >> { %1577 = vmax.xlane.f32.xlu1 %v1576_v37 }
 0x503   : >> { %v7485_v36 = vpop.f32.mrb[4].mxu1 }
 0x504   : >> { %v7487_v26 = vpop.f32.mrb[5].mxu1 }
 0x505   : >> { %v7489_v27 = vpop.f32.mrb[6].mxu1  ;;  %v1579_v8 = vmax.f32 %v7485_v36, %v7487_v26 }
 0x506   : >> { %v7493_v33 = vpop.f32.mrb[7].mxu1 }
 0x507   : >> { %1580 = vmax.xlane.f32.xlu0 %v1579_v8  ;;  %v1582_v30 = vmax.f32 %v7489_v27, %v7493_v33 }
 0x509   : >> { %1583 = vmax.xlane.f32.xlu1 %v1582_v30 }
 0x50b   : >> { %v7497_v34 = vpop.f32.mrb[8].mxu1 }
 0x50c   : >> { %v7499_v44 = vpop.f32.mrb[9].mxu1 }
 0x50d   : >> { %v7501_v38 = vpop.f32.mrb[10].mxu1  ;;  %v1585_v14 = vmax.f32 %v7497_v34, %v7499_v44 }
 0x50e   : >> { %v7505_v18 = vpop.f32.mrb[11].mxu1 }
 0x50f   : >> { %1586 = vmax.xlane.f32.xlu1 %v1585_v14  ;;  %v1588_v20 = vmax.f32 %v7501_v38, %v7505_v18 }
 0x513   : >> { %1589 = vmax.xlane.f32.xlu1 %v1588_v20  ;;  %v7509_v9 = vpop.f32.mrb[12].mxu1  ;;  %v9049_v20 = vld [vmem:[#allocation19_spill] sm:$0xff] }
 0x514   : >> { %v7511_v21 = vpop.f32.mrb[13].mxu1 }
 0x515   : >> { %v7513_v17 = vpop.f32.mrb[14].mxu1  ;;  %v1591_v39 = vmax.f32 %v7509_v9, %v7511_v21 }
 0x516   : >> { %v7517_v23 = vpop.f32.mrb[15].mxu1 }
 0x517   : >> { %1592 = vmax.xlane.f32.xlu0 %v1591_v39  ;;  %v1594_v11 = vmax.f32 %v7513_v17, %v7517_v23  ;;  %v9050_v39 = vld [vmem:[#allocation18_spill] sm:$0xff] }
 0x518   : >> { %v7535_v40 = vcombine.low %v9050_v39, %v9049_v20 }
 0x519   : >> { %1595 = vmax.xlane.f32.xlu1 %v1594_v11 }
 0x51a   : >> { %5231 = vmatprep.subr.bf16.mxu0 %v7535_v40 }
 0x51b   : >> { %v7521_v28 = vpop.f32.mrb[16].mxu1 }
 0x51c   : >> { %v7523_v43 = vpop.f32.mrb[17].mxu1 }
 0x51d   : >> { %v7525_v37 = vpop.f32.mrb[18].mxu1  ;;  %v1597_v8 = vmax.f32 %v7521_v28, %v7523_v43 }
 0x51e   : >> { %v7529_v30 = vpop.f32.mrb[19].mxu1 }
 0x51f   : >> { %1598 = vmax.xlane.f32.xlu1 %v1597_v8  ;;  %v1600_v14 = vmax.f32 %v7525_v37, %v7529_v30 }
 0x523   : >> { %1601 = vmax.xlane.f32.xlu1 %v1600_v14  ;;  %v7538_v11 = vpop.f32.mrb[20].mxu1 }
 0x524   : >> { %v7540_v57 = vpop.f32.mrb[21].mxu1 }
 0x525   : >> { %v7542_v58 = vpop.f32.mrb[22].mxu1  ;;  %v1603_v61 = vmax.f32 %v7538_v11, %v7540_v57 }
 0x526   : >> { %v7546_v8 = vpop.f32.mrb[23].mxu1 }
 0x527   : >> { %1604 = vmax.xlane.f32.xlu0 %v1603_v61  ;;  %v1606_v59 = vmax.f32 %v7542_v58, %v7546_v8 }
 0x529   : >> { %1607 = vmax.xlane.f32.xlu1 %v1606_v59 }
 0x52b   : >> { %v7550_v20 = vpop.f32.mrb[24].mxu1 }
 0x52c   : >> { %v7552_v39 = vpop.f32.mrb[25].mxu1 }
 0x52d   : >> { %v7554_v14 = vpop.f32.mrb[26].mxu1  ;;  %v1609_v5 = vmax.f32 %v7550_v20, %v7552_v39 }
 0x52e   : >> { %v7558_v47 = vpop.f32.mrb[27].mxu1 }
 0x52f   : >> { %1610 = vmax.xlane.f32.xlu1 %v1609_v5  ;;  %v1612_v41 = vmax.f32 %v7554_v14, %v7558_v47 }
 0x531   : >> { %1613 = vmax.xlane.f32.xlu0 %v1612_v41 }
 0x533   : >> { %v7562_v61 = vpop.f32.mrb[28].mxu1 }
 0x534   : >> { %v7564_v1 = vpop.f32.mrb[29].mxu1 }
 0x535   : >> { %v7566_v59 = vpop.f32.mrb[30].mxu1  ;;  %v1615_v45 = vmax.f32 %v7562_v61, %v7564_v1 }
 0x536   : >> { %v7570_v48 = vpop.f32.mrb[31].mxu1 }
 0x537   : >> { %1616 = vmax.xlane.f32.xlu1 %v1615_v45  ;;  %v1618_v32 = vmax.f32 %v7566_v59, %v7570_v48 }
 0x539   : >> { %1619 = vmax.xlane.f32.xlu0 %v1618_v32 }
 0x571   : >> { %v7574_v5 = vpop.f32.mrb[32].mxu1 }
 0x572   : >> { %v7576_v53 = vpop.f32.mrb[33].mxu1 }
 0x573   : >> { %v7578_v41 = vpop.f32.mrb[34].mxu1  ;;  %v2324_v6 = vmax.f32 %v7574_v5, %v7576_v53 }
 0x574   : >> { %v7582_v42 = vpop.f32.mrb[35].mxu1 }
 0x575   : >> { %2325 = vmax.xlane.f32.xlu0 %v2324_v6  ;;  %v2327_v63 = vmax.f32 %v7578_v41, %v7582_v42  ;;  %v7598_v6 = vpop.permute.xlu1 %2550 }
 0x576   : >> { %9051 = vst [vmem:[#allocation97_spill] sm:$0xff] %v7598_v6 }
 0x579   : >> { %v7586_v45 = vpop.f32.mrb[36].mxu1  ;;  %2328 = vmax.xlane.f32.xlu0 %v2327_v63  ;;  %v7608_v46 = vpop.permute.xlu1 %2552 }
 0x57a   : >> { %v7588_v16 = vpop.f32.mrb[37].mxu1  ;;  %9052 = vst [vmem:[#allocation98_spill] sm:$0xff] %v7608_v46 }
 0x57b   : >> { %v7590_v32 = vpop.f32.mrb[38].mxu1  ;;  %v2330_v55 = vmax.f32 %v7586_v45, %v7588_v16 }
 0x57c   : >> { %v7594_v24 = vpop.f32.mrb[39].mxu1 }
 0x57d   : >> { %2331 = vmax.xlane.f32.xlu0 %v2330_v55  ;;  %v2333_v31 = vmax.f32 %v7590_v32, %v7594_v24  ;;  %v7616_v6 = vpop.permute.xlu1 %3681 }
 0x57e   : >> { %9054 = vst [vmem:[#allocation100_spill] sm:$0xff] %v7616_v6 }
 0x57f   : >> { %2334 = vmax.xlane.f32.xlu1 %v2333_v31 }
 0x581   : >> { %v7600_v22 = vpop.f32.mrb[40].mxu1 }
 0x582   : >> { %v7602_v15 = vpop.f32.mrb[41].mxu1 }
 0x583   : >> { %v7606_v13 = vpop.f32.mrb[42].mxu1 }
 0x584   : >> { %v7610_v4 = vpop.f32.mrb[43].mxu1 }
 0x589   : >> { %v7614_v29 = vpop.f32.mrb[44].mxu1 }
 0x58a   : >> { %9053 = vst [vmem:[#allocation99_spill] sm:$0xff] %v7614_v29  ;;  %v7618_v31 = vpop.f32.mrb[45].mxu1 }
 0x58b   : >> { %9055 = vst [vmem:[#allocation101_spill] sm:$0xff] %v7618_v31  ;;  %v7622_v35 = vpop.f32.mrb[46].mxu1 }
 0x58c   : >> { %v1575_v63 = vpop.xlane.xlu0 %1574  ;;  %v7624_v50 = vpop.f32.mrb[47].mxu1 }
 0x58d   : >> { %v1621_v46 = vsub.f32 %v7472_v3, %v1575_v63  ;;  %v1622_v52 = vsub.f32 %v7474_v25, %v1575_v63 }
 0x58e   : >> { %v1578_v12 = vpop.xlane.xlu1 %1577 }
 0x58f   : >> { %v1653_v49 = vmul.f32 1.442695, %v1621_v46  ;;  %v1655_v6 = vmul.f32 1.442695, %v1622_v52  ;;  %v1623_v56 = vsub.f32 %v7476_v62, %v1578_v12  ;;  %v1624_v2 = vsub.f32 %v7480_v7, %v1578_v12 }
 0x591   : >> { %5581 = vpow2.f32 %v1653_v49  ;;  %v1657_v10 = vmul.f32 1.442695, %v1623_v56  ;;  %v1659_v31 = vmul.f32 1.442695, %v1624_v2  ;;  %v7632_v29 = vpop.f32.mrb[48].mxu1 }
 0x592   : >> { %5583 = vpow2.f32 %v1655_v6  ;;  %v7634_v54 = vpop.f32.mrb[49].mxu1 }
 0x593   : >> { %9056 = vst [vmem:[#allocation102_spill] sm:$0xff] %v7634_v54  ;;  %5585 = vpow2.f32 %v1657_v10  ;;  %v7638_v25 = vpop.f32.mrb[50].mxu1 }
 0x594   : >> { %9057 = vst [vmem:[#allocation103_spill] sm:$0xff] %v7638_v25  ;;  %5587 = vpow2.f32 %v1659_v31  ;;  %v1581_v52 = vpop.xlane.xlu0 %1580  ;;  %v7640_v46 = vpop.f32.mrb[51].mxu1  ;;  %v9062_v25 = vld [vmem:[#allocation20_spill] sm:$0xff] }
 0x595   : >> { %9058 = vst [vmem:[#allocation104_spill] sm:$0xff] %v7640_v46  ;;  %v1625_v12 = vsub.f32 %v7485_v36, %v1581_v52  ;;  %v1626_v56 = vsub.f32 %v7487_v26, %v1581_v52  ;;  %v9061_v46 = vld [vmem:[#allocation21_spill] sm:$0xff] }
 0x596   : >> { %v1584_v2 = vpop.xlane.xlu1 %1583  ;;  %v4637_v54 = vcombine.low %v9062_v25, %v9061_v46 }
 0x597   : >> { %v1661_v62 = vmul.f32 1.442695, %v1625_v12  ;;  %v1663_v7 = vmul.f32 1.442695, %v1626_v56  ;;  %v1627_v10 = vsub.f32 %v7489_v27, %v1584_v2  ;;  %v1628_v6 = vsub.f32 %v7493_v33, %v1584_v2 }
 0x599   : >> { %5589 = vpow2.f32 %v1661_v62  ;;  %v1665_v63 = vmul.f32 1.442695, %v1627_v10  ;;  %v1667_v31 = vmul.f32 1.442695, %v1628_v6  ;;  %v7648_v3 = vpop.f32.mrb[52].mxu1 }
 0x59a   : >> { %9059 = vst [vmem:[#allocation105_spill] sm:$0xff] %v7648_v3  ;;  %5591 = vpow2.f32 %v1663_v7  ;;  %v7650_v55 = vpop.f32.mrb[53].mxu1  ;;  %v9092_v7 = vmax.f32 %v7622_v35, %v7624_v50 }
 0x59b   : >> { %9060 = vst [vmem:[#allocation106_spill] sm:$0xff] %v7650_v55  ;;  %v5582_v36 = vpop.eup %5581  ;;  %5593 = vpow2.f32 %v1665_v63  ;;  %v7654_v52 = vpop.f32.mrb[54].mxu1 }
 0x59c   : >> { %v5584_v12 = vpop.eup %5583  ;;  %5595 = vpow2.f32 %v1667_v31  ;;  %v1587_v27 = vpop.xlane.xlu1 %1586 }
 0x59d   : >> { %v7656_v56 = vpop.f32.mrb[55].mxu1  ;;  %v5586_v33 = vpop.eup %5585  ;;  %v1629_v2 = vsub.f32 %v7497_v34, %v1587_v27  ;;  %v1630_v62 = vsub.f32 %v7499_v44, %v1587_v27  ;;  %v1717_v10 = vadd.f32 %v5584_v12, %v5582_v36 }
 0x59e   : >> { %v5588_v6 = vpop.eup %5587  ;;  %v1765_v63 = vpack.c.bf16 %v5586_v33, %v5582_v36 }
 0x59f   : >> { %v1669_v49 = vmul.f32 1.442695, %v1629_v2  ;;  %v1671_v26 = vmul.f32 1.442695, %v1630_v62  ;;  %1718 = vadd.xlane.f32.xlu0 %v1717_v10  ;;  %v1766_v55 = vpack.c.bf16 %v5588_v6, %v5584_v12  ;;  %v1720_v3 = vadd.f32 %v5588_v6, %v5586_v33 }
 0x5a0   : >> { %v1590_v31 = vpop.xlane.xlu1 %1589 }
 0x5a1   : >> { %5597 = vpow2.f32 %v1669_v49  ;;  %1813 = vmatprep.mubr.bf16.mxu0 %v1766_v55  ;;  %v1631_v34 = vsub.f32 %v7501_v38, %v1590_v31  ;;  %v1632_v44 = vsub.f32 %v7505_v18, %v1590_v31  ;;  %1721 = vadd.xlane.f32.xlu1 %v1720_v3  ;;  %v7666_v27 = vpop.f32.mrb[56].mxu1 }
 0x5a2   : >> { %5599 = vpow2.f32 %v1671_v26  ;;  %1814 = vmatmul.mubr.bf16.vlgmr.msra.gmra.mrb[16].mxu0 %v1765_v63  ;;  %v7668_v36 = vpop.f32.mrb[57].mxu1 }
 0x5a3   : >> { %v5590_v2 = vpop.eup %5589  ;;  %v1673_v12 = vmul.f32 1.442695, %v1631_v34  ;;  %v1675_v33 = vmul.f32 1.442695, %v1632_v44  ;;  %5232 = vmatpush3.bf16.msra.mxu0 %v7535_v40  ;;  %v7673_v55 = vpop.f32.mrb[58].mxu1 }
 0x5a4   : >> { %v5592_v38 = vpop.eup %5591  ;;  %5233 = vmatprep.subr.bf16.mxu0 %v4637_v54  ;;  %v1593_v18 = vpop.xlane.xlu0 %1592 }
 0x5a5   : >> { %v7675_v3 = vpop.f32.mrb[59].mxu1  ;;  %v5594_v46 = vpop.eup %5593  ;;  %5601 = vpow2.f32 %v1673_v12  ;;  %v1633_v49 = vsub.f32 %v7509_v9, %v1593_v18  ;;  %v1634_v26 = vsub.f32 %v7511_v21, %v1593_v18  ;;  %v1723_v6 = vadd.f32 %v5592_v38, %v5590_v2 }
 0x5a6   : >> { %v5596_v40 = vpop.eup %5595  ;;  %5603 = vpow2.f32 %v1675_v33  ;;  %v1596_v10 = vpop.xlane.xlu1 %1595  ;;  %v1767_v63 = vpack.c.bf16 %v5594_v46, %v5590_v2 }
 0x5a7   : >> { %v1677_v31 = vmul.f32 1.442695, %v1633_v49  ;;  %v1679_v34 = vmul.f32 1.442695, %v1634_v26  ;;  %5234 = vmatpush3.bf16.msra.mxu0 %v4637_v54  ;;  %v1635_v44 = vsub.f32 %v7513_v17, %v1596_v10  ;;  %v1636_v25 = vsub.f32 %v7517_v23, %v1596_v10  ;;  %1724 = vadd.xlane.f32.xlu0 %v1723_v6  ;;  %v9088_v17 = vld [vmem:[#allocation81_spill] sm:$0xff] }
 0x5a8   : >> { %4878 = vmatprep.subr.bf16.mxu0 %v7445_v19  ;;  %v1768_v9 = vpack.c.bf16 %v5596_v40, %v5592_v38  ;;  %v1726_v21 = vadd.f32 %v5596_v40, %v5594_v46 }
 0x5a9   : >> { %5605 = vpow2.f32 %v1677_v31  ;;  %v1681_v12 = vmul.f32 1.442695, %v1635_v44  ;;  %v1683_v18 = vmul.f32 1.442695, %v1636_v25  ;;  %v7684_v62 = vpop.f32.mrb[60].mxu1 }
 0x5aa   : >> { %5607 = vpow2.f32 %v1679_v34  ;;  %1821 = vmatprep.mubr.bf16.mxu0 %v1768_v9  ;;  %1727 = vadd.xlane.f32.xlu1 %v1726_v21  ;;  %v7686_v2 = vpop.f32.mrb[61].mxu1 }
 0x5ab   : >> { %v5598_v54 = vpop.eup %5597  ;;  %5609 = vpow2.f32 %v1681_v12  ;;  %1822 = vmatmul.mubr.bf16.gmra.mrb[20].mxu0 %v1767_v63  ;;  %v7690_v19 = vpop.f32.mrb[62].mxu1 }
 0x5ac   : >> { %v5600_v23 = vpop.eup %5599  ;;  %5611 = vpow2.f32 %v1683_v18  ;;  %v1599_v33 = vpop.xlane.xlu1 %1598 }
 0x5ad   : >> { %v7692_v38 = vpop.f32.mrb[63].mxu1  ;;  %v1637_v25 = vsub.f32 %v7521_v28, %v1599_v33  ;;  %v1638_v46 = vsub.f32 %v7523_v43, %v1599_v33  ;;  %v1729_v26 = vadd.f32 %v5600_v23, %v5598_v54 }
 0x5af   : >> { %v5602_v40 = vpop.eup %5601  ;;  %v1685_v10 = vmul.f32 1.442695, %v1637_v25  ;;  %v1687_v6 = vmul.f32 1.442695, %v1638_v46  ;;  %1730 = vadd.xlane.f32.xlu1 %v1729_v26 }
 0x5b0   : >> { %v5604_v63 = vpop.eup %5603  ;;  %v1602_v31 = vpop.xlane.xlu1 %1601  ;;  %v1769_v34 = vpack.c.bf16 %v5602_v40, %v5598_v54 }
 0x5b1   : >> { %5613 = vpow2.f32 %v1685_v10  ;;  %v1639_v44 = vsub.f32 %v7525_v37, %v1602_v31  ;;  %v1640_v9 = vsub.f32 %v7529_v30, %v1602_v31  ;;  %v7700_v21 = vpop.f32.mrb[64].mxu1  ;;  %v1770_v28 = vpack.c.bf16 %v5604_v63, %v5600_v23 }
 0x5b2   : >> { %5615 = vpow2.f32 %v1687_v6  ;;  %v1732_v43 = vadd.f32 %v5604_v63, %v5602_v40  ;;  %v7702_v12 = vpop.f32.mrb[65].mxu1 }
 0x5b3   : >> { %v5606_v18 = vpop.eup %5605  ;;  %v1689_v33 = vmul.f32 1.442695, %v1639_v44  ;;  %v1691_v25 = vmul.f32 1.442695, %v1640_v9  ;;  %1829 = vmatprep.mubr.bf16.mxu0 %v1770_v28  ;;  %v7706_v54 = vpop.f32.mrb[66].mxu1 }
 0x5b4   : >> { %v5608_v26 = vpop.eup %5607  ;;  %1733 = vadd.xlane.f32.xlu1 %v1732_v43  ;;  %1830 = vmatmul.mubr.bf16.gmra.mrb[24].mxu0 %v1769_v34  ;;  %v1605_v37 = vpop.xlane.xlu0 %1604 }
 0x5b5   : >> { %v7708_v30 = vpop.f32.mrb[67].mxu1  ;;  %v5610_v23 = vpop.eup %5609  ;;  %5617 = vpow2.f32 %v1689_v33  ;;  %v1641_v40 = vsub.f32 %v7538_v11, %v1605_v37  ;;  %v1642_v10 = vsub.f32 %v7540_v57, %v1605_v37  ;;  %v1735_v44 = vadd.f32 %v5608_v26, %v5606_v18 }
 0x5b6   : >> { %9063 = vst [vmem:[#allocation107_spill] sm:$0xff] %v7708_v30  ;;  %v5612_v63 = vpop.eup %5611  ;;  %5619 = vpow2.f32 %v1691_v25  ;;  %v1608_v31 = vpop.xlane.xlu1 %1607  ;;  %v1771_v9 = vpack.c.bf16 %v5610_v23, %v5606_v18 }
 0x5b7   : >> { %v1693_v28 = vmul.f32 1.442695, %v1641_v40  ;;  %v1695_v43 = vmul.f32 1.442695, %v1642_v10  ;;  %v1643_v34 = vsub.f32 %v7542_v58, %v1608_v31  ;;  %v1644_v46 = vsub.f32 %v7546_v8, %v1608_v31  ;;  %1736 = vadd.xlane.f32.xlu0 %v1735_v44 }
 0x5b8   : >> { %v1772_v33 = vpack.c.bf16 %v5612_v63, %v5608_v26  ;;  %v1738_v49 = vadd.f32 %v5612_v63, %v5610_v23 }
 0x5b9   : >> { %5621 = vpow2.f32 %v1693_v28  ;;  %v1697_v11 = vmul.f32 1.442695, %v1643_v34  ;;  %v1699_v57 = vmul.f32 1.442695, %v1644_v46  ;;  %v7716_v37 = vpop.f32.mrb[68].mxu1 }
 0x5ba   : >> { %9064 = vst [vmem:[#allocation108_spill] sm:$0xff] %v7716_v37  ;;  %5623 = vpow2.f32 %v1695_v43  ;;  %1837 = vmatprep.mubr.bf16.mxu0 %v1772_v33  ;;  %1739 = vadd.xlane.f32.xlu1 %v1738_v49  ;;  %v7718_v25 = vpop.f32.mrb[69].mxu1 }
 0x5bb   : >> { %9065 = vst [vmem:[#allocation109_spill] sm:$0xff] %v7718_v25  ;;  %v5614_v18 = vpop.eup %5613  ;;  %5625 = vpow2.f32 %v1697_v11  ;;  %v7722_v40 = vpop.f32.mrb[70].mxu1 }
 0x5bc   : >> { %9066 = vst [vmem:[#allocation110_spill] sm:$0xff] %v7722_v40  ;;  %v5616_v8 = vpop.eup %5615  ;;  %5627 = vpow2.f32 %v1699_v57  ;;  %1838 = vmatmul.mubr.bf16.gmra.mrb[28].mxu0 %v1771_v9  ;;  %v1611_v26 = vpop.xlane.xlu1 %1610 }
 0x5bd   : >> { %v7724_v23 = vpop.f32.mrb[71].mxu1  ;;  %v1645_v46 = vsub.f32 %v7550_v20, %v1611_v26  ;;  %v1646_v10 = vsub.f32 %v7552_v39, %v1611_v26  ;;  %v1741_v63 = vadd.f32 %v5616_v8, %v5614_v18 }
 0x5be   : >> { %9067 = vst [vmem:[#allocation111_spill] sm:$0xff] %v7724_v23  ;;  %v1614_v31 = vpop.xlane.xlu0 %1613 }
 0x5bf   : >> { %v5618_v44 = vpop.eup %5617  ;;  %v1701_v28 = vmul.f32 1.442695, %v1645_v46  ;;  %v1703_v43 = vmul.f32 1.442695, %v1646_v10  ;;  %v1647_v34 = vsub.f32 %v7554_v14, %v1614_v31  ;;  %v1648_v33 = vsub.f32 %v7558_v47, %v1614_v31  ;;  %1742 = vadd.xlane.f32.xlu1 %v1741_v63 }
 0x5c0   : >> { %v5620_v9 = vpop.eup %5619  ;;  %v1773_v11 = vpack.c.bf16 %v5618_v44, %v5614_v18 }
 0x5c1   : >> { %5629 = vpow2.f32 %v1701_v28  ;;  %v1705_v57 = vmul.f32 1.442695, %v1647_v34  ;;  %v1707_v20 = vmul.f32 1.442695, %v1648_v33  ;;  %v7732_v58 = vpop.f32.mrb[72].mxu1  ;;  %v1774_v39 = vpack.c.bf16 %v5620_v9, %v5616_v8 }
 0x5c2   : >> { %9068 = vst [vmem:[#allocation112_spill] sm:$0xff] %v7732_v58  ;;  %5631 = vpow2.f32 %v1703_v43  ;;  %v1744_v26 = vadd.f32 %v5620_v9, %v5618_v44  ;;  %v7734_v49 = vpop.f32.mrb[73].mxu1  ;;  %v9087_v44 = vld [vmem:[#allocation76_spill] sm:$0xff] }
 0x5c3   : >> { %9069 = vst [vmem:[#allocation113_spill] sm:$0xff] %v7734_v49  ;;  %v5622_v6 = vpop.eup %5621  ;;  %5633 = vpow2.f32 %v1705_v57  ;;  %1845 = vmatprep.mubr.bf16.mxu0 %v1774_v39  ;;  %v7738_v47 = vpop.f32.mrb[74].mxu1 }
 0x5c4   : >> { %9070 = vst [vmem:[#allocation114_spill] sm:$0xff] %v7738_v47  ;;  %v5624_v46 = vpop.eup %5623  ;;  %5635 = vpow2.f32 %v1707_v20  ;;  %1745 = vadd.xlane.f32.xlu1 %v1744_v26  ;;  %1846 = vmatmul.mubr.bf16.gmra.mrb[32].mxu0 %v1773_v11  ;;  %v1617_v18 = vpop.xlane.xlu1 %1616 }
 0x5c5   : >> { %v7740_v10 = vpop.f32.mrb[75].mxu1  ;;  %v5626_v8 = vpop.eup %5625  ;;  %v1649_v63 = vsub.f32 %v7562_v61, %v1617_v18  ;;  %v1650_v31 = vsub.f32 %v7564_v1, %v1617_v18  ;;  %v1747_v28 = vadd.f32 %v5624_v46, %v5622_v6 }
 0x5c6   : >> { %9071 = vst [vmem:[#allocation115_spill] sm:$0xff] %v7740_v10  ;;  %v5628_v43 = vpop.eup %5627  ;;  %v1620_v34 = vpop.xlane.xlu0 %1619  ;;  %v1775_v33 = vpack.c.bf16 %v5626_v8, %v5622_v6 }
 0x5c7   : >> { %v1709_v9 = vmul.f32 1.442695, %v1649_v63  ;;  %v1711_v57 = vmul.f32 1.442695, %v1650_v31  ;;  %1748 = vadd.xlane.f32.xlu0 %v1747_v28  ;;  %v1651_v11 = vsub.f32 %v7566_v59, %v1620_v34  ;;  %v1652_v20 = vsub.f32 %v7570_v48, %v1620_v34 }
 0x5c8   : >> { %v1776_v39 = vpack.c.bf16 %v5628_v43, %v5624_v46  ;;  %v1750_v26 = vadd.f32 %v5628_v43, %v5626_v8 }
 0x5c9   : >> { %5637 = vpow2.f32 %v1709_v9  ;;  %v1713_v61 = vmul.f32 1.442695, %v1651_v11  ;;  %v1715_v14 = vmul.f32 1.442695, %v1652_v20  ;;  %v7748_v1 = vpop.f32.mrb[76].mxu1 }
 0x5ca   : >> { %9072 = vst [vmem:[#allocation116_spill] sm:$0xff] %v7748_v1  ;;  %5639 = vpow2.f32 %v1711_v57  ;;  %1853 = vmatprep.mubr.bf16.mxu0 %v1776_v39  ;;  %1751 = vadd.xlane.f32.xlu1 %v1750_v26  ;;  %v7750_v18 = vpop.f32.mrb[77].mxu1 }
 0x5cb   : >> { %9073 = vst [vmem:[#allocation117_spill] sm:$0xff] %v7750_v18  ;;  %v5630_v6 = vpop.eup %5629  ;;  %5641 = vpow2.f32 %v1713_v61  ;;  %v7754_v59 = vpop.f32.mrb[78].mxu1  ;;  %v9095_v18 = vld [vmem:[#allocation55_spill] sm:$0xff] }
 0x5cc   : >> { %9074 = vst [vmem:[#allocation118_spill] sm:$0xff] %v7754_v59  ;;  %v5632_v48 = vpop.eup %5631  ;;  %5643 = vpow2.f32 %v1715_v14  ;;  %1854 = vmatmul.mubr.bf16.gmra.mrb[36].mxu0 %v1775_v33  ;;  %v7756_v46 = vpop.f32.mrb[79].mxu1 }
 0x5cd   : >> { %9075 = vst [vmem:[#allocation119_spill] sm:$0xff] %v7756_v46  ;;  %v5634_v8 = vpop.eup %5633  ;;  %v1753_v28 = vadd.f32 %v5632_v48, %v5630_v6  ;;  %v9097_v46 = vld [vmem:[#allocation85_spill] sm:$0xff] }
 0x5ce   : >> { %v5636_v43 = vpop.eup %5635  ;;  %v1777_v34 = vpack.c.bf16 %v5634_v8, %v5630_v6 }
 0x5cf   : >> { %1754 = vadd.xlane.f32.xlu1 %v1753_v28  ;;  %v1778_v9 = vpack.c.bf16 %v5636_v43, %v5632_v48  ;;  %v1756_v57 = vadd.f32 %v5636_v43, %v5634_v8 }
 0x5d1   : >> { %1861 = vmatprep.mubr.bf16.mxu0 %v1778_v9  ;;  %v7760_v11 = vpop.f32.mrb[80].mxu1 }
 0x5d2   : >> { %9076 = vst [vmem:[#allocation120_spill] sm:$0xff] %v7760_v11  ;;  %v7762_v20 = vpop.f32.mrb[81].mxu1 }
 0x5d3   : >> { %9077 = vst [vmem:[#allocation121_spill] sm:$0xff] %v7762_v20  ;;  %v5638_v39 = vpop.eup %5637  ;;  %1757 = vadd.xlane.f32.xlu1 %v1756_v57  ;;  %v7766_v33 = vpop.f32.mrb[82].mxu1 }
 0x5d4   : >> { %9078 = vst [vmem:[#allocation122_spill] sm:$0xff] %v7766_v33  ;;  %v5640_v26 = vpop.eup %5639  ;;  %1862 = vmatmul.mubr.bf16.gmra.mrb[40].mxu0 %v1777_v34  ;;  %v7768_v61 = vpop.f32.mrb[83].mxu1  ;;  %v9094_v33 = vld [vmem:[#allocation83_spill] sm:$0xff] }
 0x5d5   : >> { %9079 = vst [vmem:[#allocation123_spill] sm:$0xff] %v7768_v61  ;;  %v5642_v6 = vpop.eup %5641  ;;  %v1759_v8 = vadd.f32 %v5640_v26, %v5638_v39 }
 0x5d6   : >> { %v5644_v28 = vpop.eup %5643  ;;  %v1779_v43 = vpack.c.bf16 %v5642_v6, %v5638_v39 }
 0x5d7   : >> { %1760 = vadd.xlane.f32.xlu0 %v1759_v8  ;;  %v1780_v9 = vpack.c.bf16 %v5644_v28, %v5640_v26  ;;  %v1762_v63 = vadd.f32 %v5644_v28, %v5642_v6 }
 0x5d9   : >> { %1869 = vmatprep.mubr.bf16.mxu0 %v1780_v9  ;;  %1763 = vadd.xlane.f32.xlu1 %v1762_v63 }
 0x5dc   : >> { %1870 = vmatmul.mubr.bf16.gmra.mrb[44].mxu0 %v1779_v43 }
 0x5ea   : >> { %2570 = vrot.lane.b32.xlu1 %v8988_v0, %s6220_s21 }
 0x5ed   : >> { %3697 = vrot.lane.b32.xlu0 %v8989_v60, %s6222_s10 }
 0x5f1   : >> { %2554 = vrot.lane.b32.xlu0 %v8987_v51, %s6220_s21 }
 0x602   : >> { %v2326_v34 = vpop.xlane.xlu0 %2325 }
 0x603   : >> { %v2372_v57 = vsub.f32 %v7574_v5, %v2326_v34  ;;  %v2373_v39 = vsub.f32 %v7576_v53, %v2326_v34 }
 0x605   : >> { %v2404_v8 = vmul.f32 1.442695, %v2372_v57  ;;  %v2406_v26 = vmul.f32 1.442695, %v2373_v39 }
 0x606   : >> { %v2329_v6 = vpop.xlane.xlu0 %2328 }
 0x607   : >> { %5645 = vpow2.f32 %v2404_v8  ;;  %v2374_v63 = vsub.f32 %v7578_v41, %v2329_v6  ;;  %v2375_v28 = vsub.f32 %v7582_v42, %v2329_v6  ;;  %v9080_v42 = vmax.f32 %v7600_v22, %v7602_v15 }
 0x608   : >> { %5647 = vpow2.f32 %v2406_v26 }
 0x609   : >> { %v2408_v43 = vmul.f32 1.442695, %v2374_v63  ;;  %v2410_v9 = vmul.f32 1.442695, %v2375_v28 }
 0x60a   : >> { %v2332_v14 = vpop.xlane.xlu0 %2331 }
 0x60b   : >> { %5649 = vpow2.f32 %v2408_v43  ;;  %v2376_v48 = vsub.f32 %v7586_v45, %v2332_v14  ;;  %v2377_v31 = vsub.f32 %v7588_v16, %v2332_v14  ;;  %v9081_v45 = vmax.f32 %v7606_v13, %v7610_v4 }
 0x60c   : >> { %5651 = vpow2.f32 %v2410_v9  ;;  %v2335_v5 = vpop.xlane.xlu1 %2334 }
 0x60d   : >> { %v2412_v53 = vmul.f32 1.442695, %v2376_v48  ;;  %v2414_v34 = vmul.f32 1.442695, %v2377_v31  ;;  %v2378_v57 = vsub.f32 %v7590_v32, %v2335_v5  ;;  %v2379_v39 = vsub.f32 %v7594_v24, %v2335_v5 }
 0x60e   : >> { %2337 = vmax.xlane.f32.xlu1 %v9080_v42  ;;  %v9083_v42 = vld [vmem:[#allocation90_spill] sm:$0xff] }
 0x60f   : >> { %5653 = vpow2.f32 %v2412_v53  ;;  %v2416_v41 = vmul.f32 1.442695, %v2378_v57  ;;  %v2418_v8 = vmul.f32 1.442695, %v2379_v39  ;;  %v9082_v39 = vld [vmem:[#allocation72_spill] sm:$0xff]  ;;  %v9089_v53 = vld [vmem:[#allocation99_spill] sm:$0xff] }
 0x610   : >> { %5655 = vpow2.f32 %v2414_v34  ;;  %2340 = vmax.xlane.f32.xlu0 %v9081_v45  ;;  %v9086_v45 = vld [vmem:[#allocation74_spill] sm:$0xff]  ;;  %v9090_v34 = vld [vmem:[#allocation101_spill] sm:$0xff] }
 0x611   : >> { %v7792_v16 = vpop.eup %5645  ;;  %5657 = vpow2.f32 %v2416_v41  ;;  %v9084_v41 = vld [vmem:[#allocation79_spill] sm:$0xff]  ;;  %v9091_v48 = vmax.f32 %v9089_v53, %v9090_v34 }
 0x612   : >> { %v7794_v31 = vpop.eup %5647  ;;  %5659 = vpow2.f32 %v2418_v8  ;;  %v9085_v8 = vld [vmem:[#allocation80_spill] sm:$0xff] }
 0x613   : >> { %v7798_v24 = vadd.f32 %v7794_v31, %v7792_v16 }
 0x615   : >> { %v7800_v32 = vpop.eup %5649 }
 0x616   : >> { %v7802_v14 = vpop.eup %5651 }
 0x617   : >> { %v7810_v6 = vadd.f32 %v7802_v14, %v7800_v32 }
 0x619   : >> { %v7812_v63 = vpop.eup %5653 }
 0x61a   : >> { %v7814_v28 = vpop.eup %5655 }
 0x61b   : >> { %v7816_v43 = vpop.eup %5657  ;;  %v7820_v9 = vadd.f32 %v7814_v28, %v7812_v63 }
 0x61c   : >> { %v7822_v5 = vpop.eup %5659 }
 0x61d   : >> { %v7830_v57 = vadd.f32 %v7822_v5, %v7816_v43 }
 0x61f   : >> { %2556 = vrot.lane.b32.xlu1 %v9082_v39, %s6220_s21 }
 0x623   : >> { %2892 = vrot.lane.b32.xlu1 %v9083_v42, %s6221_s23 }
 0x626   : >> { %2572 = vrot.lane.b32.xlu0 %v9084_v41, %s6220_s21  ;;  %v9099_v41 = vld [vmem:[#allocation82_spill] sm:$0xff] }
 0x627   : >> { %3699 = vrot.lane.b32.xlu1 %v9085_v8, %s6222_s10 }
 0x62a   : >> { %3683 = vrot.lane.b32.xlu0 %v9086_v45, %s6222_s10  ;;  %v9093_v45 = vld [vmem:[#allocation57_spill] sm:$0xff] }
 0x62b   : >> { %2558 = vrot.lane.b32.xlu1 %v9087_v44, %s6220_s21  ;;  %v9100_v44 = vld [vmem:[#allocation61_spill] sm:$0xff] }
 0x62c   : >> { %v1719_v26 = vpop.xlane.xlu0 %1718 }
 0x62d   : >> { %5661 = vrcp.f32 %v1719_v26 }
 0x62e   : >> { %2574 = vrot.lane.b32.xlu0 %v9088_v17, %s6220_s21  ;;  %v1722_v20 = vpop.xlane.xlu1 %1721  ;;  %v9098_v17 = vld [vmem:[#allocation100_spill] sm:$0xff] }
 0x62f   : >> { %5663 = vrcp.f32 %v1722_v20 }
 0x634   : >> { %v1725_v60 = vpop.xlane.xlu0 %1724 }
 0x635   : >> { %5665 = vrcp.f32 %v1725_v60 }
 0x637   : >> { %v1728_v61 = vpop.xlane.xlu1 %1727  ;;  %v5662_v47 = vpop.eup %5661 }
 0x638   : >> { %5667 = vrcp.f32 %v1728_v61 }
 0x639   : >> { %v5664_v0 = vpop.eup %5663 }
 0x63c   : >> { %v1731_v1 = vpop.xlane.xlu1 %1730 }
 0x63d   : >> { %5669 = vrcp.f32 %v1731_v1  ;;  %v9102_v1 = vld [vmem:[#allocation95_spill] sm:$0xff] }
 0x644   : >> { %v1737_v8 = vpop.xlane.xlu0 %1736 }
 0x64d   : >> { %2343 = vmax.xlane.f32.xlu0 %v9091_v48 }
 0x64f   : >> { %2346 = vmax.xlane.f32.xlu1 %v9092_v7  ;;  %v9096_v7 = vld [vmem:[#allocation93_spill] sm:$0xff] }
 0x654   : >> { %v7852_v11 = vpop.xlane.xlu0 %1748 }
 0x660   : >> { %2560 = vrot.lane.b32.xlu1 %v9093_v45, %s6220_s21  ;;  %v3742_v45 = vsel %vm1387_vm2, %v9098_v17, 0 }
 0x663   : >> { %2576 = vrot.lane.b32.xlu0 %v9094_v33, %s6220_s21  ;;  %v1734_v33 = vpop.xlane.xlu1 %1733 }
 0x664   : >> { %3685 = vrot.lane.b32.xlu1 %v9095_v18, %s6222_s10  ;;  %v7860_v48 = vpop.xlane.xlu0 %1760  ;;  %5671 = vrcp.f32 %v1734_v33 }
 0x665   : >> { %5673 = vrcp.f32 %v1737_v8  ;;  %v9105_v8 = vld [vmem:[#allocation97_spill] sm:$0xff] }
 0x667   : >> { %2894 = vrot.lane.b32.xlu0 %v9096_v7, %s6221_s23  ;;  %v1740_v18 = vpop.xlane.xlu1 %1739 }
 0x668   : >> { %2578 = vrot.lane.b32.xlu1 %v9097_v46, %s6220_s21  ;;  %v3698_v59 = vpop.permute.xlu0 %3697  ;;  %5675 = vrcp.f32 %v1740_v18  ;;  %v9108_v18 = vld [vmem:[#allocation104_spill] sm:$0xff] }
 0x669   : >> { %5443 = vmatprep.subr.msk.bf16.mxu1 %vm1387_vm2, %v3698_v59 }
 0x66a   : >> { %5067 = vmatpush3.bf16.xpose.msra.mxu1 %v3742_v45 }
 0x66b   : >> { %3701 = vrot.lane.b32.xlu0 %v9099_v41, %s6222_s10  ;;  %v1743_v39 = vpop.xlane.xlu1 %1742 }
 0x66c   : >> { %5677 = vrcp.f32 %v1743_v39 }
 0x66f   : >> { %2562 = vrot.lane.b32.xlu0 %v9100_v44, %s6220_s21  ;;  %v1746_v59 = vpop.xlane.xlu1 %1745  ;;  %s8688_s21 = scalar_lea.hbm (%p1144_p3), %s9265_s13, %s4706_s12 }
 0x670   : >> { %5679 = vrcp.f32 %v1746_v59 }
 0x671   : >> { %5681 = vrcp.f32 %v7852_v11  ;;  %v9111_v11 = vld [vmem:[#allocation59_spill] sm:$0xff] }
 0x673   : >> { %v7873_v26 = vpop.xlane.xlu1 %1751 }
 0x674   : >> { %5683 = vrcp.f32 %v7873_v26 }
 0x675   : >> { %v4788_v49 = vpop.f32.mrb[16].mxu0 }
 0x676   : >> { %v4789_v46 = vpop.f32.mrb[17].mxu0 }
 0x677   : >> { %v4790_v58 = vadd.f32 %v4789_v46, %v4788_v49  ;;  %v4791_v10 = vpop.f32.mrb[18].mxu0  ;;  %v7876_v49 = vpop.xlane.xlu1 %1754 }
 0x678   : >> { %v4792_v17 = vpop.f32.mrb[19].mxu0  ;;  %v5666_v46 = vpop.eup %5665  ;;  %5685 = vrcp.f32 %v7876_v49 }
 0x679   : >> { %v4793_v45 = vadd.f32 %v4792_v17, %v4791_v10  ;;  %v1894_v51 = vmul.f32 %v5662_v47, %v4790_v58  ;;  %v5668_v10 = vpop.eup %5667 }
 0x67b   : >> { %v1895_v41 = vmul.f32 %v5664_v0, %v4793_v45  ;;  %v7878_v47 = vpop.xlane.xlu1 %1757 }
 0x67c   : >> { %5687 = vrcp.f32 %v7878_v47 }
 0x67d   : >> { %v1910_v25 = vpack.c.bf16 %v1895_v41, %v1894_v51 }
 0x67e   : >> { %v4794_v37 = vpop.f32.mrb[20].mxu0 }
 0x67f   : >> { %v4795_v44 = vpop.f32.mrb[21].mxu0  ;;  %5235 = vmatprep.mubr.msk.bf16.mxu0 %vm1387_vm2, %v1910_v25  ;;  %v7883_v41 = vpop.xlane.xlu1 %1763 }
 0x680   : >> { %v4796_v20 = vadd.f32 %v4795_v44, %v4794_v37  ;;  %v4797_v23 = vpop.f32.mrb[22].mxu0  ;;  %v9101_v37 = vld [vmem:[#allocation94_spill] sm:$0xff] }
 0x681   : >> { %v4798_v60 = vpop.f32.mrb[23].mxu0 }
 0x682   : >> { %v4799_v61 = vadd.f32 %v4798_v60, %v4797_v23  ;;  %v1896_v17 = vmul.f32 %v5666_v46, %v4796_v20  ;;  %v5670_v23 = vpop.eup %5669  ;;  %v9103_v46 = vld [vmem:[#allocation102_spill] sm:$0xff] }
 0x683   : >> { %v5672_v60 = vpop.eup %5671 }
 0x684   : >> { %v1897_v58 = vmul.f32 %v5668_v10, %v4799_v61  ;;  %v9104_v61 = vmax.f32 %v7632_v29, %v9103_v46 }
 0x686   : >> { %v1911_v0 = vpack.c.bf16 %v1897_v58, %v1896_v17  ;;  %v9106_v58 = vld [vmem:[#allocation96_spill] sm:$0xff] }
 0x687   : >> { %v4800_v51 = vpop.f32.mrb[24].mxu0 }
 0x688   : >> { %5236 = vmatmul.mubr.msk.bf16.vlgmr.msra.gmra.mrb[48].mxu0 %vm1387_vm2, %v1911_v0  ;;  %v4801_v45 = vpop.f32.mrb[25].mxu0  ;;  %v9107_v0 = vld [vmem:[#allocation103_spill] sm:$0xff] }
 0x689   : >> { %4879 = vmatpush3.bf16.msra.mxu0 %v9101_v37  ;;  %v4802_v25 = vadd.f32 %v4801_v45, %v4800_v51  ;;  %v4803_v44 = vpop.f32.mrb[26].mxu0  ;;  %v9109_v51 = vmax.f32 %v9107_v0, %v9108_v18 }
 0x68a   : >> { %4880 = vmatprep.subr.bf16.mxu0 %v9102_v1  ;;  %v4804_v33 = vpop.f32.mrb[27].mxu0 }
 0x68b   : >> { %v4805_v20 = vadd.f32 %v4804_v33, %v4803_v44  ;;  %v1898_v10 = vmul.f32 %v5670_v23, %v4802_v25  ;;  %v2571_v44 = vpop.permute.xlu1 %2570  ;;  %v9110_v33 = vld [vmem:[#allocation98_spill] sm:$0xff]  ;;  %v5674_v23 = vpop.eup %5673 }
 0x68c   : >> { %2349 = vmax.xlane.f32.xlu1 %v9104_v61  ;;  %v2555_v61 = vpop.permute.xlu0 %2554 }
 0x68d   : >> { %v1899_v17 = vmul.f32 %v5672_v60, %v4805_v20  ;;  %4881 = vmatpush3.bf16.msra.mxu0 %v9105_v8  ;;  %v5676_v60 = vpop.eup %5675 }
 0x68e   : >> { %4882 = vmatprep.subr.bf16.mxu0 %v9106_v58  ;;  %2352 = vmax.xlane.f32.xlu0 %v9109_v51 }
 0x68f   : >> { %v1912_v45 = vpack.c.bf16 %v1899_v17, %v1898_v10  ;;  %v4806_v37 = vpop.f32.mrb[28].mxu0 }
 0x690   : >> { %v4807_v1 = vpop.f32.mrb[29].mxu0 }
 0x691   : >> { %4883 = vmatpush3.bf16.msra.mxu0 %v9110_v33  ;;  %v4808_v40 = vadd.f32 %v4807_v1, %v4806_v37  ;;  %v4809_v30 = vpop.f32.mrb[30].mxu0  ;;  %5239 = vmatprep.mubr.msk.bf16.mxu0 %vm1387_vm2, %v1912_v45  ;;  %v5678_v45 = vpop.eup %5677 }
 0x692   : >> { %4884 = vmatprep.subr.bf16.mxu0 %v2571_v44  ;;  %v4810_v25 = vpop.f32.mrb[31].mxu0  ;;  %v5680_v44 = vpop.eup %5679 }
 0x693   : >> { %v4811_v20 = vadd.f32 %v4810_v25, %v4809_v30  ;;  %v1900_v8 = vmul.f32 %v5674_v23, %v4808_v40  ;;  %v5682_v47 = vpop.eup %5681 }
 0x695   : >> { %v1901_v58 = vmul.f32 %v5676_v60, %v4811_v20  ;;  %4885 = vmatpush3.bf16.msra.mxu0 %v2555_v61 }
 0x697   : >> { %v1913_v10 = vpack.c.bf16 %v1901_v58, %v1900_v8  ;;  %v4812_v17 = vpop.f32.mrb[32].mxu0 }
 0x698   : >> { %v4813_v39 = vpop.f32.mrb[33].mxu0 }
 0x699   : >> { %v4814_v51 = vadd.f32 %v4813_v39, %v4812_v17  ;;  %v4815_v37 = vpop.f32.mrb[34].mxu0  ;;  %5240 = vmatmul.mubr.msk.bf16.gmra.mrb[52].mxu0 %vm1387_vm2, %v1913_v10 }
 0x69a   : >> { %v4816_v59 = vpop.f32.mrb[35].mxu0 }
 0x69b   : >> { %v4817_v1 = vadd.f32 %v4816_v59, %v4815_v37  ;;  %v2338_v30 = vpop.xlane.xlu1 %2337  ;;  %v1902_v25 = vmul.f32 %v5678_v45, %v4814_v51  ;;  %v9112_v37 = vld [vmem:[#allocation84_spill] sm:$0xff] }
 0x69c   : >> { %v2380_v40 = vsub.f32 %v7600_v22, %v2338_v30  ;;  %v2381_v33 = vsub.f32 %v7602_v15, %v2338_v30  ;;  %v9113_v30 = vld [vmem:[#allocation92_spill] sm:$0xff] }
 0x69d   : >> { %v1903_v23 = vmul.f32 %v5680_v44, %v4817_v1  ;;  %3687 = vrot.lane.b32.xlu1 %v9111_v11, %s6222_s10  ;;  %v2341_v20 = vpop.xlane.xlu0 %2340  ;;  %v5684_v1 = vpop.eup %5683 }
 0x69e   : >> { %v2420_v60 = vmul.f32 1.442695, %v2380_v40  ;;  %v2422_v61 = vmul.f32 1.442695, %v2381_v33  ;;  %v2382_v26 = vsub.f32 %v7606_v13, %v2341_v20  ;;  %v2383_v8 = vsub.f32 %v7610_v4, %v2341_v20 }
 0x69f   : >> { %v1914_v58 = vpack.c.bf16 %v1903_v23, %v1902_v25  ;;  %v4818_v22 = vpop.f32.mrb[36].mxu0  ;;  %v2557_v10 = vpop.permute.xlu1 %2556 }
 0x6a0   : >> { %5689 = vpow2.f32 %v2420_v60  ;;  %v2424_v15 = vmul.f32 1.442695, %v2382_v26  ;;  %v2426_v49 = vmul.f32 1.442695, %v2383_v8  ;;  %v4819_v17 = vpop.f32.mrb[37].mxu0  ;;  %v5686_v25 = vpop.eup %5685 }
 0x6a1   : >> { %5691 = vpow2.f32 %v2422_v61  ;;  %v4820_v39 = vadd.f32 %v4819_v17, %v4818_v22  ;;  %v4821_v51 = vpop.f32.mrb[38].mxu0  ;;  %3703 = vrot.lane.b32.xlu1 %v9112_v37, %s6222_s10  ;;  %5243 = vmatprep.mubr.msk.bf16.mxu0 %vm1387_vm2, %v1914_v58  ;;  %v2573_v13 = vpop.permute.xlu0 %2572 }
 0x6a2   : >> { %5693 = vpow2.f32 %v2424_v15  ;;  %v4822_v4 = vpop.f32.mrb[39].mxu0  ;;  %4886 = vmatprep.subr.bf16.mxu0 %v2573_v13  ;;  %v5688_v26 = vpop.eup %5687 }
 0x6a3   : >> { %5695 = vpow2.f32 %v2426_v49  ;;  %v4823_v59 = vadd.f32 %v4822_v4, %v4821_v51  ;;  %v2893_v45 = vpop.permute.xlu1 %2892  ;;  %4887 = vmatpush3.bf16.msra.mxu0 %v2557_v10  ;;  %v1904_v44 = vmul.f32 %v5682_v47, %v4820_v39 }
 0x6a4   : >> { %2896 = vrot.lane.b32.xlu0 %v9113_v30, %s6221_s23  ;;  %4978 = vmatprep.mubr.msk.bf16.mxu1 %vm1387_vm2, %v2893_v45  ;;  %5697 = vrcp.f32 %v7860_v48 }
 0x6a5   : >> { %v1905_v40 = vmul.f32 %v5684_v1, %v4823_v59  ;;  %4979 = vmatmul.mubr.msk.bf16.gmra.mrb[84].mxu1 %vm1387_vm2, %v2893_v45  ;;  %v3684_v33 = vpop.permute.xlu0 %3683  ;;  %5699 = vrcp.f32 %v7883_v41 }
 0x6a6   : >> { %v3745_v60 = vsel %vm1387_vm2, %v3684_v33, 0 }
 0x6a7   : >> { %v1915_v23 = vpack.c.bf16 %v1905_v40, %v1904_v44  ;;  %v4824_v11 = vpop.f32.mrb[40].mxu0  ;;  %v3700_v20 = vpop.permute.xlu1 %3699 }
 0x6a8   : >> { %v4825_v61 = vpop.f32.mrb[41].mxu0  ;;  %5444 = vmatprep.subr.msk.bf16.mxu1 %vm1387_vm2, %v3700_v20 }
 0x6a9   : >> { %v4826_v8 = vadd.f32 %v4825_v61, %v4824_v11  ;;  %v4827_v58 = vpop.f32.mrb[42].mxu0  ;;  %5244 = vmatmul.mubr.msk.bf16.gmra.mrb[56].mxu0 %vm1387_vm2, %v1915_v23  ;;  %5069 = vmatpush3.bf16.xpose.msra.mxu1 %v3745_v60  ;;  %v2575_v22 = vpop.permute.xlu0 %2574 }
 0x6aa   : >> { %v7917_v10 = vpop.eup %5689  ;;  %v4828_v15 = vpop.f32.mrb[43].mxu0  ;;  %4888 = vmatprep.subr.bf16.mxu0 %v2575_v22  ;;  %v9116_v22 = vld [vmem:[#allocation106_spill] sm:$0xff] }
 0x6ab   : >> { %v7920_v49 = vpop.eup %5691  ;;  %v4829_v17 = vadd.f32 %v4828_v15, %v4827_v58  ;;  %v2559_v39 = vpop.permute.xlu1 %2558  ;;  %v1906_v13 = vmul.f32 %v5686_v25, %v4826_v8  ;;  %v9114_v8 = vpack.c.bf16 %v7802_v14, %v7794_v31  ;;  %v9115_v58 = vld [vmem:[#allocation105_spill] sm:$0xff] }
 0x6ac   : >> { %v7922_v51 = vpop.eup %5693  ;;  %4889 = vmatpush3.bf16.msra.mxu0 %v2559_v39  ;;  %v7926_v48 = vadd.f32 %v7920_v49, %v7917_v10  ;;  %v9117_v15 = vmax.f32 %v9115_v58, %v9116_v22  ;;  %v9119_v39 = vmax.f32 %v7666_v27, %v7668_v36 }
 0x6ad   : >> { %v7928_v37 = vpop.eup %5695  ;;  %v1907_v4 = vmul.f32 %v5688_v26, %v4829_v17  ;;  %v2520_v41 = vpack.c.bf16 %v7922_v51, %v7917_v10  ;;  %v9118_v17 = vmax.f32 %v7654_v52, %v7656_v56 }
 0x6ae   : >> { %v2521_v47 = vpack.c.bf16 %v7928_v37, %v7920_v49  ;;  %v7936_v59 = vadd.f32 %v7928_v37, %v7922_v51  ;;  %v5698_v25 = vpop.eup %5697 }
 0x6af   : >> { %v1916_v45 = vpack.c.bf16 %v1907_v4, %v1906_v13  ;;  %v4830_v1 = vpop.f32.mrb[44].mxu0  ;;  %v5700_v20 = vpop.eup %5699  ;;  %v9120_v13 = vmax.f32 %v7673_v55, %v7675_v3  ;;  %v9121_v4 = vld [vmem:[#allocation87_spill] sm:$0xff] }
 0x6b0   : >> { %v4831_v44 = vpop.f32.mrb[45].mxu0 }
 0x6b1   : >> { %v4832_v40 = vadd.f32 %v4831_v44, %v4830_v1  ;;  %v4833_v33 = vpop.f32.mrb[46].mxu0  ;;  %5247 = vmatprep.mubr.msk.bf16.mxu0 %vm1387_vm2, %v1916_v45 }
 0x6b2   : >> { %v4834_v23 = vpop.f32.mrb[47].mxu0 }
 0x6b3   : >> { %v4835_v11 = vadd.f32 %v4834_v23, %v4833_v33  ;;  %v1908_v60 = vmul.f32 %v5698_v25, %v4832_v40  ;;  %v9122_v25 = vld [vmem:[#allocation86_spill] sm:$0xff] }
 0x6b5   : >> { %v1909_v61 = vmul.f32 %v5700_v20, %v4835_v11 }
 0x6b7   : >> { %v1917_v26 = vpack.c.bf16 %v1909_v61, %v1908_v60 }
 0x6b9   : >> { %5248 = vmatmul.mubr.msk.bf16.gmra.mrb[60].mxu0 %vm1387_vm2, %v1917_v26 }
 0x6ba   : >> { %2628 = vmatprep.mubr.bf16.mxu0 %v9114_v8 }
 0x6c3   : >> { %2355 = vmax.xlane.f32.xlu0 %v9117_v15 }
 0x6c5   : >> { %2358 = vmax.xlane.f32.xlu1 %v9118_v17 }
 0x6c9   : >> { %2361 = vmax.xlane.f32.xlu1 %v9119_v39 }
 0x6cd   : >> { %2364 = vmax.xlane.f32.xlu1 %v9120_v13 }
 0x6d9   : >> { %3657 = vrot.lane.b32.xlu0 %v9121_v4, %s6222_s10 }
 0x6da   : >> { %v2344_v31 = vpop.xlane.xlu0 %2343 }
 0x6db   : >> { %v2384_v14 = vsub.f32 %v9089_v53, %v2344_v31  ;;  %v2385_v45 = vsub.f32 %v9090_v34, %v2344_v31 }
 0x6dc   : >> { %v2347_v1 = vpop.xlane.xlu1 %2346 }
 0x6dd   : >> { %v2428_v44 = vmul.f32 1.442695, %v2384_v14  ;;  %v2430_v40 = vmul.f32 1.442695, %v2385_v45  ;;  %v2386_v33 = vsub.f32 %v7622_v35, %v2347_v1  ;;  %v2387_v23 = vsub.f32 %v7624_v50, %v2347_v1 }
 0x6de   : >> { %3659 = vrot.lane.b32.xlu1 %v9122_v25, %s6222_s10  ;;  %v2577_v11 = vpop.permute.xlu0 %2576  ;;  %v9123_v1 = vpack.c.bf16 %v7800_v32, %v7792_v16  ;;  %v9127_v16 = vmax.f32 %v7690_v19, %v7692_v38  ;;  %v9128_v32 = vld [vmem:[#allocation89_spill] sm:$0xff] }
 0x6df   : >> { %5701 = vpow2.f32 %v2428_v44  ;;  %v2432_v20 = vmul.f32 1.442695, %v2386_v33  ;;  %v2434_v60 = vmul.f32 1.442695, %v2387_v23  ;;  %4890 = vmatprep.subr.bf16.mxu0 %v2577_v11  ;;  %v9124_v44 = vpack.c.bf16 %v7822_v5, %v7814_v28  ;;  %v9130_v28 = vld [vmem:[#allocation88_spill] sm:$0xff] }
 0x6e0   : >> { %5703 = vpow2.f32 %v2430_v40  ;;  %v2561_v61 = vpop.permute.xlu1 %2560  ;;  %v9125_v40 = vpack.c.bf16 %v7816_v43, %v7812_v63  ;;  %v9126_v33 = vmax.f32 %v7684_v62, %v7686_v2  ;;  %v9129_v63 = vld [vmem:[#allocation91_spill] sm:$0xff] }
 0x6e1   : >> { %5705 = vpow2.f32 %v2432_v20  ;;  %4891 = vmatpush3.bf16.msra.mxu0 %v2561_v61 }
 0x6e2   : >> { %5707 = vpow2.f32 %v2434_v60  ;;  %v2895_v53 = vpop.permute.xlu0 %2894 }
 0x6e3   : >> { %4980 = vmatprep.mubr.msk.bf16.mxu1 %vm1387_vm2, %v2895_v53 }
 0x6e4   : >> { %v3686_v34 = vpop.permute.xlu1 %3685  ;;  %4981 = vmatmul.mubr.msk.bf16.gmra.mrb[88].mxu1 %vm1387_vm2, %v2895_v53 }
 0x6e5   : >> { %v3748_v50 = vsel %vm1387_vm2, %v3686_v34, 0 }
 0x6e6   : >> { %v3702_v35 = vpop.permute.xlu0 %3701 }
 0x6e7   : >> { %5445 = vmatprep.subr.msk.bf16.mxu1 %vm1387_vm2, %v3702_v35 }
 0x6e8   : >> { %v2579_v26 = vpop.permute.xlu1 %2578  ;;  %5071 = vmatpush3.bf16.xpose.msra.mxu1 %v3748_v50 }
 0x6e9   : >> { %v5702_v8 = vpop.eup %5701  ;;  %4892 = vmatprep.subr.bf16.mxu0 %v2579_v26 }
 0x6ea   : >> { %v5704_v15 = vpop.eup %5703  ;;  %v2563_v17 = vpop.permute.xlu0 %2562 }
 0x6eb   : >> { %v5706_v39 = vpop.eup %5705  ;;  %4893 = vmatpush3.bf16.msra.mxu0 %v2563_v17  ;;  %v2486_v13 = vadd.f32 %v5704_v15, %v5702_v8  ;;  %v9132_v17 = vld [vmem:[#allocation22_spill] sm:$0xff] }
 0x6ec   : >> { %v5708_v4 = vpop.eup %5707  ;;  %v2522_v31 = vpack.c.bf16 %v5706_v39, %v5702_v8 }
 0x6ed   : >> { %v2523_v14 = vpack.c.bf16 %v5708_v4, %v5704_v15  ;;  %v2489_v45 = vadd.f32 %v5708_v4, %v5706_v39 }
 0x6ee   : >> { %2629 = vmatmul.mubr.bf16.vlgmr.msra.gmra.mrb[64].mxu0 %v9123_v1 }
 0x6ef   : >> { %2636 = vmatprep.mubr.bf16.mxu0 %v9124_v44 }
 0x6f6   : >> { %2637 = vmatmul.mubr.bf16.gmra.mrb[68].mxu0 %v9125_v40 }
 0x6f7   : >> { %2644 = vmatprep.mubr.bf16.mxu0 %v2521_v47 }
 0x6f8   : >> { %2367 = vmax.xlane.f32.xlu0 %v9126_v33 }
 0x6fe   : >> { %2645 = vmatmul.mubr.bf16.gmra.mrb[72].mxu0 %v2520_v41 }
 0x6ff   : >> { %2652 = vmatprep.mubr.bf16.mxu0 %v2523_v14  ;;  %v9134_v14 = vld [vmem:[#allocation24_spill] sm:$0xff] }
 0x702   : >> { %2370 = vmax.xlane.f32.xlu1 %v9127_v16 }
 0x706   : >> { %2653 = vmatmul.mubr.bf16.gmra.mrb[76].mxu0 %v2522_v31  ;;  %v9133_v31 = vld [vmem:[#allocation25_spill] sm:$0xff] }
 0x70e   : >> { %3661 = vrot.lane.b32.xlu0 %v9128_v32, %s6222_s10 }
 0x712   : >> { %3665 = vrot.lane.b32.xlu0 %v9129_v63, %s6222_s10 }
 0x713   : >> { %3663 = vrot.lane.b32.xlu1 %v9130_v28, %s6222_s10 }
 0x716   : >> { %3667 = vrot.lane.b32.xlu0 %v9083_v42, %s6222_s10 }
 0x717   : >> { %3671 = vrot.lane.b32.xlu1 %v9113_v30, %s6222_s10 }
 0x719   : >> { %v2350_v43 = vpop.xlane.xlu1 %2349 }
 0x71a   : >> { %v2388_v5 = vsub.f32 %v7632_v29, %v2350_v43  ;;  %v2389_v10 = vsub.f32 %v9103_v46, %v2350_v43  ;;  %3669 = vrot.lane.b32.xlu0 %v9096_v7, %s6222_s10 }
 0x71b   : >> { %v2353_v49 = vpop.xlane.xlu0 %2352 }
 0x71c   : >> { %v2436_v51 = vmul.f32 1.442695, %v2388_v5  ;;  %v2438_v37 = vmul.f32 1.442695, %v2389_v10  ;;  %v2390_v41 = vsub.f32 %v9107_v0, %v2353_v49  ;;  %v2391_v47 = vsub.f32 %v9108_v18, %v2353_v49 }
 0x71d   : >> { %v3688_v23 = vpop.permute.xlu1 %3687 }
 0x71e   : >> { %5709 = vpow2.f32 %v2436_v51  ;;  %v2440_v42 = vmul.f32 1.442695, %v2390_v41  ;;  %v2442_v25 = vmul.f32 1.442695, %v2391_v47  ;;  %v3751_v7 = vsel %vm1387_vm2, %v3688_v23, 0 }
 0x71f   : >> { %5711 = vpow2.f32 %v2438_v37  ;;  %v2897_v30 = vpop.permute.xlu0 %2896 }
 0x720   : >> { %5713 = vpow2.f32 %v2440_v42  ;;  %4982 = vmatprep.mubr.msk.bf16.mxu1 %vm1387_vm2, %v2897_v30 }
 0x721   : >> { %5715 = vpow2.f32 %v2442_v25  ;;  %v3704_v29 = vpop.permute.xlu1 %3703  ;;  %4983 = vmatmul.mubr.msk.bf16.gmra.mrb[92].mxu1 %vm1387_vm2, %v2897_v30 }
 0x722   : >> { %5446 = vmatprep.subr.msk.bf16.mxu1 %vm1387_vm2, %v3704_v29 }
 0x723   : >> { %5073 = vmatpush3.bf16.xpose.msra.mxu1 %v3751_v7 }
 0x728   : >> { %v5710_v46 = vpop.eup %5709 }
 0x729   : >> { %v5712_v0 = vpop.eup %5711 }
 0x72a   : >> { %v5714_v18 = vpop.eup %5713  ;;  %v2492_v11 = vadd.f32 %v5712_v0, %v5710_v46 }
 0x72b   : >> { %v5716_v20 = vpop.eup %5715  ;;  %v2524_v60 = vpack.c.bf16 %v5714_v18, %v5710_v46 }
 0x72c   : >> { %v2525_v61 = vpack.c.bf16 %v5716_v20, %v5712_v0  ;;  %v2495_v53 = vadd.f32 %v5716_v20, %v5714_v18 }
 0x72e   : >> { %2660 = vmatprep.mubr.bf16.mxu0 %v2525_v61 }
 0x72f   : >> { %2661 = vmatmul.mubr.bf16.gmra.mrb[80].mxu0 %v2524_v60 }
 0x739   : >> { %2469 = vadd.xlane.f32.xlu0 %v7798_v24 }
 0x73b   : >> { %2472 = vadd.xlane.f32.xlu1 %v7810_v6 }
 0x73d   : >> { %2475 = vadd.xlane.f32.xlu0 %v7820_v9 }
 0x73f   : >> { %2481 = vadd.xlane.f32.xlu1 %v7926_v48 }
 0x741   : >> { %2478 = vadd.xlane.f32.xlu0 %v7830_v57 }
 0x743   : >> { %2487 = vadd.xlane.f32.xlu1 %v2486_v13 }
 0x745   : >> { %2484 = vadd.xlane.f32.xlu0 %v7936_v59 }
 0x747   : >> { %2493 = vadd.xlane.f32.xlu1 %v2492_v11 }
 0x749   : >> { %2490 = vadd.xlane.f32.xlu0 %v2489_v45  ;;  %v4655_v45 = vcombine.low %v9134_v14, %v9133_v31 }
 0x74d   : >> { %2496 = vadd.xlane.f32.xlu0 %v2495_v53 }
 0x750   : >> { %v2356_v34 = vpop.xlane.xlu0 %2355 }
 0x751   : >> { %v2392_v35 = vsub.f32 %v9115_v58, %v2356_v34  ;;  %v2393_v50 = vsub.f32 %v9116_v22, %v2356_v34  ;;  %v9131_v58 = vld [vmem:[#allocation23_spill] sm:$0xff] }
 0x752   : >> { %v2359_v24 = vpop.xlane.xlu1 %2358  ;;  %v4654_v22 = vcombine.low %v9132_v17, %v9131_v58  ;;  %v9136_v17 = vld [vmem:[#allocation107_spill] sm:$0xff] }
 0x753   : >> { %v2444_v26 = vmul.f32 1.442695, %v2392_v35  ;;  %v2446_v6 = vmul.f32 1.442695, %v2393_v50  ;;  %v2394_v9 = vsub.f32 %v7654_v52, %v2359_v24  ;;  %v2395_v48 = vsub.f32 %v7656_v56, %v2359_v24 }
 0x754   : >> { %v3658_v8 = vpop.permute.xlu0 %3657  ;;  %5251 = vmatprep.subr.bf16.mxu0 %v4654_v22 }
 0x755   : >> { %5717 = vpow2.f32 %v2444_v26  ;;  %v2448_v57 = vmul.f32 1.442695, %v2394_v9  ;;  %v2450_v15 = vmul.f32 1.442695, %v2395_v48  ;;  %5074 = vmatprep.mubr.msk.bf16.mxu1 %vm1387_vm2, %v3658_v8  ;;  %5252 = vmatpush3.bf16.msra.mxu0 %v4654_v22  ;;  %v9137_v22 = vmax.f32 %v7706_v54, %v9136_v17 }
 0x756   : >> { %5719 = vpow2.f32 %v2446_v6  ;;  %v2362_v59 = vpop.xlane.xlu1 %2361  ;;  %5075 = vmatmul.mubr.msk.bf16.vlgmr.msra.gmra.mrb[96].mxu1 %vm1387_vm2, %v3658_v8  ;;  %5253 = vmatprep.subr.bf16.mxu0 %v4655_v45 }
 0x757   : >> { %5721 = vpow2.f32 %v2448_v57  ;;  %v2396_v39 = vsub.f32 %v7666_v27, %v2362_v59  ;;  %v2397_v52 = vsub.f32 %v7668_v36, %v2362_v59 }
 0x758   : >> { %5723 = vpow2.f32 %v2450_v15 }
 0x759   : >> { %v2452_v56 = vmul.f32 1.442695, %v2396_v39  ;;  %v2454_v13 = vmul.f32 1.442695, %v2397_v52  ;;  %5254 = vmatpush3.bf16.msra.mxu0 %v4655_v45  ;;  %v9138_v52 = vld [vmem:[#allocation65_spill] sm:$0xff] }
 0x75a   : >> { %v2365_v4 = vpop.xlane.xlu1 %2364 }
 0x75b   : >> { %5725 = vpow2.f32 %v2452_v56  ;;  %v2398_v1 = vsub.f32 %v7673_v55, %v2365_v4  ;;  %v2399_v44 = vsub.f32 %v7675_v3, %v2365_v4  ;;  %v9139_v56 = vld [vmem:[#allocation69_spill] sm:$0xff] }
 0x75c   : >> { %5727 = vpow2.f32 %v2454_v13  ;;  %v9140_v13 = vld [vmem:[#allocation60_spill] sm:$0xff] }
 0x75d   : >> { %v2456_v40 = vmul.f32 1.442695, %v2398_v1  ;;  %v2458_v27 = vmul.f32 1.442695, %v2399_v44 }
 0x75e   : >> { %v3660_v36 = vpop.permute.xlu1 %3659 }
 0x75f   : >> { %v5718_v33 = vpop.eup %5717  ;;  %5729 = vpow2.f32 %v2456_v40  ;;  %5076 = vmatprep.mubr.msk.bf16.mxu1 %vm1387_vm2, %v3660_v36  ;;  %v9141_v40 = vld [vmem:[#allocation56_spill] sm:$0xff] }
 0x760   : >> { %v5720_v16 = vpop.eup %5719  ;;  %5731 = vpow2.f32 %v2458_v27  ;;  %5077 = vmatmul.mubr.msk.bf16.gmra.mrb[100].mxu1 %vm1387_vm2, %v3660_v36 }
 0x761   : >> { %v5722_v32 = vpop.eup %5721  ;;  %v2498_v63 = vadd.f32 %v5720_v16, %v5718_v33 }
 0x762   : >> { %v5724_v28 = vpop.eup %5723  ;;  %v2526_v55 = vpack.c.bf16 %v5722_v32, %v5718_v33 }
 0x763   : >> { %2499 = vadd.xlane.f32.xlu1 %v2498_v63  ;;  %v2501_v3 = vadd.f32 %v5724_v28, %v5722_v32  ;;  %v2527_v43 = vpack.c.bf16 %v5724_v28, %v5720_v16 }
 0x765   : >> { %v5726_v5 = vpop.eup %5725  ;;  %2502 = vadd.xlane.f32.xlu0 %v2501_v3  ;;  %2668 = vmatprep.mubr.bf16.mxu0 %v2527_v43 }
 0x766   : >> { %v5728_v10 = vpop.eup %5727  ;;  %2669 = vmatmul.mubr.bf16.gmra.mrb[84].mxu0 %v2526_v55 }
 0x767   : >> { %v2504_v49 = vadd.f32 %v5728_v10, %v5726_v5 }
 0x769   : >> { %v5730_v51 = vpop.eup %5729  ;;  %2505 = vadd.xlane.f32.xlu1 %v2504_v49 }
 0x76a   : >> { %v5732_v37 = vpop.eup %5731  ;;  %v2528_v41 = vpack.c.bf16 %v5730_v51, %v5726_v5 }
 0x76b   : >> { %v2507_v47 = vadd.f32 %v5732_v37, %v5730_v51  ;;  %v2529_v23 = vpack.c.bf16 %v5732_v37, %v5728_v10 }
 0x76d   : >> { %2508 = vadd.xlane.f32.xlu0 %v2507_v47  ;;  %2676 = vmatprep.mubr.bf16.mxu0 %v2529_v23 }
 0x76e   : >> { %2677 = vmatmul.mubr.bf16.gmra.mrb[88].mxu0 %v2528_v41 }
 0x778   : >> { %v8030_v42 = vpop.f32.mrb[84].mxu1 }
 0x779   : >> { %v8032_v25 = vpop.f32.mrb[85].mxu1 }
 0x77a   : >> { %v8036_v29 = vpop.f32.mrb[86].mxu1 }
 0x77b   : >> { %v8038_v7 = vpop.f32.mrb[87].mxu1 }
 0x785   : >> { %v2368_v0 = vpop.xlane.xlu0 %2367 }
 0x786   : >> { %v2400_v18 = vsub.f32 %v7684_v62, %v2368_v0  ;;  %v2401_v11 = vsub.f32 %v7686_v2, %v2368_v0 }
 0x788   : >> { %v2460_v20 = vmul.f32 1.442695, %v2400_v18  ;;  %v2462_v60 = vmul.f32 1.442695, %v2401_v11 }
 0x789   : >> { %v3662_v61 = vpop.permute.xlu0 %3661 }
 0x78a   : >> { %5733 = vpow2.f32 %v2460_v20  ;;  %5078 = vmatprep.mubr.msk.bf16.mxu1 %vm1387_vm2, %v3662_v61 }
 0x78b   : >> { %5735 = vpow2.f32 %v2462_v60  ;;  %5079 = vmatmul.mubr.msk.bf16.gmra.mrb[104].mxu1 %vm1387_vm2, %v3662_v61 }
 0x78d   : >> { %v3666_v6 = vpop.permute.xlu0 %3665 }
 0x78f   : >> { %v2371_v53 = vpop.xlane.xlu1 %2370 }
 0x790   : >> { %v2402_v34 = vsub.f32 %v7690_v19, %v2371_v53  ;;  %v2403_v35 = vsub.f32 %v7692_v38, %v2371_v53  ;;  %v9135_v19 = vmax.f32 %v7700_v21, %v7702_v12 }
 0x791   : >> { %v3668_v38 = vpop.permute.xlu0 %3667 }
 0x792   : >> { %v2464_v50 = vmul.f32 1.442695, %v2402_v34  ;;  %v2466_v24 = vmul.f32 1.442695, %v2403_v35 }
 0x793   : >> { %v3664_v26 = vpop.permute.xlu1 %3663 }
 0x794   : >> { %v5734_v62 = vpop.eup %5733  ;;  %5737 = vpow2.f32 %v2464_v50  ;;  %5080 = vmatprep.mubr.msk.bf16.mxu1 %vm1387_vm2, %v3664_v26 }
 0x795   : >> { %v5736_v2 = vpop.eup %5735  ;;  %5739 = vpow2.f32 %v2466_v24  ;;  %5081 = vmatmul.mubr.msk.bf16.gmra.mrb[108].mxu1 %vm1387_vm2, %v3664_v26  ;;  %v3670_v58 = vpop.permute.xlu0 %3669 }
 0x796   : >> { %5082 = vmatprep.mubr.msk.bf16.mxu1 %vm1387_vm2, %v3666_v6  ;;  %v2510_v9 = vadd.f32 %v5736_v2, %v5734_v62 }
 0x797   : >> { %v3672_v39 = vpop.permute.xlu1 %3671 }
 0x798   : >> { %2511 = vadd.xlane.f32.xlu1 %v2510_v9  ;;  %v9142_v9 = vld [vmem:[#allocation110_spill] sm:$0xff] }
 0x79c   : >> { %3116 = vmax.xlane.f32.xlu1 %v9135_v19  ;;  %v9143_v19 = vld [vmem:[#allocation111_spill] sm:$0xff] }
 0x79d   : >> { %5083 = vmatmul.mubr.msk.bf16.gmra.mrb[112].mxu1 %vm1387_vm2, %v3666_v6 }
 0x79e   : >> { %v5738_v48 = vpop.eup %5737  ;;  %5084 = vmatprep.mubr.msk.bf16.mxu1 %vm1387_vm2, %v3668_v38 }
 0x79f   : >> { %v5740_v8 = vpop.eup %5739  ;;  %v2530_v57 = vpack.c.bf16 %v5738_v48, %v5734_v62 }
 0x7a0   : >> { %v2513_v15 = vadd.f32 %v5740_v8, %v5738_v48  ;;  %v2531_v59 = vpack.c.bf16 %v5740_v8, %v5736_v2 }
 0x7a2   : >> { %2514 = vadd.xlane.f32.xlu0 %v2513_v15  ;;  %2684 = vmatprep.mubr.bf16.mxu0 %v2531_v59 }
 0x7a3   : >> { %2685 = vmatmul.mubr.bf16.gmra.mrb[92].mxu0 %v2530_v57 }
 0x7a5   : >> { %5085 = vmatmul.mubr.msk.bf16.gmra.mrb[116].mxu1 %vm1387_vm2, %v3668_v38  ;;  %v9144_v38 = vmax.f32 %v9142_v9, %v9143_v19 }
 0x7a6   : >> { %3119 = vmax.xlane.f32.xlu0 %v9137_v22  ;;  %5086 = vmatprep.mubr.msk.bf16.mxu1 %vm1387_vm2, %v3670_v58  ;;  %v9145_v22 = vld [vmem:[#allocation108_spill] sm:$0xff] }
 0x7ad   : >> { %3339 = vrot.lane.b32.xlu1 %v9138_v52, %s6221_s23  ;;  %5087 = vmatmul.mubr.msk.bf16.gmra.mrb[120].mxu1 %vm1387_vm2, %v3670_v58 }
 0x7ae   : >> { %5088 = vmatprep.mubr.msk.bf16.mxu1 %vm1387_vm2, %v3672_v39 }
 0x7b1   : >> { %3341 = vrot.lane.b32.xlu1 %v9139_v56, %s6221_s23 }
 0x7b5   : >> { %3325 = vrot.lane.b32.xlu1 %v9140_v13, %s6221_s23  ;;  %5089 = vmatmul.mubr.msk.bf16.gmra.mrb[124].mxu1 %vm1387_vm2, %v3672_v39  ;;  %v9146_v39 = vld [vmem:[#allocation109_spill] sm:$0xff] }
 0x7b7   : >> { %v8070_v4 = vpop.f32.mrb[88].mxu1 }
 0x7b8   : >> { %v8072_v31 = vpop.f32.mrb[89].mxu1 }
 0x7b9   : >> { %v8076_v45 = vpop.f32.mrb[90].mxu1 }
 0x7ba   : >> { %v8078_v1 = vpop.f32.mrb[91].mxu1 }
 0x7bc   : >> { %3323 = vrot.lane.b32.xlu0 %v9141_v40, %s6221_s23 }
 0x7c1   : >> { %v4894_v27 = vpop.f32.mrb[64].mxu0 }
 0x7c2   : >> { %v4895_v36 = vpop.f32.mrb[65].mxu0 }
 0x7c3   : >> { %v4896_v33 = vadd.f32 %v4895_v36, %v4894_v27  ;;  %v4897_v16 = vpop.f32.mrb[66].mxu0  ;;  %v9147_v27 = vmax.f32 %v9145_v22, %v9146_v39 }
 0x7c4   : >> { %v4898_v32 = vpop.f32.mrb[67].mxu0 }
 0x7c5   : >> { %v4899_v63 = vadd.f32 %v4898_v32, %v4897_v16 }
 0x7c6   : >> { %v2470_v28 = vpop.xlane.xlu0 %2469 }
 0x7c7   : >> { %5741 = vrcp.f32 %v2470_v28 }
 0x7c8   : >> { %v2473_v55 = vpop.xlane.xlu1 %2472 }
 0x7c9   : >> { %5743 = vrcp.f32 %v2473_v55  ;;  %v4900_v3 = vpop.f32.mrb[68].mxu0 }
 0x7ca   : >> { %v4901_v43 = vpop.f32.mrb[69].mxu0  ;;  %v2476_v5 = vpop.xlane.xlu0 %2475 }
 0x7cb   : >> { %v4902_v10 = vadd.f32 %v4901_v43, %v4900_v3  ;;  %v4903_v49 = vpop.f32.mrb[70].mxu0  ;;  %5745 = vrcp.f32 %v2476_v5 }
 0x7cc   : >> { %v2482_v51 = vpop.xlane.xlu1 %2481  ;;  %v4904_v37 = vpop.f32.mrb[71].mxu0 }
 0x7cd   : >> { %v4905_v41 = vadd.f32 %v4904_v37, %v4903_v49  ;;  %v9148_v37 = vld [vmem:[#allocation64_spill] sm:$0xff] }
 0x7ce   : >> { %v2479_v47 = vpop.xlane.xlu0 %2478 }
 0x7cf   : >> { %5747 = vrcp.f32 %v2479_v47  ;;  %v9150_v47 = vld [vmem:[#allocation73_spill] sm:$0xff] }
 0x7d0   : >> { %5749 = vrcp.f32 %v2482_v51  ;;  %v2488_v0 = vpop.xlane.xlu1 %2487 }
 0x7d1   : >> { %v5742_v23 = vpop.eup %5741  ;;  %v4906_v18 = vpop.f32.mrb[72].mxu0 }
 0x7d2   : >> { %v4907_v11 = vpop.f32.mrb[73].mxu0  ;;  %v2485_v20 = vpop.xlane.xlu0 %2484  ;;  %v2709_v35 = vmul.f32 %v5742_v23, %v4896_v33 }
 0x7d3   : >> { %v5744_v60 = vpop.eup %5743  ;;  %v4908_v61 = vadd.f32 %v4907_v11, %v4906_v18  ;;  %5751 = vrcp.f32 %v2485_v20  ;;  %v4909_v53 = vpop.f32.mrb[74].mxu0 }
 0x7d4   : >> { %v4910_v34 = vpop.f32.mrb[75].mxu0  ;;  %v2710_v50 = vmul.f32 %v5744_v60, %v4899_v63  ;;  %5753 = vrcp.f32 %v2488_v0  ;;  %v9152_v0 = vld [vmem:[#allocation77_spill] sm:$0xff] }
 0x7d5   : >> { %v4911_v24 = vadd.f32 %v4910_v34, %v4909_v53  ;;  %v5746_v2 = vpop.eup %5745  ;;  %v2494_v53 = vpop.xlane.xlu1 %2493 }
 0x7d6   : >> { %v2491_v26 = vpop.xlane.xlu0 %2490  ;;  %v2725_v62 = vpack.c.bf16 %v2710_v50, %v2709_v35  ;;  %v2711_v8 = vmul.f32 %v5746_v2, %v4902_v10 }
 0x7d7   : >> { %5755 = vrcp.f32 %v2491_v26 }
 0x7d8   : >> { %5255 = vmatprep.mubr.msk.bf16.mxu0 %vm1387_vm2, %v2725_v62  ;;  %5757 = vrcp.f32 %v2494_v53 }
 0x7d9   : >> { %v5748_v6 = vpop.eup %5747  ;;  %3125 = vmax.xlane.f32.xlu1 %v9144_v38  ;;  %v4912_v48 = vpop.f32.mrb[76].mxu0 }
 0x7da   : >> { %v2712_v57 = vmul.f32 %v5748_v6, %v4905_v41  ;;  %v4913_v15 = vpop.f32.mrb[77].mxu0  ;;  %v5750_v59 = vpop.eup %5749  ;;  %v9149_v41 = vld [vmem:[#allocation68_spill] sm:$0xff] }
 0x7db   : >> { %v4914_v58 = vadd.f32 %v4913_v15, %v4912_v48  ;;  %3122 = vmax.xlane.f32.xlu0 %v9147_v27  ;;  %v4915_v36 = vpop.f32.mrb[78].mxu0  ;;  %v2713_v28 = vmul.f32 %v5750_v59, %v4908_v61  ;;  %v2497_v34 = vpop.xlane.xlu0 %2496  ;;  %v9156_v15 = vld [vmem:[#allocation114_spill] sm:$0xff]  ;;  %v9157_v59 = vld [vmem:[#allocation115_spill] sm:$0xff]  ;;  %v9159_v27 = vld [vmem:[#allocation112_spill] sm:$0xff] }
 0x7dc   : >> { %v2726_v33 = vpack.c.bf16 %v2712_v57, %v2711_v8  ;;  %v4916_v16 = vpop.f32.mrb[79].mxu0  ;;  %5759 = vrcp.f32 %v2497_v34 }
 0x7dd   : >> { %v5752_v32 = vpop.eup %5751  ;;  %v4917_v63 = vadd.f32 %v4916_v16, %v4915_v36  ;;  %v9160_v36 = vld [vmem:[#allocation113_spill] sm:$0xff] }
 0x7de   : >> { %v2714_v55 = vmul.f32 %v5752_v32, %v4911_v24  ;;  %5256 = vmatmul.mubr.msk.bf16.vlgmr.msra.gmra.mrb[48].mxu0 %vm1387_vm2, %v2726_v33  ;;  %v5754_v3 = vpop.eup %5753  ;;  %v9161_v33 = vmax.f32 %v9159_v27, %v9160_v36 }
 0x7df   : >> { %v2715_v10 = vmul.f32 %v5754_v3, %v4914_v58  ;;  %v9158_v58 = vmax.f32 %v9156_v15, %v9157_v59  ;;  %v9163_v3 = vld [vmem:[#allocation76_spill] sm:$0xff] }
 0x7e0   : >> { %v2727_v43 = vpack.c.bf16 %v2714_v55, %v2713_v28 }
 0x7e1   : >> { %v5756_v5 = vpop.eup %5755 }
 0x7e2   : >> { %v2716_v49 = vmul.f32 %v5756_v5, %v4917_v63  ;;  %5259 = vmatprep.mubr.msk.bf16.mxu0 %vm1387_vm2, %v2727_v43  ;;  %v5758_v2 = vpop.eup %5757  ;;  %v9162_v63 = vld [vmem:[#allocation72_spill] sm:$0xff] }
 0x7e4   : >> { %v2728_v51 = vpack.c.bf16 %v2716_v49, %v2715_v10 }
 0x7e6   : >> { %5260 = vmatmul.mubr.msk.bf16.gmra.mrb[52].mxu0 %vm1387_vm2, %v2728_v51  ;;  %v5760_v38 = vpop.eup %5759  ;;  %v9164_v51 = vld [vmem:[#allocation79_spill] sm:$0xff] }
 0x7ea   : >> { %3327 = vrot.lane.b32.xlu1 %v9148_v37, %s6221_s23 }
 0x7ee   : >> { %3329 = vrot.lane.b32.xlu1 %v9149_v41, %s6221_s23 }
 0x7f0   : >> { %v2500_v16 = vpop.xlane.xlu1 %2499 }
 0x7f1   : >> { %3343 = vrot.lane.b32.xlu0 %v9150_v47, %s6221_s23 }
 0x7f2   : >> { %v2503_v55 = vpop.xlane.xlu0 %2502 }
 0x7f4   : >> { %v8100_v23 = vpop.f32.mrb[92].mxu1 }
 0x7f5   : >> { %9151 = vst [vmem:[#allocation90_spill] sm:$0xff] %v8100_v23  ;;  %3345 = vrot.lane.b32.xlu0 %v9152_v0, %s6221_s23  ;;  %v8104_v18 = vpop.f32.mrb[93].mxu1 }
 0x7f6   : >> { %9153 = vst [vmem:[#allocation99_spill] sm:$0xff] %v8104_v18  ;;  %v8108_v20 = vpop.f32.mrb[94].mxu1  ;;  %v2506_v32 = vpop.xlane.xlu1 %2505 }
 0x7f7   : >> { %9154 = vst [vmem:[#allocation101_spill] sm:$0xff] %v8108_v20  ;;  %v8110_v60 = vpop.f32.mrb[95].mxu1  ;;  %v9194_v20 = vld [vmem:[#allocation123_spill] sm:$0xff] }
 0x7f8   : >> { %9155 = vst [vmem:[#allocation93_spill] sm:$0xff] %v8110_v60 }
 0x7fa   : >> { %v2509_v34 = vpop.xlane.xlu0 %2508 }
 0x802   : >> { %v4918_v35 = vpop.f32.mrb[80].mxu0 }
 0x803   : >> { %v4919_v50 = vpop.f32.mrb[81].mxu0 }
 0x804   : >> { %v4920_v24 = vadd.f32 %v4919_v50, %v4918_v35  ;;  %v4921_v26 = vpop.f32.mrb[82].mxu0 }
 0x805   : >> { %v4922_v62 = vpop.f32.mrb[83].mxu0 }
 0x806   : >> { %v4923_v6 = vadd.f32 %v4922_v62, %v4921_v26  ;;  %v2717_v48 = vmul.f32 %v5758_v2, %v4920_v24 }
 0x808   : >> { %v2718_v8 = vmul.f32 %v5760_v38, %v4923_v6 }
 0x80a   : >> { %v2729_v57 = vpack.c.bf16 %v2718_v8, %v2717_v48 }
 0x80c   : >> { %5263 = vmatprep.mubr.msk.bf16.mxu0 %vm1387_vm2, %v2729_v57 }
 0x812   : >> { %3131 = vmax.xlane.f32.xlu1 %v9158_v58 }
 0x814   : >> { %3128 = vmax.xlane.f32.xlu0 %v9161_v33 }
 0x823   : >> { %3331 = vrot.lane.b32.xlu1 %v9162_v63, %s6221_s23 }
 0x825   : >> { %v8123_v28 = vpop.xlane.xlu1 %2511 }
 0x827   : >> { %3333 = vrot.lane.b32.xlu1 %v9163_v3, %s6221_s23 }
 0x829   : >> { %v3117_v43 = vpop.xlane.xlu1 %3116  ;;  %v8127_v5 = vpop.f32.mrb[96].mxu1 }
 0x82a   : >> { %v3163_v10 = vsub.f32 %v7700_v21, %v3117_v43  ;;  %v3164_v49 = vsub.f32 %v7702_v12, %v3117_v43  ;;  %3347 = vrot.lane.b32.xlu0 %v9164_v51, %s6221_s23  ;;  %v8133_v53 = vpop.f32.mrb[97].mxu1  ;;  %v9165_v12 = vld [vmem:[#allocation81_spill] sm:$0xff] }
 0x82b   : >> { %v8137_v50 = vpop.f32.mrb[98].mxu1 }
 0x82c   : >> { %v3195_v24 = vmul.f32 1.442695, %v3163_v10  ;;  %v3197_v26 = vmul.f32 1.442695, %v3164_v49  ;;  %v8139_v62 = vpop.f32.mrb[99].mxu1 }
 0x82d   : >> { %v3340_v2 = vpop.permute.xlu1 %3339 }
 0x82e   : >> { %5761 = vpow2.f32 %v3195_v24  ;;  %3349 = vrot.lane.b32.xlu0 %v9165_v12, %s6221_s23  ;;  %4984 = vmatprep.subr.bf16.mxu0 %v3340_v2 }
 0x82f   : >> { %5763 = vpow2.f32 %v3197_v26  ;;  %v8145_v6 = vpop.xlane.xlu0 %2514 }
 0x830   : >> { %5765 = vrcp.f32 %v2500_v16 }
 0x831   : >> { %5767 = vrcp.f32 %v2503_v55  ;;  %v3342_v33 = vpop.permute.xlu1 %3341 }
 0x833   : >> { %v3120_v38 = vpop.xlane.xlu0 %3119  ;;  %v8147_v48 = vpop.f32.mrb[100].mxu1 }
 0x834   : >> { %v3165_v8 = vsub.f32 %v7706_v54, %v3120_v38  ;;  %v3166_v57 = vsub.f32 %v9136_v17, %v3120_v38  ;;  %v8151_v58 = vpop.f32.mrb[101].mxu1 }
 0x835   : >> { %v8155_v10 = vpop.f32.mrb[102].mxu1 }
 0x836   : >> { %v3199_v49 = vmul.f32 1.442695, %v3165_v8  ;;  %v3201_v24 = vmul.f32 1.442695, %v3166_v57  ;;  %v8157_v26 = vpop.f32.mrb[103].mxu1  ;;  %v3326_v57 = vpop.permute.xlu1 %3325 }
 0x837   : >> { %v3324_v55 = vpop.permute.xlu0 %3323 }
 0x838   : >> { %v8161_v2 = vpop.eup %5761  ;;  %5769 = vpow2.f32 %v3199_v49  ;;  %4985 = vmatpush3.bf16.msra.mxu0 %v3324_v55 }
 0x839   : >> { %v8163_v54 = vpop.eup %5763  ;;  %5771 = vpow2.f32 %v3201_v24  ;;  %v4924_v17 = vpop.f32.mrb[84].mxu0  ;;  %4986 = vmatprep.subr.bf16.mxu0 %v3342_v33 }
 0x83a   : >> { %v4925_v38 = vpop.f32.mrb[85].mxu0  ;;  %v8167_v8 = vadd.f32 %v8163_v54, %v8161_v2  ;;  %5773 = vrcp.f32 %v2506_v32  ;;  %v5766_v44 = vpop.eup %5765 }
 0x83b   : >> { %v4926_v11 = vadd.f32 %v4925_v38, %v4924_v17  ;;  %v4927_v61 = vpop.f32.mrb[86].mxu0  ;;  %5775 = vrcp.f32 %v2509_v34  ;;  %v5768_v55 = vpop.eup %5767 }
 0x83c   : >> { %9166 = vst [vmem:[#allocation100_spill] sm:$0xff] %v8167_v8  ;;  %v4928_v14 = vpop.f32.mrb[87].mxu0  ;;  %4987 = vmatpush3.bf16.msra.mxu0 %v3326_v57  ;;  %v9169_v57 = vld [vmem:[#allocation119_spill] sm:$0xff] }
 0x83d   : >> { %v4929_v49 = vadd.f32 %v4928_v14, %v4927_v61  ;;  %v2719_v16 = vmul.f32 %v5766_v44, %v4926_v11  ;;  %v9174_v14 = vld [vmem:[#allocation57_spill] sm:$0xff] }
 0x83f   : >> { %v2720_v43 = vmul.f32 %v5768_v55, %v4929_v49  ;;  %v9171_v55 = vld [vmem:[#allocation116_spill] sm:$0xff] }
 0x841   : >> { %v2730_v24 = vpack.c.bf16 %v2720_v43, %v2719_v16  ;;  %v4930_v30 = vpop.f32.mrb[88].mxu0 }
 0x842   : >> { %v8169_v33 = vpop.eup %5769  ;;  %v4931_v46 = vpop.f32.mrb[89].mxu0 }
 0x843   : >> { %v8171_v21 = vpop.eup %5771  ;;  %v4932_v35 = vadd.f32 %v4931_v46, %v4930_v30  ;;  %v4933_v32 = vpop.f32.mrb[90].mxu0  ;;  %5264 = vmatmul.mubr.msk.bf16.gmra.mrb[56].mxu0 %vm1387_vm2, %v2730_v24  ;;  %v9168_v46 = vld [vmem:[#allocation118_spill] sm:$0xff]  ;;  %v9172_v24 = vld [vmem:[#allocation117_spill] sm:$0xff] }
 0x844   : >> { %v4934_v17 = vpop.f32.mrb[91].mxu0  ;;  %v8180_v44 = vadd.f32 %v8171_v21, %v8169_v33  ;;  %v5774_v11 = vpop.eup %5773  ;;  %v9170_v49 = vmax.f32 %v9168_v46, %v9169_v57  ;;  %v9173_v34 = vmax.f32 %v9171_v55, %v9172_v24 }
 0x845   : >> { %v4935_v61 = vadd.f32 %v4934_v17, %v4933_v32  ;;  %v5776_v43 = vpop.eup %5775  ;;  %v2721_v16 = vmul.f32 %v5774_v11, %v4932_v35  ;;  %v9175_v35 = vld [vmem:[#allocation61_spill] sm:$0xff] }
 0x846   : >> { %9167 = vst [vmem:[#allocation94_spill] sm:$0xff] %v8180_v44 }
 0x847   : >> { %v2722_v38 = vmul.f32 %v5776_v43, %v4935_v61  ;;  %v9176_v43 = vld [vmem:[#allocation83_spill] sm:$0xff] }
 0x849   : >> { %v2731_v30 = vpack.c.bf16 %v2722_v38, %v2721_v16 }
 0x84b   : >> { %3137 = vmax.xlane.f32.xlu1 %v9170_v49  ;;  %5267 = vmatprep.mubr.msk.bf16.mxu0 %vm1387_vm2, %v2731_v30  ;;  %v9177_v49 = vld [vmem:[#allocation85_spill] sm:$0xff] }
 0x84d   : >> { %3134 = vmax.xlane.f32.xlu0 %v9173_v34 }
 0x85c   : >> { %3335 = vrot.lane.b32.xlu1 %v9174_v14, %s6221_s23 }
 0x85e   : >> { %v8191_v44 = vpop.f32.mrb[104].mxu1 }
 0x85f   : >> { %v8193_v32 = vpop.f32.mrb[105].mxu1 }
 0x860   : >> { %3337 = vrot.lane.b32.xlu1 %v9175_v35, %s6221_s23  ;;  %v8199_v11 = vpop.f32.mrb[106].mxu1 }
 0x861   : >> { %v8201_v61 = vpop.f32.mrb[107].mxu1 }
 0x863   : >> { %3351 = vrot.lane.b32.xlu0 %v9176_v43, %s6221_s23 }
 0x866   : >> { %v3126_v16 = vpop.xlane.xlu1 %3125 }
 0x867   : >> { %v3169_v38 = vsub.f32 %v9142_v9, %v3126_v16  ;;  %v3170_v30 = vsub.f32 %v9143_v19, %v3126_v16  ;;  %3353 = vrot.lane.b32.xlu0 %v9177_v49, %s6221_s23  ;;  %s6123_s23 = scalar_lea.vmem (%p1144_p3), %s8691_s26, 4096 }
 0x868   : >> { %v3123_v8 = vpop.xlane.xlu0 %3122  ;;  %v8211_v17 = vpop.f32.mrb[108].mxu1  ;;  %p6124_p5 = scmp.ne.s32.totalorder (%p1144_p3), %s8691_s26, %s6123_s23  ;;  %p6131_p2 = scmp.lt.s32.totalorder (%p1144_p3), %s6129_s17, %s6123_s23 }
 0x869   : >> { %9178 = vst [vmem:[#allocation95_spill] sm:$0xff] %v8211_v17  ;;  %v3207_v14 = vmul.f32 1.442695, %v3169_v38  ;;  %v3209_v35 = vmul.f32 1.442695, %v3170_v30  ;;  %v3167_v18 = vsub.f32 %v9145_v22, %v3123_v8  ;;  %v3168_v34 = vsub.f32 %v9146_v39, %v3123_v8  ;;  %v8215_v23 = vpop.f32.mrb[109].mxu1 }
 0x86a   : >> { %9179 = vst [vmem:[#allocation102_spill] sm:$0xff] %v8215_v23  ;;  %v8219_v9 = vpop.f32.mrb[110].mxu1  ;;  %v3328_v49 = vpop.permute.xlu1 %3327  ;;  %p6125_p7 = pnand (%p1144_p3), %p6124_p5, %p6446_p10  ;;  %p6132_p13 = por (%p1144_p3), %p6131_p2, %p6130_p1 }
 0x86b   : >> { %9180 = vst [vmem:[#allocation97_spill] sm:$0xff] %v8219_v9  ;;  %5777 = vpow2.f32 %v3207_v14  ;;  %v3203_v19 = vmul.f32 1.442695, %v3167_v18  ;;  %v3205_v16 = vmul.f32 1.442695, %v3168_v34  ;;  %v8221_v60 = vpop.f32.mrb[111].mxu1 }
 0x86c   : >> { %9181 = vst [vmem:[#allocation96_spill] sm:$0xff] %v8221_v60  ;;  %5779 = vpow2.f32 %v3209_v35  ;;  %v3344_v22 = vpop.permute.xlu0 %3343  ;;  %p6126_p12 = pneg (%p1144_p3), %p6125_p7 }
 0x86d   : >> { %5781 = vpow2.f32 %v3203_v19  ;;  %4988 = vmatprep.subr.bf16.mxu0 %v3344_v22 }
 0x86e   : >> { %5783 = vpow2.f32 %v3205_v16  ;;  %4989 = vmatpush3.bf16.msra.mxu0 %v3328_v49  ;;  %v3330_v18 = vpop.permute.xlu1 %3329  ;;  %p6133_p9 = pnand (%p1144_p3), %p6132_p13, %p6126_p12 }
 0x86f   : >> { %5785 = vrcp.f32 %v8123_v28 }
 0x870   : >> { %v3346_v39 = vpop.permute.xlu0 %3345  ;;  %v8226_v8 = vpop.f32.mrb[112].mxu1  ;;  %5787 = vrcp.f32 %v8145_v6 }
 0x871   : >> { %9182 = vst [vmem:[#allocation103_spill] sm:$0xff] %v8226_v8  ;;  %4990 = vmatprep.subr.bf16.mxu0 %v3346_v39  ;;  %v8229_v14 = vpop.f32.mrb[113].mxu1 }
 0x872   : >> { %9183 = vst [vmem:[#allocation104_spill] sm:$0xff] %v8229_v14  ;;  %4991 = vmatpush3.bf16.msra.mxu0 %v3330_v18  ;;  %v8233_v34 = vpop.f32.mrb[114].mxu1 }
 0x873   : >> { %9184 = vst [vmem:[#allocation98_spill] sm:$0xff] %v8233_v34  ;;  %v8235_v30 = vpop.f32.mrb[115].mxu1 }
 0x874   : >> { %9185 = vst [vmem:[#allocation92_spill] sm:$0xff] %v8235_v30 }
 0x875   : >> { %v8239_v49 = vpop.eup %5777 }
 0x876   : >> { %v8241_v19 = vpop.eup %5779  ;;  %v4936_v6 = vpop.f32.mrb[92].mxu0 }
 0x877   : >> { %v8243_v16 = vpop.eup %5781  ;;  %v4937_v22 = vpop.f32.mrb[93].mxu0  ;;  %v8247_v39 = vadd.f32 %v8241_v19, %v8239_v49 }
 0x878   : >> { %v8249_v18 = vpop.eup %5783  ;;  %v4938_v35 = vadd.f32 %v4937_v22, %v4936_v6  ;;  %v4939_v38 = vpop.f32.mrb[94].mxu0  ;;  %v9197_v6 = vld [vmem:[#allocation121_spill] sm:$0xff] }
 0x879   : >> { %9186 = vst [vmem:[#allocation105_spill] sm:$0xff] %v8247_v39  ;;  %v8251_v43 = vpop.f32.mrb[116].mxu1  ;;  %v5786_v14 = vpop.eup %5785  ;;  %v8261_v60 = vadd.f32 %v8249_v18, %v8243_v16 }
 0x87a   : >> { %v4940_v8 = vpop.f32.mrb[95].mxu0  ;;  %v8255_v30 = vpop.f32.mrb[117].mxu1  ;;  %v2723_v39 = vmul.f32 %v5786_v14, %v4938_v35  ;;  %v9200_v14 = vmax.f32 %v8127_v5, %v8133_v53 }
 0x87b   : >> { %9187 = vst [vmem:[#allocation106_spill] sm:$0xff] %v8261_v60  ;;  %v4941_v9 = vadd.f32 %v4940_v8, %v4939_v38  ;;  %v8265_v22 = vpop.f32.mrb[118].mxu1  ;;  %v5788_v23 = vpop.eup %5787  ;;  %v9190_v38 = vpack.c.bf16 %v8171_v21, %v8163_v54 }
 0x87c   : >> { %9188 = vst [vmem:[#allocation87_spill] sm:$0xff] %v8265_v22  ;;  %v8267_v28 = vpop.f32.mrb[119].mxu1 }
 0x87d   : >> { %9189 = vst [vmem:[#allocation86_spill] sm:$0xff] %v8267_v28  ;;  %v2724_v17 = vmul.f32 %v5788_v23, %v4941_v9  ;;  %v9193_v9 = vld [vmem:[#allocation122_spill] sm:$0xff] }
 0x87f   : >> { %v2732_v63 = vpack.c.bf16 %v2724_v17, %v2723_v39  ;;  %v9195_v17 = vmax.f32 %v9193_v9, %v9194_v20  ;;  %v9196_v39 = vld [vmem:[#allocation120_spill] sm:$0xff] }
 0x880   : >> { %v8272_v34 = vpop.f32.mrb[120].mxu1  ;;  %v9198_v21 = vmax.f32 %v9196_v39, %v9197_v6 }
 0x881   : >> { %5268 = vmatmul.mubr.msk.bf16.gmra.mrb[60].mxu0 %vm1387_vm2, %v2732_v63  ;;  %v8277_v8 = vpop.f32.mrb[121].mxu1 }
 0x882   : >> { %3403 = vmatprep.mubr.bf16.mxu0 %v9190_v38  ;;  %v8281_v35 = vpop.f32.mrb[122].mxu1 }
 0x883   : >> { %9191 = vst [vmem:[#allocation89_spill] sm:$0xff] %v8281_v35  ;;  %v8283_v23 = vpop.f32.mrb[123].mxu1 }
 0x884   : >> { %9192 = vst [vmem:[#allocation91_spill] sm:$0xff] %v8283_v23  ;;  %3143 = vmax.xlane.f32.xlu1 %v9195_v17 }
 0x886   : >> { %3140 = vmax.xlane.f32.xlu0 %v9198_v21  ;;  %v9203_v21 = vmax.f32 %v8137_v50, %v8139_v62 }
 0x888   : >> { %v8293_v54 = vpop.f32.mrb[124].mxu1 }
 0x889   : >> { %v8295_v38 = vpop.f32.mrb[125].mxu1 }
 0x88a   : >> { %9199 = vst [vmem:[#allocation88_spill] sm:$0xff] %v8295_v38  ;;  %3891 = vmax.xlane.f32.xlu0 %v9200_v14  ;;  %v8302_v28 = vpop.f32.mrb[126].mxu1 }
 0x88b   : >> { %9201 = vst [vmem:[#allocation107_spill] sm:$0xff] %v8302_v28  ;;  %v8304_v17 = vpop.f32.mrb[127].mxu1 }
 0x88c   : >> { %9202 = vst [vmem:[#allocation110_spill] sm:$0xff] %v8304_v17 }
 0x88e   : >> { %3894 = vmax.xlane.f32.xlu0 %v9203_v21 }
 0x895   : >> { %4114 = vrot.lane.b32.xlu1 %v9138_v52, %s6222_s10 }
 0x899   : >> { %4116 = vrot.lane.b32.xlu1 %v9139_v56, %s6222_s10 }
 0x89d   : >> { %4100 = vrot.lane.b32.xlu1 %v9140_v13, %s6222_s10 }
 0x89f   : >> { %v3132_v14 = vpop.xlane.xlu1 %3131 }
 0x8a0   : >> { %v3173_v60 = vsub.f32 %v9156_v15, %v3132_v14  ;;  %v3174_v23 = vsub.f32 %v9157_v59, %v3132_v14 }
 0x8a1   : >> { %v3129_v35 = vpop.xlane.xlu0 %3128 }
 0x8a2   : >> { %v3215_v63 = vmul.f32 1.442695, %v3173_v60  ;;  %v3217_v17 = vmul.f32 1.442695, %v3174_v23  ;;  %v3171_v28 = vsub.f32 %v9159_v27, %v3129_v35  ;;  %v3172_v21 = vsub.f32 %v9160_v36, %v3129_v35 }
 0x8a3   : >> { %v3332_v38 = vpop.permute.xlu1 %3331 }
 0x8a4   : >> { %5789 = vpow2.f32 %v3215_v63  ;;  %v3211_v52 = vmul.f32 1.442695, %v3171_v28  ;;  %v3213_v22 = vmul.f32 1.442695, %v3172_v21  ;;  %4098 = vrot.lane.b32.xlu0 %v9141_v40, %s6222_s10  ;;  %v9204_v40 = vmax.f32 %v8036_v29, %v8038_v7 }
 0x8a5   : >> { %5791 = vpow2.f32 %v3217_v17  ;;  %v3348_v56 = vpop.permute.xlu0 %3347  ;;  %v9207_v17 = vmax.f32 %v8155_v10, %v8157_v26 }
 0x8a6   : >> { %5793 = vpow2.f32 %v3211_v52  ;;  %4992 = vmatprep.subr.bf16.mxu0 %v3348_v56 }
 0x8a7   : >> { %5795 = vpow2.f32 %v3213_v22  ;;  %4993 = vmatpush3.bf16.msra.mxu0 %v3332_v38  ;;  %v3334_v60 = vpop.permute.xlu1 %3333  ;;  %v9205_v22 = vmax.f32 %v8030_v42, %v8032_v25  ;;  %v9206_v38 = vmax.f32 %v8147_v48, %v8151_v58 }
 0x8a9   : >> { %v3350_v13 = vpop.permute.xlu0 %3349 }
 0x8aa   : >> { %4994 = vmatprep.subr.bf16.mxu0 %v3350_v13 }
 0x8ab   : >> { %4995 = vmatpush3.bf16.msra.mxu0 %v3334_v60 }
 0x8ae   : >> { %v5790_v15 = vpop.eup %5789 }
 0x8af   : >> { %v5792_v59 = vpop.eup %5791 }
 0x8b0   : >> { %v5794_v27 = vpop.eup %5793  ;;  %v8323_v36 = vadd.f32 %v5792_v59, %v5790_v15 }
 0x8b1   : >> { %v5796_v28 = vpop.eup %5795  ;;  %v3311_v35 = vpack.c.bf16 %v5790_v15, %v5794_v27 }
 0x8b2   : >> { %v3312_v23 = vpack.c.bf16 %v5792_v59, %v5796_v28  ;;  %v8325_v63 = vadd.f32 %v5796_v28, %v5794_v27 }
 0x8c1   : >> { %3149 = vmax.xlane.f32.xlu1 %v9204_v40  ;;  %v9209_v40 = vpack.c.bf16 %v8241_v19, %v8249_v18  ;;  %v9213_v19 = vmax.f32 %v8191_v44, %v8193_v32 }
 0x8c3   : >> { %3146 = vmax.xlane.f32.xlu0 %v9205_v22 }
 0x8c7   : >> { %3897 = vmax.xlane.f32.xlu0 %v9206_v38 }
 0x8cb   : >> { %3900 = vmax.xlane.f32.xlu0 %v9207_v17 }
 0x8d2   : >> { %4118 = vrot.lane.b32.xlu1 %v9150_v47, %s6222_s10 }
 0x8d6   : >> { %4120 = vrot.lane.b32.xlu1 %v9152_v0, %s6222_s10 }
 0x8d8   : >> { %v3138_v14 = vpop.xlane.xlu1 %3137 }
 0x8d9   : >> { %v3177_v21 = vsub.f32 %v9168_v46, %v3138_v14  ;;  %v3178_v52 = vsub.f32 %v9169_v57, %v3138_v14 }
 0x8da   : >> { %4104 = vrot.lane.b32.xlu1 %v9149_v41, %s6222_s10  ;;  %v3135_v56 = vpop.xlane.xlu0 %3134 }
 0x8db   : >> { %v3223_v13 = vmul.f32 1.442695, %v3177_v21  ;;  %v3225_v60 = vmul.f32 1.442695, %v3178_v52  ;;  %v3175_v15 = vsub.f32 %v9171_v55, %v3135_v56  ;;  %v3176_v59 = vsub.f32 %v9172_v24, %v3135_v56 }
 0x8dc   : >> { %v3336_v28 = vpop.permute.xlu1 %3335  ;;  %v9208_v55 = vpack.c.bf16 %v8169_v33, %v8161_v2  ;;  %v9210_v52 = vpack.c.bf16 %v8239_v49, %v8243_v16  ;;  %v9211_v2 = vmax.f32 %v8076_v45, %v8078_v1  ;;  %v9212_v33 = vmax.f32 %v8070_v4, %v8072_v31 }
 0x8dd   : >> { %5797 = vpow2.f32 %v3223_v13  ;;  %v3219_v47 = vmul.f32 1.442695, %v3175_v15  ;;  %v3221_v27 = vmul.f32 1.442695, %v3176_v59  ;;  %v9214_v49 = vmax.f32 %v8199_v11, %v8201_v61 }
 0x8de   : >> { %5799 = vpow2.f32 %v3225_v60  ;;  %v3352_v0 = vpop.permute.xlu0 %3351 }
 0x8df   : >> { %5801 = vpow2.f32 %v3219_v47  ;;  %4996 = vmatprep.subr.bf16.mxu0 %v3352_v0 }
 0x8e0   : >> { %5803 = vpow2.f32 %v3221_v27  ;;  %4997 = vmatpush3.bf16.msra.mxu0 %v3336_v28  ;;  %v3338_v46 = vpop.permute.xlu1 %3337 }
 0x8e1   : >> { %4102 = vrot.lane.b32.xlu0 %v9148_v37, %s6222_s10 }
 0x8e2   : >> { %v3354_v41 = vpop.permute.xlu0 %3353 }
 0x8e3   : >> { %4998 = vmatprep.subr.bf16.mxu0 %v3354_v41 }
 0x8e4   : >> { %4999 = vmatpush3.bf16.msra.mxu0 %v3338_v46 }
 0x8e7   : >> { %v5798_v57 = vpop.eup %5797  ;;  %3404 = vmatmul.mubr.bf16.vlgmr.msra.gmra.mrb[96].mxu0 %v9208_v55 }
 0x8e8   : >> { %v5800_v24 = vpop.eup %5799  ;;  %3411 = vmatprep.mubr.bf16.mxu0 %v9209_v40 }
 0x8e9   : >> { %v5802_v22 = vpop.eup %5801  ;;  %v8357_v38 = vadd.f32 %v5800_v24, %v5798_v57 }
 0x8ea   : >> { %v5804_v17 = vpop.eup %5803  ;;  %v3313_v14 = vpack.c.bf16 %v5798_v57, %v5802_v22 }
 0x8eb   : >> { %v3314_v37 = vpack.c.bf16 %v5800_v24, %v5804_v17  ;;  %v8359_v21 = vadd.f32 %v5804_v17, %v5802_v22 }
 0x8ef   : >> { %3412 = vmatmul.mubr.bf16.gmra.mrb[100].mxu0 %v9210_v52 }
 0x8f0   : >> { %3419 = vmatprep.mubr.bf16.mxu0 %v3312_v23 }
 0x8f7   : >> { %3420 = vmatmul.mubr.bf16.gmra.mrb[104].mxu0 %v3311_v35 }
 0x8f8   : >> { %3427 = vmatprep.mubr.bf16.mxu0 %v3314_v37 }
 0x8fe   : >> { %3155 = vmax.xlane.f32.xlu1 %v9211_v2 }
 0x8ff   : >> { %3428 = vmatmul.mubr.bf16.gmra.mrb[108].mxu0 %v3313_v14 }
 0x900   : >> { %3152 = vmax.xlane.f32.xlu0 %v9212_v33 }
 0x904   : >> { %3903 = vmax.xlane.f32.xlu0 %v9213_v19 }
 0x908   : >> { %3906 = vmax.xlane.f32.xlu0 %v9214_v49 }
 0x90f   : >> { %4122 = vrot.lane.b32.xlu1 %v9164_v51, %s6222_s10 }
 0x911   : >> { %v3144_v16 = vpop.xlane.xlu1 %3143 }
 0x912   : >> { %v3181_v18 = vsub.f32 %v9193_v9, %v3144_v16  ;;  %v3182_v35 = vsub.f32 %v9194_v20, %v3144_v16 }
 0x913   : >> { %4124 = vrot.lane.b32.xlu1 %v9165_v12, %s6222_s10  ;;  %v3141_v23 = vpop.xlane.xlu0 %3140 }
 0x914   : >> { %v3231_v56 = vmul.f32 1.442695, %v3181_v18  ;;  %v3233_v13 = vmul.f32 1.442695, %v3182_v35  ;;  %v3179_v60 = vsub.f32 %v9196_v39, %v3141_v23  ;;  %v3180_v15 = vsub.f32 %v9197_v6, %v3141_v23  ;;  %v9216_v35 = vld [vmem:[#allocation101_spill] sm:$0xff] }
 0x915   : >> { %v4115_v59 = vpop.permute.xlu1 %4114  ;;  %v9217_v23 = vld [vmem:[#allocation93_spill] sm:$0xff] }
 0x916   : >> { %5805 = vpow2.f32 %v3231_v56  ;;  %v3227_v47 = vmul.f32 1.442695, %v3179_v60  ;;  %v3229_v27 = vmul.f32 1.442695, %v3180_v15  ;;  %5090 = vmatprep.subr.bf16.mxu1 %v4115_v59  ;;  %v9218_v56 = vmax.f32 %v9216_v35, %v9217_v23  ;;  %v9220_v60 = vld [vmem:[#allocation99_spill] sm:$0xff] }
 0x917   : >> { %5807 = vpow2.f32 %v3233_v13  ;;  %4108 = vrot.lane.b32.xlu1 %v9163_v3, %s6222_s10  ;;  %v3892_v20 = vpop.xlane.xlu0 %3891  ;;  %v9215_v3 = vld [vmem:[#allocation72_spill] sm:$0xff]  ;;  %v9219_v13 = vld [vmem:[#allocation90_spill] sm:$0xff]  ;;  %v9222_v59 = vld [vmem:[#allocation95_spill] sm:$0xff] }
 0x918   : >> { %5809 = vpow2.f32 %v3227_v47  ;;  %v3938_v51 = vsub.f32 %v8127_v5, %v3892_v20  ;;  %v3939_v12 = vsub.f32 %v8133_v53, %v3892_v20  ;;  %v9221_v15 = vmax.f32 %v9219_v13, %v9220_v60  ;;  %v9223_v47 = vld [vmem:[#allocation102_spill] sm:$0xff]  ;;  %v9225_v20 = vld [vmem:[#allocation97_spill] sm:$0xff] }
 0x919   : >> { %5811 = vpow2.f32 %v3229_v27  ;;  %v4117_v41 = vpop.permute.xlu1 %4116  ;;  %v9224_v27 = vmax.f32 %v9222_v59, %v9223_v47 }
 0x91a   : >> { %v3970_v9 = vmul.f32 1.442695, %v3938_v51  ;;  %v3972_v39 = vmul.f32 1.442695, %v3939_v12  ;;  %v9226_v51 = vld [vmem:[#allocation96_spill] sm:$0xff] }
 0x91b   : >> { %v3895_v28 = vpop.xlane.xlu0 %3894  ;;  %v9227_v12 = vmax.f32 %v9225_v20, %v9226_v51 }
 0x91c   : >> { %5813 = vpow2.f32 %v3970_v9  ;;  %v3940_v6 = vsub.f32 %v8137_v50, %v3895_v28  ;;  %v3941_v0 = vsub.f32 %v8139_v62, %v3895_v28  ;;  %v9228_v9 = vld [vmem:[#allocation83_spill] sm:$0xff] }
 0x91d   : >> { %5815 = vpow2.f32 %v3972_v39  ;;  %v4101_v22 = vpop.permute.xlu1 %4100 }
 0x91e   : >> { %v3974_v46 = vmul.f32 1.442695, %v3940_v6  ;;  %v3976_v57 = vmul.f32 1.442695, %v3941_v0  ;;  %4106 = vrot.lane.b32.xlu0 %v9215_v3, %s6222_s10  ;;  %v9229_v0 = vld [vmem:[#allocation85_spill] sm:$0xff] }
 0x91f   : >> { %v4099_v55 = vpop.permute.xlu0 %4098 }
 0x920   : >> { %v5806_v5 = vpop.eup %5805  ;;  %5817 = vpow2.f32 %v3974_v46  ;;  %5091 = vmatpush3.bf16.msra.mxu1 %v4099_v55 }
 0x921   : >> { %v5808_v53 = vpop.eup %5807  ;;  %5819 = vpow2.f32 %v3976_v57  ;;  %5092 = vmatprep.subr.bf16.mxu1 %v4117_v41 }
 0x922   : >> { %v5810_v24 = vpop.eup %5809  ;;  %v8392_v40 = vadd.f32 %v5808_v53, %v5806_v5 }
 0x923   : >> { %v5812_v50 = vpop.eup %5811  ;;  %v3315_v62 = vpack.c.bf16 %v5806_v5, %v5810_v24 }
 0x924   : >> { %5093 = vmatpush3.bf16.msra.mxu1 %v4101_v22  ;;  %v3316_v17 = vpack.c.bf16 %v5808_v53, %v5812_v50  ;;  %v8394_v14 = vadd.f32 %v5812_v50, %v5810_v24 }
 0x926   : >> { %v8396_v37 = vpop.eup %5813  ;;  %3435 = vmatprep.mubr.bf16.mxu0 %v3316_v17 }
 0x927   : >> { %v5816_v52 = vpop.eup %5815  ;;  %3436 = vmatmul.mubr.bf16.gmra.mrb[112].mxu0 %v3315_v62 }
 0x928   : >> { %v8399_v2 = vadd.f32 %v5816_v52, %v8396_v37 }
 0x92a   : >> { %v8401_v33 = vpop.eup %5817 }
 0x92b   : >> { %v5820_v19 = vpop.eup %5819  ;;  %v4082_v49 = vpack.c.bf16 %v8401_v33, %v8396_v37 }
 0x92c   : >> { %v4083_v16 = vpack.c.bf16 %v5820_v19, %v5816_v52  ;;  %v8406_v18 = vadd.f32 %v5820_v19, %v8401_v33 }
 0x92e   : >> { %4178 = vmatprep.mubr.bf16.mxu1 %v4083_v16 }
 0x93b   : >> { %3161 = vmax.xlane.f32.xlu1 %v9218_v56 }
 0x93d   : >> { %3158 = vmax.xlane.f32.xlu0 %v9221_v15  ;;  %v9231_v15 = vld [vmem:[#allocation57_spill] sm:$0xff] }
 0x941   : >> { %3909 = vmax.xlane.f32.xlu0 %v9224_v27 }
 0x945   : >> { %3912 = vmax.xlane.f32.xlu0 %v9227_v12 }
 0x94c   : >> { %4126 = vrot.lane.b32.xlu1 %v9228_v9, %s6222_s10 }
 0x94e   : >> { %v3150_v39 = vpop.xlane.xlu1 %3149 }
 0x94f   : >> { %v3185_v28 = vsub.f32 %v8036_v29, %v3150_v39  ;;  %v3186_v6 = vsub.f32 %v8038_v7, %v3150_v39  ;;  %v9230_v29 = vld [vmem:[#allocation61_spill] sm:$0xff] }
 0x950   : >> { %4128 = vrot.lane.b32.xlu1 %v9229_v0, %s6222_s10  ;;  %v3147_v41 = vpop.xlane.xlu0 %3146 }
 0x951   : >> { %v3239_v46 = vmul.f32 1.442695, %v3185_v28  ;;  %v3241_v57 = vmul.f32 1.442695, %v3186_v6  ;;  %v3183_v3 = vsub.f32 %v8030_v42, %v3147_v41  ;;  %v3184_v55 = vsub.f32 %v8032_v25, %v3147_v41 }
 0x952   : >> { %v4119_v5 = vpop.permute.xlu1 %4118 }
 0x953   : >> { %5821 = vpow2.f32 %v3239_v46  ;;  %v3235_v53 = vmul.f32 1.442695, %v3183_v3  ;;  %v3237_v24 = vmul.f32 1.442695, %v3184_v55  ;;  %5094 = vmatprep.subr.bf16.mxu1 %v4119_v5 }
 0x954   : >> { %5823 = vpow2.f32 %v3241_v57  ;;  %4112 = vrot.lane.b32.xlu1 %v9230_v29, %s6222_s10  ;;  %v3898_v7 = vpop.xlane.xlu0 %3897  ;;  %v9233_v29 = vld [vmem:[#allocation92_spill] sm:$0xff] }
 0x955   : >> { %5825 = vpow2.f32 %v3235_v53  ;;  %v3942_v50 = vsub.f32 %v8147_v48, %v3898_v7  ;;  %v3943_v22 = vsub.f32 %v8151_v58, %v3898_v7 }
 0x956   : >> { %5827 = vpow2.f32 %v3237_v24  ;;  %v4121_v19 = vpop.permute.xlu1 %4120  ;;  %v9232_v24 = vld [vmem:[#allocation98_spill] sm:$0xff] }
 0x957   : >> { %v3978_v62 = vmul.f32 1.442695, %v3942_v50  ;;  %v3980_v42 = vmul.f32 1.442695, %v3943_v22  ;;  %v9234_v7 = vmax.f32 %v9232_v24, %v9233_v29  ;;  %v9235_v50 = vld [vmem:[#allocation103_spill] sm:$0xff]  ;;  %v9236_v22 = vld [vmem:[#allocation104_spill] sm:$0xff] }
 0x958   : >> { %v3901_v17 = vpop.xlane.xlu0 %3900 }
 0x959   : >> { %5829 = vpow2.f32 %v3978_v62  ;;  %v3944_v25 = vsub.f32 %v8155_v10, %v3901_v17  ;;  %v3945_v52 = vsub.f32 %v8157_v26, %v3901_v17  ;;  %v9237_v62 = vmax.f32 %v9235_v50, %v9236_v22 }
 0x95a   : >> { %5831 = vpow2.f32 %v3980_v42  ;;  %v4105_v39 = vpop.permute.xlu1 %4104  ;;  %v9238_v42 = vmax.f32 %v8272_v34, %v8277_v8  ;;  %v9239_v17 = vmax.f32 %v8251_v43, %v8255_v30 }
 0x95b   : >> { %v3982_v16 = vmul.f32 1.442695, %v3944_v25  ;;  %v3984_v56 = vmul.f32 1.442695, %v3945_v52  ;;  %4110 = vrot.lane.b32.xlu0 %v9231_v15, %s6222_s10  ;;  %v9240_v25 = vld [vmem:[#allocation88_spill] sm:$0xff] }
 0x95c   : >> { %v4103_v27 = vpop.permute.xlu0 %4102  ;;  %v9241_v52 = vmax.f32 %v8293_v54, %v9240_v25  ;;  %v9245_v15 = vld [vmem:[#allocation100_spill] sm:$0xff] }
 0x95d   : >> { %v5822_v48 = vpop.eup %5821  ;;  %5833 = vpow2.f32 %v3982_v16  ;;  %5095 = vmatpush3.bf16.msra.mxu1 %v4103_v27  ;;  %v9243_v16 = vld [vmem:[#allocation86_spill] sm:$0xff]  ;;  %v9246_v27 = vld [vmem:[#allocation89_spill] sm:$0xff] }
 0x95e   : >> { %v5824_v58 = vpop.eup %5823  ;;  %5835 = vpow2.f32 %v3984_v56  ;;  %5096 = vmatprep.subr.bf16.mxu1 %v4121_v19  ;;  %v9242_v19 = vld [vmem:[#allocation87_spill] sm:$0xff] }
 0x95f   : >> { %v5826_v12 = vpop.eup %5825  ;;  %v8436_v9 = vadd.f32 %v5824_v58, %v5822_v48  ;;  %v9244_v56 = vmax.f32 %v9242_v19, %v9243_v16 }
 0x960   : >> { %v5828_v10 = vpop.eup %5827  ;;  %v3317_v26 = vpack.c.bf16 %v5822_v48, %v5826_v12  ;;  %v9247_v48 = vld [vmem:[#allocation91_spill] sm:$0xff] }
 0x961   : >> { %5097 = vmatpush3.bf16.msra.mxu1 %v4105_v39  ;;  %v3318_v28 = vpack.c.bf16 %v5824_v58, %v5828_v10  ;;  %v3289_v6 = vadd.f32 %v5828_v10, %v5826_v12  ;;  %v9248_v58 = vmax.f32 %v9246_v27, %v9247_v48  ;;  %v9249_v12 = vld [vmem:[#allocation106_spill] sm:$0xff]  ;;  %v9250_v10 = vld [vmem:[#allocation107_spill] sm:$0xff] }
 0x962   : >> { %v9251_v39 = vld [vmem:[#allocation110_spill] sm:$0xff] }
 0x963   : >> { %v8438_v0 = vpop.eup %5829  ;;  %3443 = vmatprep.mubr.bf16.mxu0 %v3318_v28 }
 0x964   : >> { %v8440_v41 = vpop.eup %5831  ;;  %3444 = vmatmul.mubr.bf16.gmra.mrb[116].mxu0 %v3317_v26  ;;  %v9252_v26 = vmax.f32 %v9250_v10, %v9251_v39 }
 0x965   : >> { %v8444_v46 = vadd.f32 %v8440_v41, %v8438_v0 }
 0x967   : >> { %v8446_v57 = vpop.eup %5833 }
 0x968   : >> { %v8448_v3 = vpop.eup %5835  ;;  %v9259_v37 = vpack.c.bf16 %v8446_v57, %v8438_v0 }
 0x969   : >> { %v4085_v5 = vpack.c.bf16 %v8448_v3, %v8440_v41  ;;  %v8456_v53 = vadd.f32 %v8448_v3, %v8446_v57 }
 0x978   : >> { %3918 = vmax.xlane.f32.xlu1 %v9234_v7 }
 0x97a   : >> { %3915 = vmax.xlane.f32.xlu0 %v9237_v62 }
 0x97c   : >> { %3927 = vmax.xlane.f32.xlu1 %v9238_v42 }
 0x97e   : >> { %3921 = vmax.xlane.f32.xlu0 %v9239_v17 }
 0x980   : >> { %3933 = vmax.xlane.f32.xlu1 %v9241_v52 }
 0x982   : >> { %3924 = vmax.xlane.f32.xlu0 %v9244_v56 }
 0x984   : >> { %3260 = vadd.xlane.f32.xlu1 %v9245_v15 }
 0x986   : >> { %3930 = vmax.xlane.f32.xlu0 %v9248_v58  ;;  %v9253_v58 = vld [vmem:[#allocation94_spill] sm:$0xff] }
 0x988   : >> { %3266 = vadd.xlane.f32.xlu1 %v9249_v12 }
 0x98a   : >> { %3936 = vmax.xlane.f32.xlu0 %v9252_v26 }
 0x98b   : >> { %v3156_v28 = vpop.xlane.xlu1 %3155 }
 0x98c   : >> { %v3189_v7 = vsub.f32 %v8076_v45, %v3156_v28  ;;  %v3190_v62 = vsub.f32 %v8078_v1, %v3156_v28  ;;  %3272 = vadd.xlane.f32.xlu1 %v8325_v63  ;;  %v9254_v28 = vld [vmem:[#allocation105_spill] sm:$0xff] }
 0x98d   : >> { %v3153_v42 = vpop.xlane.xlu0 %3152 }
 0x98e   : >> { %v3247_v17 = vmul.f32 1.442695, %v3189_v7  ;;  %v3249_v52 = vmul.f32 1.442695, %v3190_v62  ;;  %v3187_v56 = vsub.f32 %v8070_v4, %v3153_v42  ;;  %v3188_v15 = vsub.f32 %v8072_v31, %v3153_v42  ;;  %3263 = vadd.xlane.f32.xlu0 %v9253_v58 }
 0x98f   : >> { %v4123_v12 = vpop.permute.xlu1 %4122 }
 0x990   : >> { %5837 = vpow2.f32 %v3247_v17  ;;  %v3243_v55 = vmul.f32 1.442695, %v3187_v56  ;;  %v3245_v26 = vmul.f32 1.442695, %v3188_v15  ;;  %3278 = vadd.xlane.f32.xlu1 %v8359_v21  ;;  %5098 = vmatprep.subr.bf16.mxu1 %v4123_v12 }
 0x991   : >> { %5839 = vpow2.f32 %v3249_v52  ;;  %v3904_v45 = vpop.xlane.xlu0 %3903 }
 0x992   : >> { %5841 = vpow2.f32 %v3243_v55  ;;  %v3946_v1 = vsub.f32 %v8191_v44, %v3904_v45  ;;  %v3947_v63 = vsub.f32 %v8193_v32, %v3904_v45  ;;  %3269 = vadd.xlane.f32.xlu0 %v9254_v28  ;;  %v9256_v28 = vld [vmem:[#allocation26_spill] sm:$0xff] }
 0x993   : >> { %5843 = vpow2.f32 %v3245_v26  ;;  %v4125_v55 = vpop.permute.xlu1 %4124 }
 0x994   : >> { %v3986_v4 = vmul.f32 1.442695, %v3946_v1  ;;  %v3988_v31 = vmul.f32 1.442695, %v3947_v63  ;;  %3284 = vadd.xlane.f32.xlu1 %v8394_v14 }
 0x995   : >> { %v3907_v7 = vpop.xlane.xlu0 %3906 }
 0x996   : >> { %5845 = vpow2.f32 %v3986_v4  ;;  %v3948_v62 = vsub.f32 %v8199_v11, %v3907_v7  ;;  %v3949_v21 = vsub.f32 %v8201_v61, %v3907_v7  ;;  %3275 = vadd.xlane.f32.xlu0 %v8323_v36  ;;  %v9258_v7 = vld [vmem:[#allocation28_spill] sm:$0xff] }
 0x997   : >> { %5847 = vpow2.f32 %v3988_v31  ;;  %v4109_v61 = vpop.permute.xlu1 %4108  ;;  %v9257_v31 = vld [vmem:[#allocation29_spill] sm:$0xff] }
 0x998   : >> { %v3990_v44 = vmul.f32 1.442695, %v3948_v62  ;;  %v3992_v42 = vmul.f32 1.442695, %v3949_v21  ;;  %3290 = vadd.xlane.f32.xlu1 %v3289_v6  ;;  %v4673_v62 = vcombine.low %v9258_v7, %v9257_v31 }
 0x999   : >> { %v4107_v32 = vpop.permute.xlu0 %4106 }
 0x99a   : >> { %v5838_v17 = vpop.eup %5837  ;;  %5849 = vpow2.f32 %v3990_v44  ;;  %3281 = vadd.xlane.f32.xlu0 %v8357_v38  ;;  %5099 = vmatpush3.bf16.msra.mxu1 %v4107_v32 }
 0x99b   : >> { %v5840_v14 = vpop.eup %5839  ;;  %5851 = vpow2.f32 %v3992_v42  ;;  %5100 = vmatprep.subr.bf16.mxu1 %v4125_v55 }
 0x99c   : >> { %v5842_v52 = vpop.eup %5841  ;;  %v3298_v11 = vadd.f32 %v5840_v14, %v5838_v17 }
 0x99d   : >> { %v5844_v56 = vpop.eup %5843  ;;  %v3319_v15 = vpack.c.bf16 %v5838_v17, %v5842_v52 }
 0x99e   : >> { %3287 = vadd.xlane.f32.xlu0 %v8392_v40  ;;  %5101 = vmatpush3.bf16.msra.mxu1 %v4109_v61  ;;  %v3320_v36 = vpack.c.bf16 %v5840_v14, %v5844_v56  ;;  %v3295_v58 = vadd.f32 %v5844_v56, %v5842_v52 }
 0x9a0   : >> { %v8500_v6 = vpop.eup %5845  ;;  %3451 = vmatprep.mubr.bf16.mxu0 %v3320_v36  ;;  %3296 = vadd.xlane.f32.xlu1 %v3295_v58 }
 0x9a1   : >> { %v8502_v12 = vpop.eup %5847  ;;  %3452 = vmatmul.mubr.bf16.gmra.mrb[120].mxu0 %v3319_v15 }
 0x9a2   : >> { %3293 = vadd.xlane.f32.xlu0 %v8436_v9  ;;  %v8507_v38 = vadd.f32 %v8502_v12, %v8500_v6  ;;  %v9255_v9 = vld [vmem:[#allocation27_spill] sm:$0xff] }
 0x9a3   : >> { %v4672_v4 = vcombine.low %v9256_v28, %v9255_v9 }
 0x9a4   : >> { %v8509_v26 = vpop.eup %5849 }
 0x9a5   : >> { %v8511_v45 = vpop.eup %5851  ;;  %v4086_v40 = vpack.c.bf16 %v8509_v26, %v8500_v6  ;;  %5271 = vmatprep.subr.bf16.mxu0 %v4672_v4 }
 0x9a6   : >> { %3299 = vadd.xlane.f32.xlu0 %v3298_v11  ;;  %v8517_v1 = vadd.f32 %v8511_v45, %v8509_v26  ;;  %v4087_v63 = vpack.c.bf16 %v8511_v45, %v8502_v12  ;;  %5272 = vmatpush3.bf16.msra.mxu0 %v4672_v4 }
 0x9a7   : >> { %5273 = vmatprep.subr.bf16.mxu0 %v4673_v62 }
 0x9aa   : >> { %5274 = vmatpush3.bf16.msra.mxu0 %v4673_v62 }
 0x9ba   : >> { %v5000_v21 = vpop.f32.mrb[96].mxu0 }
 0x9bb   : >> { %v5001_v55 = vpop.f32.mrb[97].mxu0 }
 0x9bc   : >> { %v8525_v44 = vadd.f32 %v5001_v55, %v5000_v21  ;;  %v5003_v42 = vpop.f32.mrb[98].mxu0 }
 0x9bd   : >> { %v5004_v32 = vpop.f32.mrb[99].mxu0 }
 0x9be   : >> { %v8527_v17 = vadd.f32 %v5004_v32, %v5003_v42 }
 0x9c2   : >> { %v5006_v14 = vpop.f32.mrb[100].mxu0 }
 0x9c3   : >> { %v5007_v52 = vpop.f32.mrb[101].mxu0 }
 0x9c4   : >> { %v8529_v11 = vadd.f32 %v5007_v52, %v5006_v14  ;;  %v5009_v56 = vpop.f32.mrb[102].mxu0 }
 0x9c5   : >> { %v5010_v61 = vpop.f32.mrb[103].mxu0 }
 0x9c6   : >> { %v8531_v15 = vadd.f32 %v5010_v61, %v5009_v56 }
 0x9c8   : >> { %v3162_v36 = vpop.xlane.xlu1 %3161 }
 0x9c9   : >> { %v3193_v58 = vsub.f32 %v9216_v35, %v3162_v36  ;;  %v3194_v9 = vsub.f32 %v9217_v23, %v3162_v36 }
 0x9ca   : >> { %v5012_v28 = vpop.f32.mrb[104].mxu0  ;;  %v3159_v4 = vpop.xlane.xlu0 %3158 }
 0x9cb   : >> { %v3255_v31 = vmul.f32 1.442695, %v3193_v58  ;;  %v3257_v7 = vmul.f32 1.442695, %v3194_v9  ;;  %v3191_v62 = vsub.f32 %v9219_v13, %v3159_v4  ;;  %v3192_v21 = vsub.f32 %v9220_v60, %v3159_v4  ;;  %v5013_v55 = vpop.f32.mrb[105].mxu0 }
 0x9cc   : >> { %v8537_v42 = vadd.f32 %v5013_v55, %v5012_v28  ;;  %v4127_v32 = vpop.permute.xlu1 %4126  ;;  %v5015_v14 = vpop.f32.mrb[106].mxu0 }
 0x9cd   : >> { %5853 = vpow2.f32 %v3255_v31  ;;  %v3251_v52 = vmul.f32 1.442695, %v3191_v62  ;;  %v3253_v56 = vmul.f32 1.442695, %v3192_v21  ;;  %v5016_v61 = vpop.f32.mrb[107].mxu0  ;;  %5102 = vmatprep.subr.bf16.mxu1 %v4127_v32 }
 0x9ce   : >> { %5855 = vpow2.f32 %v3257_v7  ;;  %v8539_v35 = vadd.f32 %v5016_v61, %v5015_v14  ;;  %v3910_v23 = vpop.xlane.xlu0 %3909 }
 0x9cf   : >> { %5857 = vpow2.f32 %v3251_v52  ;;  %v3950_v36 = vsub.f32 %v9222_v59, %v3910_v23  ;;  %v3951_v13 = vsub.f32 %v9223_v47, %v3910_v23 }
 0x9d0   : >> { %5859 = vpow2.f32 %v3253_v56  ;;  %v4129_v7 = vpop.permute.xlu1 %4128 }
 0x9d1   : >> { %v3994_v60 = vmul.f32 1.442695, %v3950_v36  ;;  %v3996_v58 = vmul.f32 1.442695, %v3951_v13 }
 0x9d2   : >> { %v5018_v9 = vpop.f32.mrb[108].mxu0  ;;  %v3913_v28 = vpop.xlane.xlu0 %3912 }
 0x9d3   : >> { %5861 = vpow2.f32 %v3994_v60  ;;  %v3952_v4 = vsub.f32 %v9225_v20, %v3913_v28  ;;  %v3953_v31 = vsub.f32 %v9226_v51, %v3913_v28  ;;  %v5019_v62 = vpop.f32.mrb[109].mxu0 }
 0x9d4   : >> { %5863 = vpow2.f32 %v3996_v58  ;;  %v8545_v21 = vadd.f32 %v5019_v62, %v5018_v9  ;;  %v5021_v55 = vpop.f32.mrb[110].mxu0  ;;  %v4113_v36 = vpop.permute.xlu1 %4112 }
 0x9d5   : >> { %v3998_v32 = vmul.f32 1.442695, %v3952_v4  ;;  %v4000_v59 = vmul.f32 1.442695, %v3953_v31  ;;  %v5022_v14 = vpop.f32.mrb[111].mxu0 }
 0x9d6   : >> { %v8547_v47 = vadd.f32 %v5022_v14, %v5021_v55  ;;  %v4111_v52 = vpop.permute.xlu0 %4110 }
 0x9d7   : >> { %v5854_v56 = vpop.eup %5853  ;;  %5865 = vpow2.f32 %v3998_v32  ;;  %5103 = vmatpush3.bf16.msra.mxu1 %v4111_v52 }
 0x9d8   : >> { %v5856_v61 = vpop.eup %5855  ;;  %5867 = vpow2.f32 %v4000_v59  ;;  %5104 = vmatprep.subr.bf16.mxu1 %v4129_v7 }
 0x9d9   : >> { %v5858_v20 = vpop.eup %5857  ;;  %v3304_v51 = vadd.f32 %v5856_v61, %v5854_v56 }
 0x9da   : >> { %v5860_v23 = vpop.eup %5859  ;;  %v3321_v13 = vpack.c.bf16 %v5854_v56, %v5858_v20 }
 0x9db   : >> { %3305 = vadd.xlane.f32.xlu0 %v3304_v51  ;;  %5105 = vmatpush3.bf16.msra.mxu1 %v4113_v36  ;;  %v3322_v60 = vpack.c.bf16 %v5856_v61, %v5860_v23  ;;  %v3301_v58 = vadd.f32 %v5860_v23, %v5858_v20 }
 0x9dd   : >> { %v5862_v9 = vpop.eup %5861  ;;  %3459 = vmatprep.mubr.bf16.mxu0 %v3322_v60  ;;  %3302 = vadd.xlane.f32.xlu1 %v3301_v58 }
 0x9de   : >> { %v5864_v28 = vpop.eup %5863  ;;  %3460 = vmatmul.mubr.bf16.gmra.mrb[124].mxu0 %v3321_v13  ;;  %4179 = vmatmul.mubr.bf16.vlgmr.msra.gmra.mrb[128].mxu1 %v4082_v49 }
 0x9df   : >> { %4038 = vadd.xlane.f32.xlu0 %v8406_v18  ;;  %4186 = vmatprep.mubr.bf16.mxu1 %v4085_v5  ;;  %v4052_v4 = vadd.f32 %v5864_v28, %v5862_v9 }
 0x9e1   : >> { %v5866_v31 = vpop.eup %5865  ;;  %4035 = vadd.xlane.f32.xlu1 %v8399_v2 }
 0x9e2   : >> { %v5868_v62 = vpop.eup %5867  ;;  %v4088_v7 = vpack.c.bf16 %v5866_v31, %v5862_v9 }
 0x9e3   : >> { %4044 = vadd.xlane.f32.xlu0 %v8456_v53  ;;  %v4055_v55 = vadd.f32 %v5868_v62, %v5866_v31  ;;  %v4089_v32 = vpack.c.bf16 %v5868_v62, %v5864_v28 }
 0x9e5   : >> { %4041 = vadd.xlane.f32.xlu1 %v8444_v46 }
 0x9e6   : >> { %4187 = vmatmul.mubr.bf16.gmra.mrb[132].mxu1 %v9259_v37 }
 0x9e7   : >> { %4050 = vadd.xlane.f32.xlu0 %v8517_v1  ;;  %4194 = vmatprep.mubr.bf16.mxu1 %v4087_v63 }
 0x9e9   : >> { %4047 = vadd.xlane.f32.xlu1 %v8507_v38 }
 0x9eb   : >> { %4056 = vadd.xlane.f32.xlu0 %v4055_v55 }
 0x9ed   : >> { %4053 = vadd.xlane.f32.xlu1 %v4052_v4 }
 0x9ee   : >> { %4195 = vmatmul.mubr.bf16.gmra.mrb[136].mxu1 %v4086_v40 }
 0x9ef   : >> { %4202 = vmatprep.mubr.bf16.mxu1 %v4089_v32 }
 0x9f6   : >> { %4203 = vmatmul.mubr.bf16.gmra.mrb[140].mxu1 %v4088_v7 }
 0x9fa   : >> { %v5024_v2 = vpop.f32.mrb[112].mxu0 }
 0x9fb   : >> { %v5025_v33 = vpop.f32.mrb[113].mxu0 }
 0x9fc   : >> { %v8570_v49 = vadd.f32 %v5025_v33, %v5024_v2  ;;  %v5027_v18 = vpop.f32.mrb[114].mxu0 }
 0x9fd   : >> { %v5028_v0 = vpop.f32.mrb[115].mxu0 }
 0x9fe   : >> { %v8572_v41 = vadd.f32 %v5028_v0, %v5027_v18 }
 0xa05   : >> { %v3919_v46 = vpop.xlane.xlu1 %3918 }
 0xa06   : >> { %v3956_v57 = vsub.f32 %v9232_v24, %v3919_v46  ;;  %v3957_v3 = vsub.f32 %v9233_v29, %v3919_v46 }
 0xa07   : >> { %v3916_v5 = vpop.xlane.xlu0 %3915 }
 0xa08   : >> { %v4006_v53 = vmul.f32 1.442695, %v3956_v57  ;;  %v4008_v12 = vmul.f32 1.442695, %v3957_v3  ;;  %v3954_v6 = vsub.f32 %v9235_v50, %v3916_v5  ;;  %v3955_v38 = vsub.f32 %v9236_v22, %v3916_v5 }
 0xa09   : >> { %v3928_v26 = vpop.xlane.xlu1 %3927 }
 0xa0a   : >> { %5869 = vpow2.f32 %v4006_v53  ;;  %v4002_v45 = vmul.f32 1.442695, %v3954_v6  ;;  %v4004_v40 = vmul.f32 1.442695, %v3955_v38  ;;  %v3962_v1 = vsub.f32 %v8272_v34, %v3928_v26 }
 0xa0b   : >> { %5871 = vpow2.f32 %v4008_v12  ;;  %v3963_v63 = vsub.f32 %v8277_v8, %v3928_v26  ;;  %v3922_v59 = vpop.xlane.xlu0 %3921 }
 0xa0c   : >> { %5873 = vpow2.f32 %v4002_v45  ;;  %v4018_v24 = vmul.f32 1.442695, %v3962_v1  ;;  %v3958_v29 = vsub.f32 %v8251_v43, %v3922_v59  ;;  %v3959_v14 = vsub.f32 %v8255_v30, %v3922_v59 }
 0xa0d   : >> { %5875 = vpow2.f32 %v4004_v40  ;;  %v4020_v50 = vmul.f32 1.442695, %v3963_v63  ;;  %v3934_v52 = vpop.xlane.xlu1 %3933 }
 0xa0e   : >> { %5877 = vpow2.f32 %v4018_v24  ;;  %v4010_v22 = vmul.f32 1.442695, %v3958_v29  ;;  %v4012_v56 = vmul.f32 1.442695, %v3959_v14  ;;  %v3966_v61 = vsub.f32 %v8293_v54, %v3934_v52 }
 0xa0f   : >> { %5879 = vpow2.f32 %v4020_v50  ;;  %v3967_v34 = vsub.f32 %v9240_v25, %v3934_v52  ;;  %v3925_v20 = vpop.xlane.xlu0 %3924 }
 0xa10   : >> { %5881 = vpow2.f32 %v4010_v22  ;;  %v4026_v8 = vmul.f32 1.442695, %v3966_v61  ;;  %v3960_v51 = vsub.f32 %v9242_v19, %v3925_v20  ;;  %v3961_v43 = vsub.f32 %v9243_v16, %v3925_v20 }
 0xa11   : >> { %5883 = vpow2.f32 %v4012_v56  ;;  %v4028_v30 = vmul.f32 1.442695, %v3967_v34  ;;  %v3261_v23 = vpop.xlane.xlu1 %3260 }
 0xa12   : >> { %5885 = vpow2.f32 %v4026_v8  ;;  %v4014_v36 = vmul.f32 1.442695, %v3960_v51  ;;  %v4016_v13 = vmul.f32 1.442695, %v3961_v43 }
 0xa13   : >> { %5887 = vpow2.f32 %v4028_v30  ;;  %v3931_v60 = vpop.xlane.xlu0 %3930 }
 0xa14   : >> { %v5870_v58 = vpop.eup %5869  ;;  %5889 = vpow2.f32 %v4014_v36  ;;  %v3964_v54 = vsub.f32 %v9246_v27, %v3931_v60  ;;  %v3965_v25 = vsub.f32 %v9247_v48, %v3931_v60 }
 0xa15   : >> { %v5872_v9 = vpop.eup %5871  ;;  %5891 = vpow2.f32 %v4016_v13  ;;  %v3267_v28 = vpop.xlane.xlu1 %3266 }
 0xa16   : >> { %v5874_v19 = vpop.eup %5873  ;;  %v4022_v4 = vmul.f32 1.442695, %v3964_v54  ;;  %v4024_v16 = vmul.f32 1.442695, %v3965_v25  ;;  %v4061_v31 = vadd.f32 %v5872_v9, %v5870_v58 }
 0xa17   : >> { %v5876_v62 = vpop.eup %5875  ;;  %v3937_v7 = vpop.xlane.xlu0 %3936  ;;  %v4090_v55 = vpack.c.bf16 %v5870_v58, %v5874_v19 }
 0xa18   : >> { %v8588_v32 = vpop.eup %5877  ;;  %5893 = vpow2.f32 %v4022_v4  ;;  %4062 = vadd.xlane.f32.xlu0 %v4061_v31  ;;  %v3968_v37 = vsub.f32 %v9250_v10, %v3937_v7  ;;  %v3969_v27 = vsub.f32 %v9251_v39, %v3937_v7  ;;  %v4091_v2 = vpack.c.bf16 %v5872_v9, %v5876_v62 }
 0xa19   : >> { %v5880_v48 = vpop.eup %5879  ;;  %5895 = vpow2.f32 %v4024_v16  ;;  %v4058_v33 = vadd.f32 %v5876_v62, %v5874_v19  ;;  %v3273_v5 = vpop.xlane.xlu1 %3272 }
 0xa1a   : >> { %v5882_v18 = vpop.eup %5881  ;;  %5897 = vrcp.f32 %v3261_v23  ;;  %v4030_v0 = vmul.f32 1.442695, %v3968_v37  ;;  %v4032_v46 = vmul.f32 1.442695, %v3969_v27  ;;  %4210 = vmatprep.mubr.bf16.mxu1 %v4091_v2  ;;  %v4070_v57 = vadd.f32 %v5880_v48, %v8588_v32 }
 0xa1b   : >> { %v5884_v3 = vpop.eup %5883  ;;  %5899 = vrcp.f32 %v3267_v28  ;;  %4059 = vadd.xlane.f32.xlu1 %v4058_v33  ;;  %4211 = vmatmul.mubr.bf16.gmra.mrb[144].mxu1 %v4090_v55  ;;  %v3264_v53 = vpop.xlane.xlu0 %3263 }
 0xa1c   : >> { %v8593_v10 = vpop.eup %5885  ;;  %5901 = vpow2.f32 %v4030_v0  ;;  %v4064_v39 = vadd.f32 %v5884_v3, %v5882_v18 }
 0xa1d   : >> { %v5888_v12 = vpop.eup %5887  ;;  %5903 = vpow2.f32 %v4032_v46  ;;  %v3279_v59 = vpop.xlane.xlu1 %3278 }
 0xa1e   : >> { %v5890_v6 = vpop.eup %5889  ;;  %5905 = vrcp.f32 %v3264_v53  ;;  %v4076_v38 = vadd.f32 %v5888_v12, %v8593_v10 }
 0xa1f   : >> { %v5892_v26 = vpop.eup %5891  ;;  %4065 = vadd.xlane.f32.xlu1 %v4064_v39  ;;  %v3270_v45 = vpop.xlane.xlu0 %3269  ;;  %v4092_v40 = vpack.c.bf16 %v5890_v6, %v5882_v18  ;;  %v9261_v39 = vld [vmem:[#allocation30_spill] sm:$0xff] }
 0xa20   : >> { %5907 = vrcp.f32 %v3270_v45  ;;  %v4093_v1 = vpack.c.bf16 %v5892_v26, %v5884_v3  ;;  %v4067_v63 = vadd.f32 %v5892_v26, %v5890_v6 }
 0xa21   : >> { %5909 = vrcp.f32 %v3273_v5  ;;  %v3285_v8 = vpop.xlane.xlu1 %3284 }
 0xa22   : >> { %v5894_v24 = vpop.eup %5893  ;;  %4218 = vmatprep.mubr.bf16.mxu1 %v4093_v1  ;;  %4068 = vadd.xlane.f32.xlu0 %v4067_v63 }
 0xa23   : >> { %v5896_v29 = vpop.eup %5895  ;;  %4071 = vadd.xlane.f32.xlu1 %v4070_v57  ;;  %4219 = vmatmul.mubr.bf16.gmra.mrb[148].mxu1 %v4092_v40  ;;  %v3276_v14 = vpop.xlane.xlu0 %3275  ;;  %v4094_v50 = vpack.c.bf16 %v5894_v24, %v8588_v32 }
 0xa24   : >> { %v5898_v52 = vpop.eup %5897  ;;  %5911 = vrcp.f32 %v3276_v14  ;;  %v4095_v22 = vpack.c.bf16 %v5896_v29, %v5880_v48  ;;  %v4073_v56 = vadd.f32 %v5896_v29, %v5894_v24 }
 0xa25   : >> { %v5900_v61 = vpop.eup %5899  ;;  %5913 = vrcp.f32 %v3279_v59  ;;  %v3484_v13 = vmul.f32 %v5898_v52, %v8525_v44  ;;  %v3291_v44 = vpop.xlane.xlu1 %3290 }
 0xa26   : >> { %v5902_v34 = vpop.eup %5901  ;;  %4226 = vmatprep.mubr.bf16.mxu1 %v4095_v22  ;;  %4074 = vadd.xlane.f32.xlu0 %v4073_v56  ;;  %v3486_v54 = vmul.f32 %v5900_v61, %v8529_v11 }
 0xa27   : >> { %v5904_v20 = vpop.eup %5903  ;;  %4077 = vadd.xlane.f32.xlu1 %v4076_v38  ;;  %v3282_v51 = vpop.xlane.xlu0 %3281  ;;  %v4096_v43 = vpack.c.bf16 %v5902_v34, %v8593_v10  ;;  %v9260_v10 = vld [vmem:[#allocation31_spill] sm:$0xff] }
 0xa28   : >> { %v5906_v30 = vpop.eup %5905  ;;  %5915 = vrcp.f32 %v3282_v51  ;;  %v4079_v23 = vadd.f32 %v5904_v20, %v5902_v34  ;;  %v4097_v36 = vpack.c.bf16 %v5904_v20, %v5888_v12  ;;  %v4690_v12 = vcombine.low %v9261_v39, %v9260_v10 }
 0xa29   : >> { %v3485_v60 = vmul.f32 %v5906_v30, %v8527_v17  ;;  %5917 = vrcp.f32 %v3285_v8 }
 0xa2a   : >> { %v5908_v58 = vpop.eup %5907  ;;  %4080 = vadd.xlane.f32.xlu0 %v4079_v23  ;;  %5291 = vmatprep.subr.bf16.mxu0 %v4690_v12 }
 0xa2b   : >> { %v3487_v25 = vmul.f32 %v5908_v58, %v8531_v15  ;;  %4227 = vmatmul.mubr.bf16.gmra.mrb[152].mxu1 %v4094_v50  ;;  %v3500_v9 = vpack.c.bf16 %v3485_v60, %v3484_v13  ;;  %v3288_v28 = vpop.xlane.xlu0 %3287  ;;  %v5910_v19 = vpop.eup %5909 }
 0xa2c   : >> { %4234 = vmatprep.mubr.bf16.mxu1 %v4097_v36  ;;  %5919 = vrcp.f32 %v3288_v28  ;;  %v3488_v31 = vmul.f32 %v5910_v19, %v8537_v42 }
 0xa2d   : >> { %v3501_v4 = vpack.c.bf16 %v3487_v25, %v3486_v54  ;;  %5275 = vmatprep.mubr.msk.bf16.mxu0 %vm1387_vm2, %v3500_v9  ;;  %v3297_v26 = vpop.xlane.xlu1 %3296 }
 0xa2e   : >> { %v5912_v16 = vpop.eup %5911 }
 0xa2f   : >> { %5276 = vmatmul.mubr.msk.bf16.vlgmr.msra.gmra.mrb[48].mxu0 %vm1387_vm2, %v3501_v4  ;;  %v3294_v17 = vpop.xlane.xlu0 %3293  ;;  %v3489_v11 = vmul.f32 %v5912_v16, %v8539_v35  ;;  %v5914_v62 = vpop.eup %5913 }
 0xa30   : >> { %5921 = vrcp.f32 %v3294_v17  ;;  %v3490_v55 = vmul.f32 %v5914_v62, %v8545_v21  ;;  %5292 = vmatpush3.bf16.msra.mxu0 %v4690_v12 }
 0xa31   : >> { %v3502_v15 = vpack.c.bf16 %v3489_v11, %v3488_v31  ;;  %5923 = vrcp.f32 %v3291_v44 }
 0xa32   : >> { %v5916_v7 = vpop.eup %5915  ;;  %5925 = vrcp.f32 %v3297_v26 }
 0xa33   : >> { %4235 = vmatmul.mubr.bf16.gmra.mrb[156].mxu1 %v4096_v43  ;;  %5279 = vmatprep.mubr.msk.bf16.mxu0 %vm1387_vm2, %v3502_v15  ;;  %v3491_v32 = vmul.f32 %v5916_v7, %v8547_v47  ;;  %v5918_v37 = vpop.eup %5917  ;;  %v3300_v45 = vpop.xlane.xlu0 %3299 }
 0xa34   : >> { %v3492_v42 = vmul.f32 %v5918_v37, %v8570_v49  ;;  %v9262_v49 = vld [vmem:[#allocation33_spill] sm:$0xff]  ;;  %5927 = vrcp.f32 %v3300_v45 }
 0xa35   : >> { %v3503_v27 = vpack.c.bf16 %v3491_v32, %v3490_v55 }
 0xa36   : >> { %v5920_v2 = vpop.eup %5919 }
 0xa37   : >> { %v5030_v48 = vpop.f32.mrb[116].mxu0  ;;  %5280 = vmatmul.mubr.msk.bf16.gmra.mrb[52].mxu0 %vm1387_vm2, %v3503_v27  ;;  %v3493_v35 = vmul.f32 %v5920_v2, %v8572_v41  ;;  %v9263_v41 = vld [vmem:[#allocation32_spill] sm:$0xff] }
 0xa38   : >> { %v5031_v33 = vpop.f32.mrb[117].mxu0  ;;  %v4691_v38 = vcombine.low %v9263_v41, %v9262_v49 }
 0xa39   : >> { %v5032_v18 = vadd.f32 %v5031_v33, %v5030_v48  ;;  %v5033_v0 = vpop.f32.mrb[118].mxu0  ;;  %v3504_v46 = vpack.c.bf16 %v3493_v35, %v3492_v42 }
 0xa3a   : >> { %v5922_v57 = vpop.eup %5921  ;;  %v5034_v3 = vpop.f32.mrb[119].mxu0  ;;  %5293 = vmatprep.subr.bf16.mxu0 %v4691_v38 }
 0xa3b   : >> { %v5035_v5 = vadd.f32 %v5034_v3, %v5033_v0  ;;  %5283 = vmatprep.mubr.msk.bf16.mxu0 %vm1387_vm2, %v3504_v46  ;;  %v5924_v21 = vpop.eup %5923  ;;  %5294 = vmatpush3.bf16.msra.mxu0 %v4691_v38 }
 0xa3c   : >> { %v3494_v47 = vmul.f32 %v5924_v21, %v5032_v18  ;;  %v5926_v29 = vpop.eup %5925 }
 0xa3d   : >> { %v3495_v53 = vmul.f32 %v5922_v57, %v5035_v5 }
 0xa3e   : >> { %v5928_v50 = vpop.eup %5927 }
 0xa3f   : >> { %v3505_v6 = vpack.c.bf16 %v3495_v53, %v3494_v47 }
 0xa41   : >> { %5284 = vmatmul.mubr.msk.bf16.gmra.mrb[56].mxu0 %vm1387_vm2, %v3505_v6 }
 0xa68   : >> { %v3306_v61 = vpop.xlane.xlu0 %3305 }
 0xa69   : >> { %5929 = vrcp.f32 %v3306_v61 }
 0xa6a   : >> { %v3303_v34 = vpop.xlane.xlu1 %3302 }
 0xa6b   : >> { %5931 = vrcp.f32 %v3303_v34 }
 0xa6c   : >> { %v4039_v20 = vpop.xlane.xlu0 %4038 }
 0xa6d   : >> { %5933 = vrcp.f32 %v4039_v20 }
 0xa6e   : >> { %v4036_v8 = vpop.xlane.xlu1 %4035 }
 0xa6f   : >> { %5935 = vrcp.f32 %v4036_v8 }
 0xa70   : >> { %v4045_v51 = vpop.xlane.xlu0 %4044 }
 0xa71   : >> { %5937 = vrcp.f32 %v4045_v51 }
 0xa72   : >> { %v4042_v43 = vpop.xlane.xlu1 %4041 }
 0xa73   : >> { %5939 = vrcp.f32 %v4042_v43  ;;  %v5930_v9 = vpop.eup %5929 }
 0xa74   : >> { %v5036_v40 = vpop.f32.mrb[120].mxu0  ;;  %v4051_v15 = vpop.xlane.xlu0 %4050 }
 0xa75   : >> { %v5037_v1 = vpop.f32.mrb[121].mxu0  ;;  %v5932_v4 = vpop.eup %5931  ;;  %5941 = vrcp.f32 %v4051_v15 }
 0xa76   : >> { %v5038_v63 = vadd.f32 %v5037_v1, %v5036_v40  ;;  %v5039_v59 = vpop.f32.mrb[122].mxu0  ;;  %v4048_v7 = vpop.xlane.xlu1 %4047 }
 0xa77   : >> { %v5040_v24 = vpop.f32.mrb[123].mxu0  ;;  %v5934_v44 = vpop.eup %5933  ;;  %5943 = vrcp.f32 %v4048_v7 }
 0xa78   : >> { %v5041_v14 = vadd.f32 %v5040_v24, %v5039_v59  ;;  %v3496_v52 = vmul.f32 %v5926_v29, %v5038_v63  ;;  %v4057_v5 = vpop.xlane.xlu0 %4056 }
 0xa79   : >> { %v5936_v62 = vpop.eup %5935  ;;  %5945 = vrcp.f32 %v4057_v5 }
 0xa7a   : >> { %v3497_v22 = vmul.f32 %v5928_v50, %v5041_v14  ;;  %v4054_v21 = vpop.xlane.xlu1 %4053 }
 0xa7b   : >> { %v5938_v18 = vpop.eup %5937  ;;  %5947 = vrcp.f32 %v4054_v21 }
 0xa7c   : >> { %v3506_v56 = vpack.c.bf16 %v3497_v22, %v3496_v52 }
 0xa7d   : >> { %v5940_v46 = vpop.eup %5939 }
 0xa7e   : >> { %5287 = vmatprep.mubr.msk.bf16.mxu0 %vm1387_vm2, %v3506_v56 }
 0xa7f   : >> { %v5942_v49 = vpop.eup %5941 }
 0xa81   : >> { %v5944_v38 = vpop.eup %5943 }
 0xa83   : >> { %v5946_v14 = vpop.eup %5945 }
 0xa85   : >> { %v5948_v52 = vpop.eup %5947 }
 0xaa5   : >> { %v4063_v34 = vpop.xlane.xlu0 %4062 }
 0xaa6   : >> { %5949 = vrcp.f32 %v4063_v34 }
 0xaa8   : >> { %v4060_v20 = vpop.xlane.xlu1 %4059 }
 0xaa9   : >> { %5951 = vrcp.f32 %v4060_v20 }
 0xaac   : >> { %v4066_v8 = vpop.xlane.xlu1 %4065 }
 0xaad   : >> { %5953 = vrcp.f32 %v4066_v8 }
 0xaaf   : >> { %v4069_v51 = vpop.xlane.xlu0 %4068 }
 0xab0   : >> { %5955 = vrcp.f32 %v4069_v51 }
 0xab1   : >> { %v5042_v30 = vpop.f32.mrb[124].mxu0  ;;  %v5106_v23 = vpop.f32.mrb[128].mxu1 }
 0xab2   : >> { %v5043_v36 = vpop.f32.mrb[125].mxu0  ;;  %v5107_v13 = vpop.f32.mrb[129].mxu1 }
 0xab3   : >> { %v5044_v60 = vadd.f32 %v5043_v36, %v5042_v30  ;;  %v5045_v58 = vpop.f32.mrb[126].mxu0  ;;  %v5108_v54 = vadd.f32 %v5107_v13, %v5106_v23  ;;  %v5109_v19 = vpop.f32.mrb[130].mxu1 }
 0xab4   : >> { %v5046_v25 = vpop.f32.mrb[127].mxu0  ;;  %v5110_v16 = vpop.f32.mrb[131].mxu1 }
 0xab5   : >> { %v5047_v28 = vadd.f32 %v5046_v25, %v5045_v58  ;;  %v3498_v17 = vmul.f32 %v5932_v4, %v5044_v60  ;;  %v5111_v11 = vadd.f32 %v5110_v16, %v5109_v19  ;;  %v4259_v55 = vmul.f32 %v5936_v62, %v5108_v54  ;;  %v5950_v60 = vpop.eup %5949  ;;  %v4075_v19 = vpop.xlane.xlu0 %4074 }
 0xab6   : >> { %v5952_v54 = vpop.eup %5951 }
 0xab7   : >> { %v3499_v31 = vmul.f32 %v5930_v9, %v5047_v28  ;;  %v4260_v37 = vmul.f32 %v5934_v44, %v5111_v11  ;;  %v4072_v28 = vpop.xlane.xlu1 %4071  ;;  %v5954_v62 = vpop.eup %5953 }
 0xab8   : >> { %5957 = vrcp.f32 %v4072_v28 }
 0xab9   : >> { %v3507_v32 = vpack.c.bf16 %v3499_v31, %v3498_v17  ;;  %v5112_v27 = vpop.f32.mrb[132].mxu1  ;;  %v4275_v48 = vpack.c.bf16 %v4260_v37, %v4259_v55  ;;  %5959 = vrcp.f32 %v4075_v19 }
 0xaba   : >> { %v5113_v2 = vpop.f32.mrb[133].mxu1  ;;  %v5956_v7 = vpop.eup %5955 }
 0xabb   : >> { %5288 = vmatmul.mubr.msk.bf16.gmra.mrb[60].mxu0 %vm1387_vm2, %v3507_v32  ;;  %v5114_v42 = vadd.f32 %v5113_v2, %v5112_v27  ;;  %v5115_v35 = vpop.f32.mrb[134].mxu1  ;;  %v4078_v37 = vpop.xlane.xlu1 %4077 }
 0xabc   : >> { %v5116_v33 = vpop.f32.mrb[135].mxu1  ;;  %5295 = vmatprep.mubr.msk.bf16.mxu0 %vm1387_vm2, %v4275_v48  ;;  %v4081_v27 = vpop.xlane.xlu0 %4080  ;;  %5961 = vrcp.f32 %v4078_v37 }
 0xabd   : >> { %v5117_v0 = vadd.f32 %v5116_v33, %v5115_v35  ;;  %v4261_v57 = vmul.f32 %v5940_v46, %v5114_v42  ;;  %5963 = vrcp.f32 %v4081_v27  ;;  %v5976_v27 = vld [vmem:[%s7100_s27 + $0x48] sm:$0xff] }
 0xabf   : >> { %v4262_v3 = vmul.f32 %v5938_v18, %v5117_v0 }
 0xac1   : >> { %v4276_v47 = vpack.c.bf16 %v4262_v3, %v4261_v57  ;;  %v5118_v53 = vpop.f32.mrb[136].mxu1 }
 0xac2   : >> { %v5119_v10 = vpop.f32.mrb[137].mxu1  ;;  %v5958_v0 = vpop.eup %5957 }
 0xac3   : >> { %v5120_v39 = vadd.f32 %v5119_v10, %v5118_v53  ;;  %v5121_v12 = vpop.f32.mrb[138].mxu1  ;;  %5296 = vmatmul.mubr.msk.bf16.vlgmr.msra.gmra.mrb[48].mxu0 %vm1387_vm2, %v4276_v47  ;;  %v5960_v57 = vpop.eup %5959 }
 0xac4   : >> { %v5122_v6 = vpop.f32.mrb[139].mxu1 }
 0xac5   : >> { %v5123_v41 = vadd.f32 %v5122_v6, %v5121_v12  ;;  %v4263_v26 = vmul.f32 %v5944_v38, %v5120_v39 }
 0xac6   : >> { %v5962_v6 = vpop.eup %5961 }
 0xac7   : >> { %v4264_v45 = vmul.f32 %v5942_v49, %v5123_v41  ;;  %v5964_v41 = vpop.eup %5963 }
 0xac9   : >> { %v4277_v40 = vpack.c.bf16 %v4264_v45, %v4263_v26  ;;  %v5124_v1 = vpop.f32.mrb[140].mxu1 }
 0xaca   : >> { %v5125_v63 = vpop.f32.mrb[141].mxu1 }
 0xacb   : >> { %v5126_v59 = vadd.f32 %v5125_v63, %v5124_v1  ;;  %v5127_v24 = vpop.f32.mrb[142].mxu1  ;;  %5299 = vmatprep.mubr.msk.bf16.mxu0 %vm1387_vm2, %v4277_v40  ;;  %v5965_v40 = vld [vmem:[%s7100_s27 + $0x10] sm:$0xff]  ;;  %v9264_v1 = vld [vmem:[#allocation51_spill] sm:$0xff] }
 0xacc   : >> { %v5128_v29 = vpop.f32.mrb[143].mxu1  ;;  %v1373_v63 = vadd.f32 %v5965_v40, %v9264_v1 }
 0xacd   : >> { %v5129_v50 = vadd.f32 %v5128_v29, %v5127_v24  ;;  %v4265_v22 = vmul.f32 %v5948_v52, %v5126_v59  ;;  %v5966_v59 = vld [vmem:[%s7100_s27] sm:$0xff]  ;;  %v5967_v29 = vld [vmem:[%s7100_s27 + $0x18] sm:$0xff]  ;;  %v5968_v52 = vld [vmem:[%s7100_s27 + $0x8] sm:$0xff] }
 0xace   : >> { %v1371_v24 = vadd.f32 %v5966_v59, %v9264_v1 }
 0xacf   : >> { %v4266_v56 = vmul.f32 %v5946_v14, %v5129_v50  ;;  %v1374_v14 = vadd.f32 %v5967_v29, %v9264_v1 }
 0xad1   : >> { %v4278_v61 = vpack.c.bf16 %v4266_v56, %v4265_v22  ;;  %v1372_v22 = vadd.f32 %v5968_v52, %v9264_v1 }
 0xad3   : >> { %5300 = vmatmul.mubr.msk.bf16.gmra.mrb[52].mxu0 %vm1387_vm2, %v4278_v61 }
 0xaee   : >> { %v5130_v43 = vpop.f32.mrb[144].mxu1 }
 0xaef   : >> { %v5131_v30 = vpop.f32.mrb[145].mxu1 }
 0xaf0   : >> { %v5132_v23 = vadd.f32 %v5131_v30, %v5130_v43  ;;  %v5133_v36 = vpop.f32.mrb[146].mxu1  ;;  %v5969_v30 = vld [vmem:[%s7100_s27 + $0x30] sm:$0xff] }
 0xaf1   : >> { %v5134_v13 = vpop.f32.mrb[147].mxu1 }
 0xaf2   : >> { %v5135_v58 = vadd.f32 %v5134_v13, %v5133_v36  ;;  %v4267_v25 = vmul.f32 %v5952_v54, %v5132_v23  ;;  %v1377_v23 = vadd.f32 %v5969_v30, %v9264_v1  ;;  %v5970_v36 = vld [vmem:[%s7100_s27 + $0x20] sm:$0xff] }
 0xaf3   : >> { %v1375_v13 = vadd.f32 %v5970_v36, %v9264_v1 }
 0xaf4   : >> { %v4268_v9 = vmul.f32 %v5950_v60, %v5135_v58  ;;  %v5971_v60 = vld [vmem:[%s7100_s27 + $0x38] sm:$0xff] }
 0xaf5   : >> { %v1378_v58 = vadd.f32 %v5971_v60, %v9264_v1 }
 0xaf6   : >> { %v4279_v4 = vpack.c.bf16 %v4268_v9, %v4267_v25  ;;  %v5136_v16 = vpop.f32.mrb[148].mxu1  ;;  %v5972_v25 = vld [vmem:[%s7100_s27 + $0x28] sm:$0xff] }
 0xaf7   : >> { %v5137_v44 = vpop.f32.mrb[149].mxu1  ;;  %v1376_v9 = vadd.f32 %v5972_v25, %v9264_v1 }
 0xaf8   : >> { %v5138_v17 = vadd.f32 %v5137_v44, %v5136_v16  ;;  %v5139_v31 = vpop.f32.mrb[150].mxu1  ;;  %5303 = vmatprep.mubr.msk.bf16.mxu0 %vm1387_vm2, %v4279_v4 }
 0xaf9   : >> { %v5140_v11 = vpop.f32.mrb[151].mxu1 }
 0xafa   : >> { %v5141_v15 = vadd.f32 %v5140_v11, %v5139_v31  ;;  %v4269_v55 = vmul.f32 %v5954_v62, %v5138_v17  ;;  %v5973_v11 = vld [vmem:[%s7100_s27 + $0x50] sm:$0xff] }
 0xafb   : >> { %v1381_v62 = vadd.f32 %v5973_v11, %v9264_v1 }
 0xafc   : >> { %v4270_v32 = vmul.f32 %v5956_v7, %v5141_v15  ;;  %v5974_v15 = vld [vmem:[%s7100_s27 + $0x40] sm:$0xff] }
 0xafd   : >> { %v1379_v7 = vadd.f32 %v5974_v15, %v9264_v1 }
 0xafe   : >> { %v4280_v2 = vpack.c.bf16 %v4270_v32, %v4269_v55  ;;  %v5142_v48 = vpop.f32.mrb[152].mxu1  ;;  %v5975_v55 = vld [vmem:[%s7100_s27 + $0x58] sm:$0xff] }
 0xaff   : >> { %v5143_v42 = vpop.f32.mrb[153].mxu1  ;;  %v1382_v32 = vadd.f32 %v5975_v55, %v9264_v1 }
 0xb00   : >> { %v5144_v35 = vadd.f32 %v5143_v42, %v5142_v48  ;;  %v5145_v33 = vpop.f32.mrb[154].mxu1  ;;  %5304 = vmatmul.mubr.msk.bf16.gmra.mrb[56].mxu0 %vm1387_vm2, %v4280_v2  ;;  %v1380_v2 = vadd.f32 %v5976_v27, %v9264_v1 }
 0xb01   : >> { %v5146_v18 = vpop.f32.mrb[155].mxu1 }
 0xb02   : >> { %v5147_v46 = vadd.f32 %v5146_v18, %v5145_v33  ;;  %v4271_v3 = vmul.f32 %v5958_v0, %v5144_v35 }
 0xb04   : >> { %v4272_v5 = vmul.f32 %v5960_v57, %v5147_v46  ;;  %v5977_v57 = vld [vmem:[%s7100_s27 + $0x70] sm:$0xff] }
 0xb06   : >> { %v4281_v21 = vpack.c.bf16 %v4272_v5, %v4271_v3  ;;  %v5148_v47 = vpop.f32.mrb[156].mxu1  ;;  %v1385_v3 = vadd.f32 %v5977_v57, %v9264_v1  ;;  %v5978_v5 = vld [vmem:[%s7100_s27 + $0x60] sm:$0xff] }
 0xb07   : >> { %v5149_v53 = vpop.f32.mrb[157].mxu1 }
 0xb08   : >> { %v5150_v10 = vadd.f32 %v5149_v53, %v5148_v47  ;;  %v5151_v39 = vpop.f32.mrb[158].mxu1  ;;  %5307 = vmatprep.mubr.msk.bf16.mxu0 %vm1387_vm2, %v4281_v21  ;;  %v1383_v21 = vadd.f32 %v5978_v5, %v9264_v1  ;;  %v5979_v47 = vld [vmem:[%s7100_s27 + $0x78] sm:$0xff] }
 0xb09   : >> { %v5152_v12 = vpop.f32.mrb[159].mxu1  ;;  %v1386_v53 = vadd.f32 %v5979_v47, %v9264_v1 }
 0xb0a   : >> { %v5153_v49 = vadd.f32 %v5152_v12, %v5151_v39  ;;  %v4273_v38 = vmul.f32 %v5962_v6, %v5150_v10  ;;  %v5980_v39 = vld [vmem:[%s7100_s27 + $0x68] sm:$0xff]  ;;  %s4450_s27 = scalar_lea.sflag (%p1144_p3), [#allocation4], %s6501_s25 }
 0xb0b   : >> { %v1384_v12 = vadd.f32 %v5980_v39, %v9264_v1 }
 0xb0c   : >> { %v4274_v26 = vmul.f32 %v5964_v41, %v5153_v49 }
 0xb0e   : >> { %v4282_v45 = vpack.c.bf16 %v4274_v26, %v4273_v38 }
 0xb10   : >> { %5308 = vmatmul.mubr.msk.bf16.gmra.mrb[60].mxu0 %vm1387_vm2, %v4282_v45 }
 0xb96   : >> { %v5297_v50 = vpop.f32.mrb[48].mxu0 }
 0xb97   : >> { %v5351_v56 = vadd.f32 %v5297_v50, %v1373_v63  ;;  %v4353_v61 = vpop.f32.mrb[49].mxu0 }
 0xb98   : >> { %v5352_v34 = vadd.f32 %v4353_v61, %v1371_v24  ;;  %v5298_v20 = vpop.f32.mrb[50].mxu0 }
 0xb99   : >> { %4435 = vst [vmem:[%s8637_s18 + $0x10] sm:$0xff] %v5351_v56  ;;  %v5353_v8 = vadd.f32 %v5298_v20, %v1374_v14  ;;  %v4356_v51 = vpop.f32.mrb[51].mxu0 }
 0xb9a   : >> { %4433 = vst [vmem:[%s8637_s18] sm:$0xff] %v5352_v34  ;;  %v5354_v43 = vadd.f32 %v4356_v51, %v1372_v22 }
 0xb9b   : >> { %4436 = vst [vmem:[%s8637_s18 + $0x18] sm:$0xff] %v5353_v8 }
 0xb9c   : >> { %4434 = vst [vmem:[%s8637_s18 + $0x8] sm:$0xff] %v5354_v43 }
 0xba6   : >> { %v5301_v54 = vpop.f32.mrb[52].mxu0 }
 0xba7   : >> { %v5355_v28 = vadd.f32 %v5301_v54, %v1377_v23  ;;  %v4369_v19 = vpop.f32.mrb[53].mxu0 }
 0xba8   : >> { %v5356_v4 = vadd.f32 %v4369_v19, %v1375_v13  ;;  %v5302_v16 = vpop.f32.mrb[54].mxu0 }
 0xba9   : >> { %4439 = vst [vmem:[%s8637_s18 + $0x30] sm:$0xff] %v5355_v28  ;;  %v5357_v44 = vadd.f32 %v5302_v16, %v1378_v58  ;;  %v4372_v17 = vpop.f32.mrb[55].mxu0 }
 0xbaa   : >> { %4437 = vst [vmem:[%s8637_s18 + $0x20] sm:$0xff] %v5356_v4  ;;  %v5358_v31 = vadd.f32 %v4372_v17, %v1376_v9 }
 0xbab   : >> { %4440 = vst [vmem:[%s8637_s18 + $0x38] sm:$0xff] %v5357_v44 }
 0xbac   : >> { %4438 = vst [vmem:[%s8637_s18 + $0x28] sm:$0xff] %v5358_v31 }
 0xbd3   : >> { %v5305_v37 = vpop.f32.mrb[56].mxu0 }
 0xbd4   : >> { %v5359_v48 = vadd.f32 %v5305_v37, %v1381_v62  ;;  %v4385_v42 = vpop.f32.mrb[57].mxu0 }
 0xbd5   : >> { %v5360_v35 = vadd.f32 %v4385_v42, %v1379_v7  ;;  %v5306_v33 = vpop.f32.mrb[58].mxu0 }
 0xbd6   : >> { %4443 = vst [vmem:[%s8637_s18 + $0x50] sm:$0xff] %v5359_v48  ;;  %v5361_v18 = vadd.f32 %v5306_v33, %v1382_v32  ;;  %v4388_v0 = vpop.f32.mrb[59].mxu0 }
 0xbd7   : >> { %4441 = vst [vmem:[%s8637_s18 + $0x40] sm:$0xff] %v5360_v35  ;;  %v5362_v46 = vadd.f32 %v4388_v0, %v1380_v2 }
 0xbd8   : >> { %4444 = vst [vmem:[%s8637_s18 + $0x58] sm:$0xff] %v5361_v18 }
 0xbd9   : >> { %4442 = vst [vmem:[%s8637_s18 + $0x48] sm:$0xff] %v5362_v46 }
 0xbe3   : >> { %v5309_v10 = vpop.f32.mrb[60].mxu0  ;;  %1146 = sbr.rel (!%p1144_p3) target bundleno = 800 (0x320), region = 130 }
 0xbe4   : >> { %v5363_v6 = vadd.f32 %v5309_v10, %v1385_v3  ;;  %v4401_v49 = vpop.f32.mrb[61].mxu0 }
 0xbe5   : >> { %v5364_v41 = vadd.f32 %v4401_v49, %v1383_v21  ;;  %v5310_v38 = vpop.f32.mrb[62].mxu0 }
 0xbe6   : >> { %4447 = vst [vmem:[%s8637_s18 + $0x70] sm:$0xff] %v5363_v6  ;;  %v5365_v26 = vadd.f32 %v5310_v38, %v1386_v53  ;;  %v4404_v45 = vpop.f32.mrb[63].mxu0 }
 0xbe7   : >> { %4445 = vst [vmem:[%s8637_s18 + $0x60] sm:$0xff] %v5364_v41  ;;  %v5366_v40 = vadd.f32 %v4404_v45, %v1384_v12 }
 0xbe8   : >> { %4448 = vst [vmem:[%s8637_s18 + $0x78] sm:$0xff] %v5365_v26 }
 0xbe9   : >> { %4446 = vst [vmem:[%s8637_s18 + $0x68] sm:$0xff] %v5366_v40 }
 0xbea   : > { %6136 = shalt.err (!%p6133_p9)
}
 0xbeb   : > { %s6137_s7 = scalar_lea.hbm %s8688_s21, 4096  ;;  %s6141_s12 = scalar_lea.hbm %s9266_s24, 8192 }
 0xbec   : > { %p6138_p0 = scmp.ne.s32.totalorder %s8688_s21, %s6137_s7  ;;  %p6142_p8 = scmp.lt.u32.totalorder %s8688_s21, %s9266_s24 }
 0xbed   : > { %p6143_p6 = scmp.lt.u32.totalorder %s6141_s12, %s6137_s7  ;;  %p6145_p5 = scmp.lt.u32.totalorder %s6137_s7, %s8688_s21 }
 0xbee   : > { %p6139_p11 = pnand %p6138_p0, %p6446_p10 }
 0xbef   : > { %p6144_p3 = por %p6143_p6, %p6142_p8 }
 0xbf0   : > { %p6140_p4 = pneg %p6139_p11 }
 0xbf1   : > { %p6146_p7 = por %p6145_p5, %p6144_p3 }
 0xbf3   : > { %p6147_p12 = pnand %p6146_p7, %p6140_p4 }
 0xbf5   : > { %6150 = shalt.err (!%p6147_p12)
}
 0xbf6   : > { %s6224_s13 = smov 128   ;;  %s6225_s23 = smov 8  }
 0xbf7   : > { %5465 = dma.vmem_to_hbm [thread:$0]  (%p6446_p10), %s8691_s26, 4096, %s8688_s21, %s4450_s27, %s6224_s13, %s6224_s13, %s6225_s23  }
 0xbf8 PF: > { %s9267_s28 = sld [smem:[#allocation16_spill]]  ;;  %s9268_s19 = sld [smem:[#allocation17_spill]] }
 0xbf9   : > { %p9270_p2 = scmp.ge.s32.totalorder %s6201_s16, 2 }
 0xbfe   : > { %s4478_s17 = sand.u32 1, %s9267_s28   ;;  %p9269_p1 = scmp.ne.s32.totalorder %s9268_s19, 0 }
 0xbff   : > { %s4479_s7 = scalar_lea.sflag [#allocation4], %s4478_s17 }
 0xc00   : > { %p5485_p13 = pnand %p9270_p2, %p9269_p1 }
 0xc02   : > { %6184 = dma.done.wait (!%p5485_p13), %s4479_s7, 4096  }
 0xc03   : > { %6186 = vsyncadd (!%p5485_p13), %s4479_s7, 4294963200  ;;  %p25_p9 = scmp.ge.s32.totalorder %s6436_s22, 4   ;;  %s9271_s13 = smov %s6193_s14 }
 0xc04   : > { %s9272_s14 = smov %s6197_s15  ;;  %s9273_s15 = smov %s6452_s20 }
 0xc05   : > { %s9274_s16 = smov %s6436_s22  ;;  %27 = sbr.rel (!%p25_p9) target bundleno = 10 (0xa), region = 141 }
 0xc0c   :  { %4484 = vsyncpa [#allocation3], 1 }
 0xc0d   :  { %4486 = vsyncpa [#allocation3 + $0x1], 1 }
 0xc0e   :  { %4487 = vsyncpa [#allocation6], 1 }
 0xc0f   :  { %4488 = vsyncpa [#allocation9], 1 }
 0xc10   :  { %4489 = vsyncpa [#allocation4], 1 }
 0xc11   :  { %4491 = vsyncpa [#allocation4 + $0x1], 1 }

</bundles_post_ra>
